<compile_context>
chip_gen: v5e
topology: v5e:2x2
jax: 0.10.0
libtpu: 0.0.40
codegen_flags: <defaults>
</compile_context>

<pallas_src>
import jax
import jax.numpy as jnp
from jax import lax
from jax.experimental import pallas as pl
from jax.experimental.pallas import tpu as pltpu
import numpy as np


# ----------------------------------------------------------------------------
# Helpers
# ----------------------------------------------------------------------------
def _round_up(x, m):
    return ((x + m - 1) // m) * m


def _vmem_capacity_bytes():
    try:
        cap = int(pltpu.get_tpu_info().vmem_capacity_bytes)
        return max(cap, 32 * 1024 * 1024)
    except Exception:
        return 64 * 1024 * 1024            # conservative: v7x per-TensorCore VMEM


def _vmem_limit_bytes():
    # Leave headroom for compiler-internal scratch; cap well below physical VMEM.
    return min(int(_vmem_capacity_bytes() * 0.75), 96 * 1024 * 1024)


def _pad_gate_cols(w, H, Hp):
    """(rows, 4H) -> (rows, 4Hp) with gate k's columns at [k*Hp, k*Hp+H)."""
    rows = w.shape[0]
    out = jnp.zeros((rows, 4 * Hp), jnp.float32)
    for k in range(4):
        out = out.at[:, k * Hp:k * Hp + H].set(w[:, k * H:(k + 1) * H])
    return out


def _pad_rows(w, rows_pad):
    return jnp.zeros((rows_pad, w.shape[1]), w.dtype).at[:w.shape[0]].set(w)


def _pick_t_chunk(T, b_tile, Hp, stream_dims, gx_dtype, act_dtype, budget_bytes):
    """Largest divisor of T whose per-chunk VMEM working set fits the budget."""
    gx_b = jnp.dtype(gx_dtype).itemsize
    act_b = jnp.dtype(act_dtype).itemsize

    def est(tc):
        per_t = b_tile * (
            2 * sum(stream_dims) * 2 * act_b      # fwd+bwd input blocks, double-buffered
            + 2 * Hp * 2 * act_b                  # fwd+bwd output blocks, double-buffered
            + 2 * 4 * Hp * gx_b)                  # hoisted gate-projection scratch
        fixed = 2 * (2 * b_tile) * Hp * 4         # h/c recurrent state
        return tc * per_t + fixed

    best = 1
    for tc in range(1, T + 1):
        if T % tc == 0 and est(tc) <= budget_bytes:
            best = tc
    return best


# ----------------------------------------------------------------------------
# Fused bidirectional LSTM layer kernel (both directions share one time loop,
# one fused matmul and one set of gate ops per step).
# ----------------------------------------------------------------------------
def _make_bilstm_kernel(n_streams, t_chunk, b_tile, hidden_pad, unroll):
    Hp = hidden_pad
    Bt = b_tile
    n_in = 4 * n_streams + 3

    def kernel(*refs):
        xf_refs = refs[0:n_streams]
        xb_refs = refs[n_streams:2 * n_streams]
        wf_refs = refs[2 * n_streams:3 * n_streams]
        wb_refs = refs[3 * n_streams:4 * n_streams]
        whh_ref = refs[4 * n_streams + 0]
        bf_ref = refs[4 * n_streams + 1]
        bb_ref = refs[4 * n_streams + 2]
        outf_ref = refs[n_in + 0]
        outb_ref = refs[n_in + 1]
        gxf_scr, gxb_scr, h_scr, c_scr = refs[n_in + 2:]

        # Recurrent state is zeroed at the first time chunk of each batch tile
        # and persists in VMEM scratch across the serial time-chunk grid axis.
        @pl.when(pl.program_id(1) == 0)
        def _init():
            h_scr[...] = jnp.zeros_like(h_scr)
            c_scr[...] = jnp.zeros_like(c_scr)

        # ---- hoisted input projection: one big MXU matmul per direction ----
        gf = bf_ref[...]                                    # (1, 4Hp) f32, broadcasts
        gb = bb_ref[...]
        for s in range(n_streams):
            wf = wf_refs[s][...]
            wb = wb_refs[s][...]
            xf2 = xf_refs[s][...].reshape(t_chunk * Bt, -1).astype(wf.dtype)
            xb2 = xb_refs[s][...].reshape(t_chunk * Bt, -1).astype(wb.dtype)
            gf = gf + jnp.dot(xf2, wf, preferred_element_type=jnp.float32)
            gb = gb + jnp.dot(xb2, wb, preferred_element_type=jnp.float32)
        gxf_scr[...] = gf.reshape(t_chunk, Bt, 4 * Hp).astype(gxf_scr.dtype)
        gxb_scr[...] = gb.reshape(t_chunk, Bt, 4 * Hp).astype(gxb_scr.dtype)

        # Direction-stacked recurrent weight (2Hp, 4Hp), loaded once per chunk.
        # TODO(synk): keep it MXU-resident for the whole chunk via
        # pltpu.matmul_push_rhs / matmul_acc_lhs / matmul_pop.
        whh = whh_ref[...]

        # Block-diagonal mask so the fused (2Bt, 2Hp) @ (2Hp, 4Hp) matmul keeps
        # the two directions independent (hoisted out of the step loop).
        top = lax.broadcasted_iota(jnp.int32, (2 * Bt, 1), 0) < Bt
        ones = jnp.ones((2 * Bt, Hp), jnp.float32)
        diag_mask = jnp.concatenate(
            [jnp.where(top, ones, 0.0), jnp.where(top, 0.0, ones)], axis=-1)

        def step(t, carry):
            tb = t_chunk - 1 - t
            # Direction-stacked precomputed gate inputs for this step.
            gx = jnp.concatenate([gxf_scr[t], gxb_scr[tb]], axis=0)
            gx = gx.astype(jnp.float32)                      # (2Bt, 4Hp)
            h = h_scr[...]                                   # (2Bt, Hp)
            lhs = (jnp.concatenate([h, h], axis=-1) * diag_mask).astype(whh.dtype)
            gates = gx + jnp.dot(lhs, whh, preferred_element_type=jnp.float32)
            # PyTorch gate order: i, f, g, o.  Each slice is lane-aligned
            # because Hp is a multiple of 128.
            i_g = jax.nn.sigmoid(gates[:, 0 * Hp:1 * Hp])
            f_g = jax.nn.sigmoid(gates[:, 1 * Hp:2 * Hp])
            g_g = jnp.tanh(gates[:, 2 * Hp:3 * Hp])
            o_g = jax.nn.sigmoid(gates[:, 3 * Hp:4 * Hp])
            c_new = f_g * c_scr[...] + i_g * g_g
            h_new = o_g * jnp.tanh(c_new)
            c_scr[...] = c_new
            h_scr[...] = h_new
            outf_ref[t] = h_new[:Bt].astype(outf_ref.dtype)
            outb_ref[tb] = h_new[Bt:].astype(outb_ref.dtype)
            return carry

        lax.fori_loop(0, t_chunk, step, 0, unroll=min(unroll, t_chunk))

    return kernel


def bilstm_layer(x_streams, stream_true_dims, fwd_params, bwd_params, *,
                 hidden, hidden_pad, t_chunk=None, b_tile=None,
                 matmul_dtype=jnp.bfloat16, gx_dtype=jnp.float32, unroll=4):
    """One bidirectional LSTM layer over feature 'streams'.

    x_streams:        list of (T, Bp, Ds) arrays whose feature concat (using the
                      first stream_true_dims[s] features of each) is the layer input.
    stream_true_dims: number of valid (non-padding) features per stream.
    *_params:         (w_ih, w_hh, b_ih, b_hh) in PyTorch layout.
    Returns (out_f, out_b), each (T, Bp, Hp) in matmul_dtype with exact zeros
    in the padded lanes [hidden, hidden_pad).
    """
    T, Bp, _ = x_streams[0].shape
    H, Hp = hidden, hidden_pad
    n_streams = len(x_streams)

    if b_tile is None:
        # TODO(synk): pick Bp // num_cores on multi-TensorCore parts (v7x) so the
        # leading "parallel" grid axis spreads the batch across cores.
        b_tile = Bp
    assert Bp % b_tile == 0 and b_tile % 8 == 0
    n_b = Bp // b_tile

    # ---- weights, padded into the lane-aligned internal layout --------------
    def split_wih(w_ih):
        w_t = jnp.asarray(w_ih, jnp.float32).T                  # (sum true dims, 4H)
        pieces, off = [], 0
        for xs, d_true in zip(x_streams, stream_true_dims):
            piece = _pad_gate_cols(w_t[off:off + d_true], H, Hp)
            piece = _pad_rows(piece, xs.shape[-1]).astype(matmul_dtype)
            pieces.append(piece)
            off += d_true
        return pieces

    def pad_whh(w_hh):
        w_t = jnp.asarray(w_hh, jnp.float32).T                  # (H, 4H)
        return _pad_rows(_pad_gate_cols(w_t, H, Hp), Hp)        # (Hp, 4Hp)

    def pad_bias(b_ih, b_hh):
        b = (jnp.asarray(b_ih, jnp.float32)
             + jnp.asarray(b_hh, jnp.float32)).reshape(1, 4 * H)
        return _pad_gate_cols(b, H, Hp)                         # (1, 4Hp) f32

    wf_pieces = split_wih(fwd_params[0])
    wb_pieces = split_wih(bwd_params[0])
    whh_s = jnp.concatenate([pad_whh(fwd_params[1]), pad_whh(bwd_params[1])],
                            axis=0).astype(matmul_dtype)        # (2Hp, 4Hp)
    b_f = pad_bias(fwd_params[2], fwd_params[3])
    b_b = pad_bias(bwd_params[2], bwd_params[3])

    # ---- generation-aware chunking ------------------------------------------
    vmem_limit = _vmem_limit_bytes()
    if t_chunk is None or t_chunk > T:
        t_chunk = _pick_t_chunk(T, b_tile, Hp,
                                [xs.shape[-1] for xs in x_streams],
                                gx_dtype, x_streams[0].dtype,
                                int(vmem_limit * 0.8))
    assert T % t_chunk == 0, "seq_len must be divisible by t_chunk"
    n_chunks = T // t_chunk

    in_specs = []
    # forward-time chunk c of each stream
    for xs in x_streams:
        in_specs.append(pl.BlockSpec((t_chunk, b_tile, xs.shape[-1]),
                                     lambda b, c: (c, b, 0)))
    # reverse-order chunk (n_chunks-1-c) of each stream (bwd direction)
    for xs in x_streams:
        in_specs.append(pl.BlockSpec((t_chunk, b_tile, xs.shape[-1]),
                                     lambda b, c: (n_chunks - 1 - c, b, 0)))
    # Weights / biases: full blocks with constant index maps (fetched once).
    # TODO(synk): single-buffer these invariant blocks (pipeline_mode=pl.Buffered(1)).
    for w in wf_pieces + wb_pieces + [whh_s, b_f, b_b]:
        in_specs.append(pl.BlockSpec(w.shape, lambda b, c: (0, 0)))

    out_specs = (
        pl.BlockSpec((t_chunk, b_tile, Hp), lambda b, c: (c, b, 0)),
        pl.BlockSpec((t_chunk, b_tile, Hp), lambda b, c: (n_chunks - 1 - c, b, 0)),
    )
    out_dtype = jnp.dtype(matmul_dtype)

    kernel = _make_bilstm_kernel(n_streams, t_chunk, b_tile, Hp, unroll)

    out_f, out_b = pl.pallas_call(
        kernel,
        out_shape=(jax.ShapeDtypeStruct((T, Bp, Hp), out_dtype),
                   jax.ShapeDtypeStruct((T, Bp, Hp), out_dtype)),
        grid=(n_b, n_chunks),
        in_specs=in_specs,
        out_specs=out_specs,
        scratch_shapes=[
            pltpu.VMEM((t_chunk, b_tile, 4 * Hp), jnp.dtype(gx_dtype)),  # gx fwd
            pltpu.VMEM((t_chunk, b_tile, 4 * Hp), jnp.dtype(gx_dtype)),  # gx bwd
            pltpu.VMEM((2 * b_tile, Hp), jnp.float32),     # h (fwd|bwd stacked)
            pltpu.VMEM((2 * b_tile, Hp), jnp.float32),     # c (fwd|bwd stacked)
        ],
        compiler_params=pltpu.CompilerParams(
            dimension_semantics=("parallel", "arbitrary"),
            vmem_limit_bytes=vmem_limit),
    )(*(list(x_streams) + list(x_streams)
        + wf_pieces + wb_pieces + [whh_s, b_f, b_b]))
    return out_f, out_b


# ----------------------------------------------------------------------------
# Attention pooling + classifier kernel: tiled over time with an online softmax
# so VMEM stays bounded independent of T.
# ----------------------------------------------------------------------------
def _attn_cls_kernel(xf_ref, xb_ref, watt_ref, batt_ref, w1_ref, b1_ref,
                     w2_ref, b2_ref, out_ref, m_scr, l_scr, accf_scr, accb_scr):
    c = pl.program_id(0)
    Tc, Bp, Hp = xf_ref.shape

    @pl.when(c == 0)
    def _init():
        m_scr[...] = jnp.full_like(m_scr, -jnp.inf)
        l_scr[...] = jnp.zeros_like(l_scr)
        accf_scr[...] = jnp.zeros_like(accf_scr)
        accb_scr[...] = jnp.zeros_like(accb_scr)

    xf = xf_ref[...]
    xb = xb_ref[...]
    watt = watt_ref[...]                                          # (2Hp, 1)
    # Single MXU push on the lane-concatenated (fwd|bwd) activations.
    xcat = jnp.concatenate([xf.reshape(Tc * Bp, Hp),
                            xb.reshape(Tc * Bp, Hp)], axis=-1).astype(watt.dtype)
    s = jnp.dot(xcat, watt, preferred_element_type=jnp.float32)   # (Tc*Bp, 1)
    scores = jnp.tanh(s + batt_ref[0, 0]).reshape(Tc, Bp, 1)

    # Online softmax over time (leading axis -> cheap per-vreg reductions).
    m_prev = m_scr[...]
    m_new = jnp.maximum(m_prev, jnp.max(scores, axis=0))          # (Bp, 1)
    alpha = jnp.exp(m_prev - m_new)
    e = jnp.exp(scores - m_new[None])                             # (Tc, Bp, 1)
    l_scr[...] = alpha * l_scr[...] + jnp.sum(e, axis=0)
    accf_scr[...] = alpha * accf_scr[...] + jnp.sum(xf.astype(jnp.float32) * e, axis=0)
    accb_scr[...] = alpha * accb_scr[...] + jnp.sum(xb.astype(jnp.float32) * e, axis=0)
    m_scr[...] = m_new

    @pl.when(c == pl.num_programs(0) - 1)
    def _finish():
        l = l_scr[...]
        inv = pl.reciprocal(l, approx=True)        # EUP slot (otherwise idle)
        inv = inv * (2.0 - l * inv)                # one Newton step -> ~f32 accuracy
        pooled = jnp.concatenate([accf_scr[...], accb_scr[...]], axis=-1) * inv
        w1 = w1_ref[...]
        h1 = jnp.dot(pooled.astype(w1.dtype), w1,
                     preferred_element_type=jnp.float32) + b1_ref[...]
        h1 = jnp.maximum(h1, 0.0)                  # ReLU; Dropout = identity (inference)
        w2 = w2_ref[...]
        out_ref[...] = (jnp.dot(h1.astype(w2.dtype), w2,
                                preferred_element_type=jnp.float32)
                        + b2_ref[0, 0]).astype(out_ref.dtype)


def attention_classifier(xf, xb, att_w, att_b, w1, b1, w2, b2, *,
                         hidden, hidden_pad, t_chunk=None,
                         matmul_dtype=jnp.bfloat16):
    T, Bp, Hp = xf.shape
    H = hidden
    Dd = w1.shape[0]
    Ddp = _round_up(Dd, 128)

    watt = jnp.asarray(att_w, jnp.float32).reshape(2 * H)
    watt_s = jnp.zeros((2 * Hp, 1), jnp.float32)
    watt_s = watt_s.at[:H, 0].set(watt[:H]).at[Hp:Hp + H, 0].set(watt[H:])
    watt_s = watt_s.astype(matmul_dtype)
    batt = jnp.asarray(att_b, jnp.float32).reshape(1, 1)

    w1_t = jnp.asarray(w1, jnp.float32).T                         # (2H, Dd)
    w1_s = jnp.zeros((2 * Hp, Ddp), jnp.float32)
    w1_s = w1_s.at[:H, :Dd].set(w1_t[:H]).at[Hp:Hp + H, :Dd].set(w1_t[H:])
    w1_s = w1_s.astype(matmul_dtype)
    b1_p = jnp.zeros((1, Ddp), jnp.float32).at[0, :Dd].set(jnp.asarray(b1, jnp.float32))
    w2_p = jnp.zeros((Ddp, 1), jnp.float32).at[:Dd, 0].set(
        jnp.asarray(w2, jnp.float32).reshape(Dd)).astype(matmul_dtype)
    b2_p = jnp.asarray(b2, jnp.float32).reshape(1, 1)

    if t_chunk is None or t_chunk > T:
        budget = min(8 * 1024 * 1024, int(_vmem_limit_bytes() * 0.25))
        per_t = 2 * Bp * Hp * jnp.dtype(xf.dtype).itemsize * 2
        t_chunk = 1
        for tc in range(1, T + 1):
            if T % tc == 0 and tc * per_t <= budget:
                t_chunk = tc
    assert T % t_chunk == 0
    n_chunks = T // t_chunk

    return pl.pallas_call(
        _attn_cls_kernel,
        out_shape=jax.ShapeDtypeStruct((Bp, 1), jnp.float32),
        grid=(n_chunks,),
        in_specs=[
            pl.BlockSpec((t_chunk, Bp, Hp), lambda c: (c, 0, 0)),
            pl.BlockSpec((t_chunk, Bp, Hp), lambda c: (c, 0, 0)),
            pl.BlockSpec(watt_s.shape, lambda c: (0, 0)),
            pl.BlockSpec(memory_space=pltpu.MemorySpace.SMEM),    # attention bias scalar
            pl.BlockSpec(w1_s.shape, lambda c: (0, 0)),
            pl.BlockSpec(b1_p.shape, lambda c: (0, 0)),
            pl.BlockSpec(w2_p.shape, lambda c: (0, 0)),
            pl.BlockSpec(memory_space=pltpu.MemorySpace.SMEM),    # classifier bias scalar
        ],
        out_specs=pl.BlockSpec((Bp, 1), lambda c: (0, 0)),
        scratch_shapes=[
            pltpu.VMEM((Bp, 1), jnp.float32),       # running max
            pltpu.VMEM((Bp, 1), jnp.float32),       # running denominator
            pltpu.VMEM((Bp, Hp), jnp.float32),      # pooled fwd accumulator
            pltpu.VMEM((Bp, Hp), jnp.float32),      # pooled bwd accumulator
        ],
        compiler_params=pltpu.CompilerParams(
            dimension_semantics=("arbitrary",),
            vmem_limit_bytes=_vmem_limit_bytes()),
    )(xf, xb, watt_s, batt, w1_s, b1_p, w2_p, b2_p)


# ----------------------------------------------------------------------------
# Full module forward.
# ----------------------------------------------------------------------------
def stack_attention_lstm_forward(x, params, *, t_chunk=None,
                                 matmul_dtype=jnp.bfloat16,
                                 gx_dtype=jnp.float32, unroll=4):
    """x: (B, T, input_size), batch_first like the PyTorch module."""
    B, T, Din = x.shape
    H = params["lstm"][0]["fwd"][1].shape[1]
    Bp = _round_up(B, 8)        # sublane-pad the batch once, up front
    Hp = _round_up(H, 128)      # lane-pad the per-direction hidden width

    x_tbd = jnp.transpose(x.astype(jnp.float32), (1, 0, 2))          # (T, B, Din)
    if Bp != B:
        x_tbd = jnp.pad(x_tbd, ((0, 0), (0, Bp - B), (0, 0)))
    x_tbd = x_tbd.astype(matmul_dtype)

    streams, true_dims = [x_tbd], [Din]
    for layer in range(2):                                           # num_layers = 2
        p = params["lstm"][layer]
        out_f, out_b = bilstm_layer(streams, true_dims, p["fwd"], p["bwd"],
                                    hidden=H, hidden_pad=Hp, t_chunk=t_chunk,
                                    matmul_dtype=matmul_dtype, gx_dtype=gx_dtype,
                                    unroll=unroll)
        streams, true_dims = [out_f, out_b], [H, H]
        # TODO(synk): inter-layer gru_dropout is identity at inference.

    # TODO(synk): fusing the attention epilogue into the layer-2 kernel would avoid
    # the HBM round trip of its outputs, but with the fused fwd/bwd time loop the two
    # directions' chunks cover different time windows, so the per-time score (which
    # needs both) cannot be formed in that same pass.
    out_p = attention_classifier(streams[0], streams[1],
                                 params["att_w"], params["att_b"],
                                 params["cls_w1"], params["cls_b1"],
                                 params["cls_w2"], params["cls_b2"],
                                 hidden=H, hidden_pad=Hp, t_chunk=t_chunk,
                                 matmul_dtype=matmul_dtype)
    return out_p[:B]


# ----------------------------------------------------------------------------
# Pure-JAX reference (for sanity checking the kernels).
# ----------------------------------------------------------------------------
def reference_forward(x, params):
    def lstm_dir(seq, w_ih, w_hh, b_ih, b_hh):      # seq: (T, B, Din)
        H = w_hh.shape[1]
        def step(carry, x_t):
            h, c = carry
            g = x_t @ w_ih.T + h @ w_hh.T + b_ih + b_hh
            i = jax.nn.sigmoid(g[:, :H]); f = jax.nn.sigmoid(g[:, H:2*H])
            gg = jnp.tanh(g[:, 2*H:3*H]); o = jax.nn.sigmoid(g[:, 3*H:4*H])
            c = f * c + i * gg; h = o * jnp.tanh(c)
            return (h, c), h
        B = seq.shape[1]
        init = (jnp.zeros((B, H)), jnp.zeros((B, H)))
        _, hs = lax.scan(step, init, seq)
        return hs

    seq = jnp.transpose(x.astype(jnp.float32), (1, 0, 2))
    for layer in range(2):
        p = params["lstm"][layer]
        f = lstm_dir(seq, *p["fwd"])
        b = lstm_dir(seq[::-1], *p["bwd"])[::-1]
        seq = jnp.concatenate([f, b], axis=-1)
    xo = jnp.transpose(seq, (1, 0, 2))                               # (B, T, 2H)
    scores = jnp.tanh(jnp.einsum("btd,d->bt", xo, params["att_w"].reshape(-1))
                      + params["att_b"][0])
    att = jax.nn.softmax(scores, axis=1)
    pooled = jnp.sum(xo * att[:, :, None], axis=1)
    h1 = jnp.maximum(pooled @ params["cls_w1"].T + params["cls_b1"], 0.0)
    return h1 @ params["cls_w2"].T + params["cls_b2"]


# ----------------------------------------------------------------------------
def make_params(key, input_size, hidden_size, dense_output):
    keys = iter(jax.random.split(key, 64))
    def rnd(shape, scale=0.1):
        return (scale * jax.random.normal(next(keys), shape)).astype(jnp.float32)

    H = hidden_size
    params = {"lstm": []}
    in_sizes = [input_size, 2 * H]
    for layer in range(2):
        Din = in_sizes[layer]
        params["lstm"].append({
            "fwd": (rnd((4 * H, Din)), rnd((4 * H, H)), rnd((4 * H,)), rnd((4 * H,))),
            "bwd": (rnd((4 * H, Din)), rnd((4 * H, H)), rnd((4 * H,)), rnd((4 * H,))),
        })
    D2 = 2 * H
    params["att_w"] = rnd((1, D2))          # Attention Linear(D2 -> 1)
    params["att_b"] = jnp.zeros((1,), jnp.float32)
    params["cls_w1"] = rnd((dense_output, D2))
    params["cls_b1"] = rnd((dense_output,))
    params["cls_w2"] = rnd((1, dense_output))
    params["cls_b2"] = rnd((1,))
    return params


if __name__ == "__main__":
    B, T = 2, 8                 # batch, seq_len
    input_size = 16
    hidden_size = 32            # bidirectional output feature = 64
    dense_output = 32

    key = jax.random.PRNGKey(0)
    k_x, k_p = jax.random.split(key)
    x = jax.random.normal(k_x, (B, T, input_size), dtype=jnp.float32)
    params = make_params(k_p, input_size, hidden_size, dense_output)

    # f32 path (checked against the pure-JAX reference); t_chunk=4 exercises the
    # multi-chunk recurrence and the multi-chunk online-softmax attention.
    out = stack_attention_lstm_forward(x, params, t_chunk=4,
                                       matmul_dtype=jnp.float32,
                                       gx_dtype=jnp.float32)
    out = jax.block_until_ready(out)
    ref = jax.block_until_ready(reference_forward(x, params))
    assert out.shape == (B, 1)
    np.testing.assert_allclose(np.asarray(out), np.asarray(ref), rtol=1e-3, atol=1e-3)

    # Default fast path: bf16 matmul operands + bf16 hoisted gate projections
    # (f32 accumulation / gate math kept). Looser numerics; checked for sanity only.
    out_bf16 = stack_attention_lstm_forward(x, params, t_chunk=4,
                                            matmul_dtype=jnp.bfloat16,
                                            gx_dtype=jnp.bfloat16)
    out_bf16 = jax.block_until_ready(out_bf16)
    assert out_bf16.shape == (B, 1)
    assert bool(jnp.all(jnp.isfinite(out_bf16)))

    print("KERNEL_OK")
</pallas_src>

<mosaic_0001>
module attributes {stable_mosaic.version = 11 : i64} {
  func.func @kernel(%arg0: i32, %arg1: i32, %arg2: memref<4x8x16xf32, #tpu.memory_space<vmem>>, %arg3: memref<4x8x16xf32, #tpu.memory_space<vmem>>, %arg4: memref<16x512xf32, #tpu.memory_space<vmem>>, %arg5: memref<16x512xf32, #tpu.memory_space<vmem>>, %arg6: memref<256x512xf32, #tpu.memory_space<vmem>>, %arg7: memref<1x512xf32, #tpu.memory_space<vmem>>, %arg8: memref<1x512xf32, #tpu.memory_space<vmem>>, %arg9: memref<4x8x128xf32, #tpu.memory_space<vmem>>, %arg10: memref<4x8x128xf32, #tpu.memory_space<vmem>>, %arg11: memref<4x8x512xf32, #tpu.memory_space<vmem>>, %arg12: memref<4x8x512xf32, #tpu.memory_space<vmem>>, %arg13: memref<16x128xf32, #tpu.memory_space<vmem>>, %arg14: memref<16x128xf32, #tpu.memory_space<vmem>>) attributes {dimension_semantics = [#tpu.dimension_semantics<parallel>, #tpu.dimension_semantics<arbitrary>], iteration_bounds = array<i64: 1, 2>, scalar_prefetch = 0 : i64, scratch_operands = 4 : i64, tpu.core_type = #tpu.core_type<tc>, window_params = [{transform_indices = @transform_0, window_bounds = array<i64: 4, 8, 16>}, {transform_indices = @transform_1, window_bounds = array<i64: 4, 8, 16>}, {pipeline_mode = #tpu.pipeline_mode<synchronous>, transform_indices = @transform_2, window_bounds = array<i64: 16, 512>}, {pipeline_mode = #tpu.pipeline_mode<synchronous>, transform_indices = @transform_3, window_bounds = array<i64: 16, 512>}, {pipeline_mode = #tpu.pipeline_mode<synchronous>, transform_indices = @transform_4, window_bounds = array<i64: 256, 512>}, {pipeline_mode = #tpu.pipeline_mode<synchronous>, transform_indices = @transform_5, window_bounds = array<i64: 1, 512>}, {pipeline_mode = #tpu.pipeline_mode<synchronous>, transform_indices = @transform_6, window_bounds = array<i64: 1, 512>}, {transform_indices = @transform_7, window_bounds = array<i64: 4, 8, 128>}, {transform_indices = @transform_8, window_bounds = array<i64: 4, 8, 128>}]} {
    %c0_i32 = arith.constant 0 : i32
    %0 = arith.cmpi eq, %arg1, %c0_i32 : i32
    %1 = arith.extui %0 : i1 to i32
    %c0_i32_0 = arith.constant 0 : i32
    %2 = arith.cmpi ne, %1, %c0_i32_0 : i32
    scf.if %2 {
      %cst_111 = arith.constant 0.000000e+00 : f32
      %239 = vector.broadcast %cst_111 : f32 to vector<16x128xf32>
      %c0_112 = arith.constant 0 : index
      %c0_113 = arith.constant 0 : index
      %240 = vector.load %arg13[%c0_112, %c0_113] : memref<16x128xf32, #tpu.memory_space<vmem>>, vector<16x128xf32>
      tpu.vector_store %arg13[%c0_112, %c0_113], %239 {strides = array<i32>} : memref<16x128xf32, #tpu.memory_space<vmem>>, vector<16x128xf32>,
      %cst_114 = arith.constant 0.000000e+00 : f32
      %241 = vector.broadcast %cst_114 : f32 to vector<16x128xf32>
      %c0_115 = arith.constant 0 : index
      %c0_116 = arith.constant 0 : index
      %242 = vector.load %arg14[%c0_115, %c0_116] : memref<16x128xf32, #tpu.memory_space<vmem>>, vector<16x128xf32>
      tpu.vector_store %arg14[%c0_115, %c0_116], %241 {strides = array<i32>} : memref<16x128xf32, #tpu.memory_space<vmem>>, vector<16x128xf32>,
    } else {
    }
    %c0 = arith.constant 0 : index
    %c0_1 = arith.constant 0 : index
    %3 = vector.load %arg7[%c0, %c0_1] : memref<1x512xf32, #tpu.memory_space<vmem>>, vector<1x512xf32>
    %c0_2 = arith.constant 0 : index
    %c0_3 = arith.constant 0 : index
    %4 = vector.load %arg8[%c0_2, %c0_3] : memref<1x512xf32, #tpu.memory_space<vmem>>, vector<1x512xf32>
    %c0_4 = arith.constant 0 : index
    %c0_5 = arith.constant 0 : index
    %5 = vector.load %arg4[%c0_4, %c0_5] : memref<16x512xf32, #tpu.memory_space<vmem>>, vector<16x512xf32>
    %c0_6 = arith.constant 0 : index
    %c0_7 = arith.constant 0 : index
    %6 = vector.load %arg5[%c0_6, %c0_7] : memref<16x512xf32, #tpu.memory_space<vmem>>, vector<16x512xf32>
    %c0_8 = arith.constant 0 : index
    %c0_9 = arith.constant 0 : index
    %c0_10 = arith.constant 0 : index
    %7 = vector.load %arg2[%c0_8, %c0_9, %c0_10] : memref<4x8x16xf32, #tpu.memory_space<vmem>>, vector<4x8x16xf32>
    %8 = vector.shape_cast %7 : vector<4x8x16xf32> to vector<32x16xf32>
    %c0_11 = arith.constant 0 : index
    %c0_12 = arith.constant 0 : index
    %c0_13 = arith.constant 0 : index
    %9 = vector.load %arg3[%c0_11, %c0_12, %c0_13] : memref<4x8x16xf32, #tpu.memory_space<vmem>>, vector<4x8x16xf32>
    %10 = vector.shape_cast %9 : vector<4x8x16xf32> to vector<32x16xf32>
    %cst = arith.constant dense<0.000000e+00> : vector<32x512xf32>
    %11 = tpu.matmul %8, %5, %cst {dimension_numbers = #tpu.dot_dimension_numbers<[1], [0], [0], [1], [0, 0, 1, 1], [], []>} : vector<32x16xf32>, vector<16x512xf32>, vector<32x512xf32> -> vector<32x512xf32>
    %12 = vector.broadcast %3 : vector<1x512xf32> to vector<32x512xf32>
    %13 = arith.addf %12, %11 : vector<32x512xf32>
    %cst_14 = arith.constant dense<0.000000e+00> : vector<32x512xf32>
    %14 = tpu.matmul %10, %6, %cst_14 {dimension_numbers = #tpu.dot_dimension_numbers<[1], [0], [0], [1], [0, 0, 1, 1], [], []>} : vector<32x16xf32>, vector<16x512xf32>, vector<32x512xf32> -> vector<32x512xf32>
    %15 = vector.broadcast %4 : vector<1x512xf32> to vector<32x512xf32>
    %16 = arith.addf %15, %14 : vector<32x512xf32>
    %17 = vector.shape_cast %13 : vector<32x512xf32> to vector<4x8x512xf32>
    %c0_15 = arith.constant 0 : index
    %c0_16 = arith.constant 0 : index
    %c0_17 = arith.constant 0 : index
    %18 = vector.load %arg11[%c0_15, %c0_16, %c0_17] : memref<4x8x512xf32, #tpu.memory_space<vmem>>, vector<4x8x512xf32>
    tpu.vector_store %arg11[%c0_15, %c0_16, %c0_17], %17 {strides = array<i32>} : memref<4x8x512xf32, #tpu.memory_space<vmem>>, vector<4x8x512xf32>,
    %19 = vector.shape_cast %16 : vector<32x512xf32> to vector<4x8x512xf32>
    %c0_18 = arith.constant 0 : index
    %c0_19 = arith.constant 0 : index
    %c0_20 = arith.constant 0 : index
    %20 = vector.load %arg12[%c0_18, %c0_19, %c0_20] : memref<4x8x512xf32, #tpu.memory_space<vmem>>, vector<4x8x512xf32>
    tpu.vector_store %arg12[%c0_18, %c0_19, %c0_20], %19 {strides = array<i32>} : memref<4x8x512xf32, #tpu.memory_space<vmem>>, vector<4x8x512xf32>,
    %c0_21 = arith.constant 0 : index
    %c0_22 = arith.constant 0 : index
    %21 = vector.load %arg6[%c0_21, %c0_22] : memref<256x512xf32, #tpu.memory_space<vmem>>, vector<256x512xf32>
    %22 = tpu.iota {dimensions = array<i32: 0>} : vector<16x1xi32>
    %c8_i32 = arith.constant 8 : i32
    %23 = vector.broadcast %c8_i32 : i32 to vector<16x1xi32>
    %24 = arith.cmpi slt, %22, %23 : vector<16x1xi32>
    %cst_23 = arith.constant 1.000000e+00 : f32
    %25 = vector.broadcast %cst_23 : f32 to vector<16x128xf32>
    %cst_24 = arith.constant 0.000000e+00 : f32
    %26 = vector.shape_cast %24 : vector<16x1xi1> to vector<16x1xi1>
    %27 = vector.broadcast %26 : vector<16x1xi1> to vector<16x128xi1>
    %28 = vector.broadcast %cst_24 : f32 to vector<16x128xf32>
    %29 = arith.select %27, %25, %28 : vector<16x128xi1>, vector<16x128xf32>
    %cst_25 = arith.constant 0.000000e+00 : f32
    %30 = vector.shape_cast %24 : vector<16x1xi1> to vector<16x1xi1>
    %31 = vector.broadcast %30 : vector<16x1xi1> to vector<16x128xi1>
    %32 = vector.broadcast %cst_25 : f32 to vector<16x128xf32>
    %33 = arith.select %31, %32, %25 : vector<16x128xi1>, vector<16x128xf32>
    %34 = tpu.concatenate %29, %33 in 1 : vector<16x128xf32>, vector<16x128xf32> -> vector<16x256xf32>
    %c0_i32_26 = arith.constant 0 : i32
    %c3_i32 = arith.constant 3 : i32
    %35 = arith.subi %c3_i32, %c0_i32_26 : i32
    %36 = arith.index_cast %c0_i32_26 : i32 to index
    %c0_27 = arith.constant 0 : index
    %c0_28 = arith.constant 0 : index
    %37 = vector.load %arg11[%36, %c0_27, %c0_28] : memref<4x8x512xf32, #tpu.memory_space<vmem>>, vector<1x8x512xf32>
    %38 = vector.shape_cast %37 : vector<1x8x512xf32> to vector<8x512xf32>
    %39 = arith.index_cast %35 : i32 to index
    %c0_29 = arith.constant 0 : index
    %c0_30 = arith.constant 0 : index
    %40 = vector.load %arg12[%39, %c0_29, %c0_30] : memref<4x8x512xf32, #tpu.memory_space<vmem>>, vector<1x8x512xf32>
    %41 = vector.shape_cast %40 : vector<1x8x512xf32> to vector<8x512xf32>
    %42 = tpu.concatenate %38, %41 in 0 : vector<8x512xf32>, vector<8x512xf32> -> vector<16x512xf32>
    %c0_31 = arith.constant 0 : index
    %c0_32 = arith.constant 0 : index
    %43 = vector.load %arg13[%c0_31, %c0_32] : memref<16x128xf32, #tpu.memory_space<vmem>>, vector<16x128xf32>
    %44 = tpu.concatenate %43, %43 in 1 : vector<16x128xf32>, vector<16x128xf32> -> vector<16x256xf32>
    %45 = arith.mulf %44, %34 : vector<16x256xf32>
    %cst_33 = arith.constant dense<0.000000e+00> : vector<16x512xf32>
    %46 = tpu.matmul %45, %21, %cst_33 {dimension_numbers = #tpu.dot_dimension_numbers<[1], [0], [0], [1], [0, 0, 1, 1], [], []>} : vector<16x256xf32>, vector<256x512xf32>, vector<16x512xf32> -> vector<16x512xf32>
    %47 = arith.addf %42, %46 : vector<16x512xf32>
    %48 = vector.extract_strided_slice %47 {offsets = [0, 0], sizes = [16, 128], strides = [1, 1]} : vector<16x512xf32> to vector<16x128xf32>
    %49 = arith.negf %48 : vector<16x128xf32>
    %50 = math.exp %49 : vector<16x128xf32>
    %cst_34 = arith.constant 1.000000e+00 : f32
    %51 = vector.broadcast %cst_34 : f32 to vector<16x128xf32>
    %52 = arith.addf %51, %50 : vector<16x128xf32>
    %53 = arith.divf %51, %52 : vector<16x128xf32>
    %54 = vector.extract_strided_slice %47 {offsets = [0, 128], sizes = [16, 128], strides = [1, 1]} : vector<16x512xf32> to vector<16x128xf32>
    %55 = arith.negf %54 : vector<16x128xf32>
    %56 = math.exp %55 : vector<16x128xf32>
    %cst_35 = arith.constant 1.000000e+00 : f32
    %57 = vector.broadcast %cst_35 : f32 to vector<16x128xf32>
    %58 = arith.addf %57, %56 : vector<16x128xf32>
    %59 = arith.divf %57, %58 : vector<16x128xf32>
    %60 = vector.extract_strided_slice %47 {offsets = [0, 256], sizes = [16, 128], strides = [1, 1]} : vector<16x512xf32> to vector<16x128xf32>
    %61 = math.tanh %60 : vector<16x128xf32>
    %62 = vector.extract_strided_slice %47 {offsets = [0, 384], sizes = [16, 128], strides = [1, 1]} : vector<16x512xf32> to vector<16x128xf32>
    %63 = arith.negf %62 : vector<16x128xf32>
    %64 = math.exp %63 : vector<16x128xf32>
    %cst_36 = arith.constant 1.000000e+00 : f32
    %65 = vector.broadcast %cst_36 : f32 to vector<16x128xf32>
    %66 = arith.addf %65, %64 : vector<16x128xf32>
    %67 = arith.divf %65, %66 : vector<16x128xf32>
    %c0_37 = arith.constant 0 : index
    %c0_38 = arith.constant 0 : index
    %68 = vector.load %arg14[%c0_37, %c0_38] : memref<16x128xf32, #tpu.memory_space<vmem>>, vector<16x128xf32>
    %69 = arith.mulf %59, %68 : vector<16x128xf32>
    %70 = arith.mulf %53, %61 : vector<16x128xf32>
    %71 = arith.addf %69, %70 : vector<16x128xf32>
    %72 = math.tanh %71 : vector<16x128xf32>
    %73 = arith.mulf %67, %72 : vector<16x128xf32>
    %c0_39 = arith.constant 0 : index
    %c0_40 = arith.constant 0 : index
    %74 = vector.load %arg14[%c0_39, %c0_40] : memref<16x128xf32, #tpu.memory_space<vmem>>, vector<16x128xf32>
    tpu.vector_store %arg14[%c0_39, %c0_40], %71 {strides = array<i32>} : memref<16x128xf32, #tpu.memory_space<vmem>>, vector<16x128xf32>,
    %c0_41 = arith.constant 0 : index
    %c0_42 = arith.constant 0 : index
    %75 = vector.load %arg13[%c0_41, %c0_42] : memref<16x128xf32, #tpu.memory_space<vmem>>, vector<16x128xf32>
    tpu.vector_store %arg13[%c0_41, %c0_42], %73 {strides = array<i32>} : memref<16x128xf32, #tpu.memory_space<vmem>>, vector<16x128xf32>,
    %76 = vector.extract_strided_slice %73 {offsets = [0, 0], sizes = [8, 128], strides = [1, 1]} : vector<16x128xf32> to vector<8x128xf32>
    %77 = arith.index_cast %c0_i32_26 : i32 to index
    %c0_43 = arith.constant 0 : index
    %c0_44 = arith.constant 0 : index
    %78 = vector.load %arg9[%77, %c0_43, %c0_44] : memref<4x8x128xf32, #tpu.memory_space<vmem>>, vector<1x8x128xf32>
    %79 = vector.shape_cast %78 : vector<1x8x128xf32> to vector<8x128xf32>
    %80 = vector.shape_cast %76 : vector<8x128xf32> to vector<1x8x128xf32>
    tpu.vector_store %arg9[%77, %c0_43, %c0_44], %80 {strides = array<i32>} : memref<4x8x128xf32, #tpu.memory_space<vmem>>, vector<1x8x128xf32>,
    %81 = vector.extract_strided_slice %73 {offsets = [8, 0], sizes = [8, 128], strides = [1, 1]} : vector<16x128xf32> to vector<8x128xf32>
    %82 = arith.index_cast %35 : i32 to index
    %c0_45 = arith.constant 0 : index
    %c0_46 = arith.constant 0 : index
    %83 = vector.load %arg10[%82, %c0_45, %c0_46] : memref<4x8x128xf32, #tpu.memory_space<vmem>>, vector<1x8x128xf32>
    %84 = vector.shape_cast %83 : vector<1x8x128xf32> to vector<8x128xf32>
    %85 = vector.shape_cast %81 : vector<8x128xf32> to vector<1x8x128xf32>
    tpu.vector_store %arg10[%82, %c0_45, %c0_46], %85 {strides = array<i32>} : memref<4x8x128xf32, #tpu.memory_space<vmem>>, vector<1x8x128xf32>,
    %c1_i32 = arith.constant 1 : i32
    %c3_i32_47 = arith.constant 3 : i32
    %86 = arith.subi %c3_i32_47, %c1_i32 : i32
    %87 = arith.index_cast %c1_i32 : i32 to index
    %c0_48 = arith.constant 0 : index
    %c0_49 = arith.constant 0 : index
    %88 = vector.load %arg11[%87, %c0_48, %c0_49] : memref<4x8x512xf32, #tpu.memory_space<vmem>>, vector<1x8x512xf32>
    %89 = vector.shape_cast %88 : vector<1x8x512xf32> to vector<8x512xf32>
    %90 = arith.index_cast %86 : i32 to index
    %c0_50 = arith.constant 0 : index
    %c0_51 = arith.constant 0 : index
    %91 = vector.load %arg12[%90, %c0_50, %c0_51] : memref<4x8x512xf32, #tpu.memory_space<vmem>>, vector<1x8x512xf32>
    %92 = vector.shape_cast %91 : vector<1x8x512xf32> to vector<8x512xf32>
    %93 = tpu.concatenate %89, %92 in 0 : vector<8x512xf32>, vector<8x512xf32> -> vector<16x512xf32>
    %c0_52 = arith.constant 0 : index
    %c0_53 = arith.constant 0 : index
    %94 = vector.load %arg13[%c0_52, %c0_53] : memref<16x128xf32, #tpu.memory_space<vmem>>, vector<16x128xf32>
    %95 = tpu.concatenate %94, %94 in 1 : vector<16x128xf32>, vector<16x128xf32> -> vector<16x256xf32>
    %96 = arith.mulf %95, %34 : vector<16x256xf32>
    %cst_54 = arith.constant dense<0.000000e+00> : vector<16x512xf32>
    %97 = tpu.matmul %96, %21, %cst_54 {dimension_numbers = #tpu.dot_dimension_numbers<[1], [0], [0], [1], [0, 0, 1, 1], [], []>} : vector<16x256xf32>, vector<256x512xf32>, vector<16x512xf32> -> vector<16x512xf32>
    %98 = arith.addf %93, %97 : vector<16x512xf32>
    %99 = vector.extract_strided_slice %98 {offsets = [0, 0], sizes = [16, 128], strides = [1, 1]} : vector<16x512xf32> to vector<16x128xf32>
    %100 = arith.negf %99 : vector<16x128xf32>
    %101 = math.exp %100 : vector<16x128xf32>
    %cst_55 = arith.constant 1.000000e+00 : f32
    %102 = vector.broadcast %cst_55 : f32 to vector<16x128xf32>
    %103 = arith.addf %102, %101 : vector<16x128xf32>
    %104 = arith.divf %102, %103 : vector<16x128xf32>
    %105 = vector.extract_strided_slice %98 {offsets = [0, 128], sizes = [16, 128], strides = [1, 1]} : vector<16x512xf32> to vector<16x128xf32>
    %106 = arith.negf %105 : vector<16x128xf32>
    %107 = math.exp %106 : vector<16x128xf32>
    %cst_56 = arith.constant 1.000000e+00 : f32
    %108 = vector.broadcast %cst_56 : f32 to vector<16x128xf32>
    %109 = arith.addf %108, %107 : vector<16x128xf32>
    %110 = arith.divf %108, %109 : vector<16x128xf32>
    %111 = vector.extract_strided_slice %98 {offsets = [0, 256], sizes = [16, 128], strides = [1, 1]} : vector<16x512xf32> to vector<16x128xf32>
    %112 = math.tanh %111 : vector<16x128xf32>
    %113 = vector.extract_strided_slice %98 {offsets = [0, 384], sizes = [16, 128], strides = [1, 1]} : vector<16x512xf32> to vector<16x128xf32>
    %114 = arith.negf %113 : vector<16x128xf32>
    %115 = math.exp %114 : vector<16x128xf32>
    %cst_57 = arith.constant 1.000000e+00 : f32
    %116 = vector.broadcast %cst_57 : f32 to vector<16x128xf32>
    %117 = arith.addf %116, %115 : vector<16x128xf32>
    %118 = arith.divf %116, %117 : vector<16x128xf32>
    %c0_58 = arith.constant 0 : index
    %c0_59 = arith.constant 0 : index
    %119 = vector.load %arg14[%c0_58, %c0_59] : memref<16x128xf32, #tpu.memory_space<vmem>>, vector<16x128xf32>
    %120 = arith.mulf %110, %119 : vector<16x128xf32>
    %121 = arith.mulf %104, %112 : vector<16x128xf32>
    %122 = arith.addf %120, %121 : vector<16x128xf32>
    %123 = math.tanh %122 : vector<16x128xf32>
    %124 = arith.mulf %118, %123 : vector<16x128xf32>
    %c0_60 = arith.constant 0 : index
    %c0_61 = arith.constant 0 : index
    %125 = vector.load %arg14[%c0_60, %c0_61] : memref<16x128xf32, #tpu.memory_space<vmem>>, vector<16x128xf32>
    tpu.vector_store %arg14[%c0_60, %c0_61], %122 {strides = array<i32>} : memref<16x128xf32, #tpu.memory_space<vmem>>, vector<16x128xf32>,
    %c0_62 = arith.constant 0 : index
    %c0_63 = arith.constant 0 : index
    %126 = vector.load %arg13[%c0_62, %c0_63] : memref<16x128xf32, #tpu.memory_space<vmem>>, vector<16x128xf32>
    tpu.vector_store %arg13[%c0_62, %c0_63], %124 {strides = array<i32>} : memref<16x128xf32, #tpu.memory_space<vmem>>, vector<16x128xf32>,
    %127 = vector.extract_strided_slice %124 {offsets = [0, 0], sizes = [8, 128], strides = [1, 1]} : vector<16x128xf32> to vector<8x128xf32>
    %128 = arith.index_cast %c1_i32 : i32 to index
    %c0_64 = arith.constant 0 : index
    %c0_65 = arith.constant 0 : index
    %129 = vector.load %arg9[%128, %c0_64, %c0_65] : memref<4x8x128xf32, #tpu.memory_space<vmem>>, vector<1x8x128xf32>
    %130 = vector.shape_cast %129 : vector<1x8x128xf32> to vector<8x128xf32>
    %131 = vector.shape_cast %127 : vector<8x128xf32> to vector<1x8x128xf32>
    tpu.vector_store %arg9[%128, %c0_64, %c0_65], %131 {strides = array<i32>} : memref<4x8x128xf32, #tpu.memory_space<vmem>>, vector<1x8x128xf32>,
    %132 = vector.extract_strided_slice %124 {offsets = [8, 0], sizes = [8, 128], strides = [1, 1]} : vector<16x128xf32> to vector<8x128xf32>
    %133 = arith.index_cast %86 : i32 to index
    %c0_66 = arith.constant 0 : index
    %c0_67 = arith.constant 0 : index
    %134 = vector.load %arg10[%133, %c0_66, %c0_67] : memref<4x8x128xf32, #tpu.memory_space<vmem>>, vector<1x8x128xf32>
    %135 = vector.shape_cast %134 : vector<1x8x128xf32> to vector<8x128xf32>
    %136 = vector.shape_cast %132 : vector<8x128xf32> to vector<1x8x128xf32>
    tpu.vector_store %arg10[%133, %c0_66, %c0_67], %136 {strides = array<i32>} : memref<4x8x128xf32, #tpu.memory_space<vmem>>, vector<1x8x128xf32>,
    %c2_i32 = arith.constant 2 : i32
    %c3_i32_68 = arith.constant 3 : i32
    %137 = arith.subi %c3_i32_68, %c2_i32 : i32
    %138 = arith.index_cast %c2_i32 : i32 to index
    %c0_69 = arith.constant 0 : index
    %c0_70 = arith.constant 0 : index
    %139 = vector.load %arg11[%138, %c0_69, %c0_70] : memref<4x8x512xf32, #tpu.memory_space<vmem>>, vector<1x8x512xf32>
    %140 = vector.shape_cast %139 : vector<1x8x512xf32> to vector<8x512xf32>
    %141 = arith.index_cast %137 : i32 to index
    %c0_71 = arith.constant 0 : index
    %c0_72 = arith.constant 0 : index
    %142 = vector.load %arg12[%141, %c0_71, %c0_72] : memref<4x8x512xf32, #tpu.memory_space<vmem>>, vector<1x8x512xf32>
    %143 = vector.shape_cast %142 : vector<1x8x512xf32> to vector<8x512xf32>
    %144 = tpu.concatenate %140, %143 in 0 : vector<8x512xf32>, vector<8x512xf32> -> vector<16x512xf32>
    %c0_73 = arith.constant 0 : index
    %c0_74 = arith.constant 0 : index
    %145 = vector.load %arg13[%c0_73, %c0_74] : memref<16x128xf32, #tpu.memory_space<vmem>>, vector<16x128xf32>
    %146 = tpu.concatenate %145, %145 in 1 : vector<16x128xf32>, vector<16x128xf32> -> vector<16x256xf32>
    %147 = arith.mulf %146, %34 : vector<16x256xf32>
    %cst_75 = arith.constant dense<0.000000e+00> : vector<16x512xf32>
    %148 = tpu.matmul %147, %21, %cst_75 {dimension_numbers = #tpu.dot_dimension_numbers<[1], [0], [0], [1], [0, 0, 1, 1], [], []>} : vector<16x256xf32>, vector<256x512xf32>, vector<16x512xf32> -> vector<16x512xf32>
    %149 = arith.addf %144, %148 : vector<16x512xf32>
    %150 = vector.extract_strided_slice %149 {offsets = [0, 0], sizes = [16, 128], strides = [1, 1]} : vector<16x512xf32> to vector<16x128xf32>
    %151 = arith.negf %150 : vector<16x128xf32>
    %152 = math.exp %151 : vector<16x128xf32>
    %cst_76 = arith.constant 1.000000e+00 : f32
    %153 = vector.broadcast %cst_76 : f32 to vector<16x128xf32>
    %154 = arith.addf %153, %152 : vector<16x128xf32>
    %155 = arith.divf %153, %154 : vector<16x128xf32>
    %156 = vector.extract_strided_slice %149 {offsets = [0, 128], sizes = [16, 128], strides = [1, 1]} : vector<16x512xf32> to vector<16x128xf32>
    %157 = arith.negf %156 : vector<16x128xf32>
    %158 = math.exp %157 : vector<16x128xf32>
    %cst_77 = arith.constant 1.000000e+00 : f32
    %159 = vector.broadcast %cst_77 : f32 to vector<16x128xf32>
    %160 = arith.addf %159, %158 : vector<16x128xf32>
    %161 = arith.divf %159, %160 : vector<16x128xf32>
    %162 = vector.extract_strided_slice %149 {offsets = [0, 256], sizes = [16, 128], strides = [1, 1]} : vector<16x512xf32> to vector<16x128xf32>
    %163 = math.tanh %162 : vector<16x128xf32>
    %164 = vector.extract_strided_slice %149 {offsets = [0, 384], sizes = [16, 128], strides = [1, 1]} : vector<16x512xf32> to vector<16x128xf32>
    %165 = arith.negf %164 : vector<16x128xf32>
    %166 = math.exp %165 : vector<16x128xf32>
    %cst_78 = arith.constant 1.000000e+00 : f32
    %167 = vector.broadcast %cst_78 : f32 to vector<16x128xf32>
    %168 = arith.addf %167, %166 : vector<16x128xf32>
    %169 = arith.divf %167, %168 : vector<16x128xf32>
    %c0_79 = arith.constant 0 : index
    %c0_80 = arith.constant 0 : index
    %170 = vector.load %arg14[%c0_79, %c0_80] : memref<16x128xf32, #tpu.memory_space<vmem>>, vector<16x128xf32>
    %171 = arith.mulf %161, %170 : vector<16x128xf32>
    %172 = arith.mulf %155, %163 : vector<16x128xf32>
    %173 = arith.addf %171, %172 : vector<16x128xf32>
    %174 = math.tanh %173 : vector<16x128xf32>
    %175 = arith.mulf %169, %174 : vector<16x128xf32>
    %c0_81 = arith.constant 0 : index
    %c0_82 = arith.constant 0 : index
    %176 = vector.load %arg14[%c0_81, %c0_82] : memref<16x128xf32, #tpu.memory_space<vmem>>, vector<16x128xf32>
    tpu.vector_store %arg14[%c0_81, %c0_82], %173 {strides = array<i32>} : memref<16x128xf32, #tpu.memory_space<vmem>>, vector<16x128xf32>,
    %c0_83 = arith.constant 0 : index
    %c0_84 = arith.constant 0 : index
    %177 = vector.load %arg13[%c0_83, %c0_84] : memref<16x128xf32, #tpu.memory_space<vmem>>, vector<16x128xf32>
    tpu.vector_store %arg13[%c0_83, %c0_84], %175 {strides = array<i32>} : memref<16x128xf32, #tpu.memory_space<vmem>>, vector<16x128xf32>,
    %178 = vector.extract_strided_slice %175 {offsets = [0, 0], sizes = [8, 128], strides = [1, 1]} : vector<16x128xf32> to vector<8x128xf32>
    %179 = arith.index_cast %c2_i32 : i32 to index
    %c0_85 = arith.constant 0 : index
    %c0_86 = arith.constant 0 : index
    %180 = vector.load %arg9[%179, %c0_85, %c0_86] : memref<4x8x128xf32, #tpu.memory_space<vmem>>, vector<1x8x128xf32>
    %181 = vector.shape_cast %180 : vector<1x8x128xf32> to vector<8x128xf32>
    %182 = vector.shape_cast %178 : vector<8x128xf32> to vector<1x8x128xf32>
    tpu.vector_store %arg9[%179, %c0_85, %c0_86], %182 {strides = array<i32>} : memref<4x8x128xf32, #tpu.memory_space<vmem>>, vector<1x8x128xf32>,
    %183 = vector.extract_strided_slice %175 {offsets = [8, 0], sizes = [8, 128], strides = [1, 1]} : vector<16x128xf32> to vector<8x128xf32>
    %184 = arith.index_cast %137 : i32 to index
    %c0_87 = arith.constant 0 : index
    %c0_88 = arith.constant 0 : index
    %185 = vector.load %arg10[%184, %c0_87, %c0_88] : memref<4x8x128xf32, #tpu.memory_space<vmem>>, vector<1x8x128xf32>
    %186 = vector.shape_cast %185 : vector<1x8x128xf32> to vector<8x128xf32>
    %187 = vector.shape_cast %183 : vector<8x128xf32> to vector<1x8x128xf32>
    tpu.vector_store %arg10[%184, %c0_87, %c0_88], %187 {strides = array<i32>} : memref<4x8x128xf32, #tpu.memory_space<vmem>>, vector<1x8x128xf32>,
    %c3_i32_89 = arith.constant 3 : i32
    %c3_i32_90 = arith.constant 3 : i32
    %188 = arith.subi %c3_i32_90, %c3_i32_89 : i32
    %189 = arith.index_cast %c3_i32_89 : i32 to index
    %c0_91 = arith.constant 0 : index
    %c0_92 = arith.constant 0 : index
    %190 = vector.load %arg11[%189, %c0_91, %c0_92] : memref<4x8x512xf32, #tpu.memory_space<vmem>>, vector<1x8x512xf32>
    %191 = vector.shape_cast %190 : vector<1x8x512xf32> to vector<8x512xf32>
    %192 = arith.index_cast %188 : i32 to index
    %c0_93 = arith.constant 0 : index
    %c0_94 = arith.constant 0 : index
    %193 = vector.load %arg12[%192, %c0_93, %c0_94] : memref<4x8x512xf32, #tpu.memory_space<vmem>>, vector<1x8x512xf32>
    %194 = vector.shape_cast %193 : vector<1x8x512xf32> to vector<8x512xf32>
    %195 = tpu.concatenate %191, %194 in 0 : vector<8x512xf32>, vector<8x512xf32> -> vector<16x512xf32>
    %c0_95 = arith.constant 0 : index
    %c0_96 = arith.constant 0 : index
    %196 = vector.load %arg13[%c0_95, %c0_96] : memref<16x128xf32, #tpu.memory_space<vmem>>, vector<16x128xf32>
    %197 = tpu.concatenate %196, %196 in 1 : vector<16x128xf32>, vector<16x128xf32> -> vector<16x256xf32>
    %198 = arith.mulf %197, %34 : vector<16x256xf32>
    %cst_97 = arith.constant dense<0.000000e+00> : vector<16x512xf32>
    %199 = tpu.matmul %198, %21, %cst_97 {dimension_numbers = #tpu.dot_dimension_numbers<[1], [0], [0], [1], [0, 0, 1, 1], [], []>} : vector<16x256xf32>, vector<256x512xf32>, vector<16x512xf32> -> vector<16x512xf32>
    %200 = arith.addf %195, %199 : vector<16x512xf32>
    %201 = vector.extract_strided_slice %200 {offsets = [0, 0], sizes = [16, 128], strides = [1, 1]} : vector<16x512xf32> to vector<16x128xf32>
    %202 = arith.negf %201 : vector<16x128xf32>
    %203 = math.exp %202 : vector<16x128xf32>
    %cst_98 = arith.constant 1.000000e+00 : f32
    %204 = vector.broadcast %cst_98 : f32 to vector<16x128xf32>
    %205 = arith.addf %204, %203 : vector<16x128xf32>
    %206 = arith.divf %204, %205 : vector<16x128xf32>
    %207 = vector.extract_strided_slice %200 {offsets = [0, 128], sizes = [16, 128], strides = [1, 1]} : vector<16x512xf32> to vector<16x128xf32>
    %208 = arith.negf %207 : vector<16x128xf32>
    %209 = math.exp %208 : vector<16x128xf32>
    %cst_99 = arith.constant 1.000000e+00 : f32
    %210 = vector.broadcast %cst_99 : f32 to vector<16x128xf32>
    %211 = arith.addf %210, %209 : vector<16x128xf32>
    %212 = arith.divf %210, %211 : vector<16x128xf32>
    %213 = vector.extract_strided_slice %200 {offsets = [0, 256], sizes = [16, 128], strides = [1, 1]} : vector<16x512xf32> to vector<16x128xf32>
    %214 = math.tanh %213 : vector<16x128xf32>
    %215 = vector.extract_strided_slice %200 {offsets = [0, 384], sizes = [16, 128], strides = [1, 1]} : vector<16x512xf32> to vector<16x128xf32>
    %216 = arith.negf %215 : vector<16x128xf32>
    %217 = math.exp %216 : vector<16x128xf32>
    %cst_100 = arith.constant 1.000000e+00 : f32
    %218 = vector.broadcast %cst_100 : f32 to vector<16x128xf32>
    %219 = arith.addf %218, %217 : vector<16x128xf32>
    %220 = arith.divf %218, %219 : vector<16x128xf32>
    %c0_101 = arith.constant 0 : index
    %c0_102 = arith.constant 0 : index
    %221 = vector.load %arg14[%c0_101, %c0_102] : memref<16x128xf32, #tpu.memory_space<vmem>>, vector<16x128xf32>
    %222 = arith.mulf %212, %221 : vector<16x128xf32>
    %223 = arith.mulf %206, %214 : vector<16x128xf32>
    %224 = arith.addf %222, %223 : vector<16x128xf32>
    %225 = math.tanh %224 : vector<16x128xf32>
    %226 = arith.mulf %220, %225 : vector<16x128xf32>
    %c0_103 = arith.constant 0 : index
    %c0_104 = arith.constant 0 : index
    %227 = vector.load %arg14[%c0_103, %c0_104] : memref<16x128xf32, #tpu.memory_space<vmem>>, vector<16x128xf32>
    tpu.vector_store %arg14[%c0_103, %c0_104], %224 {strides = array<i32>} : memref<16x128xf32, #tpu.memory_space<vmem>>, vector<16x128xf32>,
    %c0_105 = arith.constant 0 : index
    %c0_106 = arith.constant 0 : index
    %228 = vector.load %arg13[%c0_105, %c0_106] : memref<16x128xf32, #tpu.memory_space<vmem>>, vector<16x128xf32>
    tpu.vector_store %arg13[%c0_105, %c0_106], %226 {strides = array<i32>} : memref<16x128xf32, #tpu.memory_space<vmem>>, vector<16x128xf32>,
    %229 = vector.extract_strided_slice %226 {offsets = [0, 0], sizes = [8, 128], strides = [1, 1]} : vector<16x128xf32> to vector<8x128xf32>
    %230 = arith.index_cast %c3_i32_89 : i32 to index
    %c0_107 = arith.constant 0 : index
    %c0_108 = arith.constant 0 : index
    %231 = vector.load %arg9[%230, %c0_107, %c0_108] : memref<4x8x128xf32, #tpu.memory_space<vmem>>, vector<1x8x128xf32>
    %232 = vector.shape_cast %231 : vector<1x8x128xf32> to vector<8x128xf32>
    %233 = vector.shape_cast %229 : vector<8x128xf32> to vector<1x8x128xf32>
    tpu.vector_store %arg9[%230, %c0_107, %c0_108], %233 {strides = array<i32>} : memref<4x8x128xf32, #tpu.memory_space<vmem>>, vector<1x8x128xf32>,
    %234 = vector.extract_strided_slice %226 {offsets = [8, 0], sizes = [8, 128], strides = [1, 1]} : vector<16x128xf32> to vector<8x128xf32>
    %235 = arith.index_cast %188 : i32 to index
    %c0_109 = arith.constant 0 : index
    %c0_110 = arith.constant 0 : index
    %236 = vector.load %arg10[%235, %c0_109, %c0_110] : memref<4x8x128xf32, #tpu.memory_space<vmem>>, vector<1x8x128xf32>
    %237 = vector.shape_cast %236 : vector<1x8x128xf32> to vector<8x128xf32>
    %238 = vector.shape_cast %234 : vector<8x128xf32> to vector<1x8x128xf32>
    tpu.vector_store %arg10[%235, %c0_109, %c0_110], %238 {strides = array<i32>} : memref<4x8x128xf32, #tpu.memory_space<vmem>>, vector<1x8x128xf32>,
    %c4_i32 = arith.constant 4 : i32
    return
  }
  func.func @transform_0(%arg0: i32, %arg1: i32) -> (i32, i32, i32) {
    %c0_i32 = arith.constant 0 : i32
    %c0_i32_0 = arith.constant 0 : i32
    return %arg1, %arg0, %c0_i32 : i32, i32, i32
  }
  func.func @transform_1(%arg0: i32, %arg1: i32) -> (i32, i32, i32) {
    %c1_i32 = arith.constant 1 : i32
    %0 = arith.subi %c1_i32, %arg1 : i32
    %c0_i32 = arith.constant 0 : i32
    %c0_i32_0 = arith.constant 0 : i32
    return %0, %arg0, %c0_i32 : i32, i32, i32
  }
  func.func @transform_2(%arg0: i32, %arg1: i32) -> (i32, i32) {
    %c0_i32 = arith.constant 0 : i32
    %c0_i32_0 = arith.constant 0 : i32
    %c0_i32_1 = arith.constant 0 : i32
    return %c0_i32, %c0_i32_0 : i32, i32
  }
  func.func @transform_3(%arg0: i32, %arg1: i32) -> (i32, i32) {
    %c0_i32 = arith.constant 0 : i32
    %c0_i32_0 = arith.constant 0 : i32
    %c0_i32_1 = arith.constant 0 : i32
    return %c0_i32, %c0_i32_0 : i32, i32
  }
  func.func @transform_4(%arg0: i32, %arg1: i32) -> (i32, i32) {
    %c0_i32 = arith.constant 0 : i32
    %c0_i32_0 = arith.constant 0 : i32
    %c0_i32_1 = arith.constant 0 : i32
    return %c0_i32, %c0_i32_0 : i32, i32
  }
  func.func @transform_5(%arg0: i32, %arg1: i32) -> (i32, i32) {
    %c0_i32 = arith.constant 0 : i32
    %c0_i32_0 = arith.constant 0 : i32
    %c0_i32_1 = arith.constant 0 : i32
    return %c0_i32, %c0_i32_0 : i32, i32
  }
  func.func @transform_6(%arg0: i32, %arg1: i32) -> (i32, i32) {
    %c0_i32 = arith.constant 0 : i32
    %c0_i32_0 = arith.constant 0 : i32
    %c0_i32_1 = arith.constant 0 : i32
    return %c0_i32, %c0_i32_0 : i32, i32
  }
  func.func @transform_7(%arg0: i32, %arg1: i32) -> (i32, i32, i32) {
    %c0_i32 = arith.constant 0 : i32
    %c0_i32_0 = arith.constant 0 : i32
    return %arg1, %arg0, %c0_i32 : i32, i32, i32
  }
  func.func @transform_8(%arg0: i32, %arg1: i32) -> (i32, i32, i32) {
    %c1_i32 = arith.constant 1 : i32
    %0 = arith.subi %c1_i32, %arg1 : i32
    %c0_i32 = arith.constant 0 : i32
    %c0_i32_0 = arith.constant 0 : i32
    return %0, %arg0, %c0_i32 : i32, i32, i32
  }
}

</mosaic_0001>

<bundles_post_ra>
// kernel: tpu_custom_call.1
= control target key start
LH: loop header
LB: loop body
LE: loop exit
PB: predicated region body
PF: predicated region fallthrough
CT: control target
= control target key end

     0   :  { %s5133_s0 = inlined_call_operand.hbm [shape: f32[8,8,16], index: 0, kind: input, shape index: {}]   ;;  %s5134_s1 = inlined_call_operand.hbm [shape: f32[8,8,16], index: 1, kind: input, shape index: {}]   ;;  %s5135_s2 = inlined_call_operand.hbm [shape: f32[16,512], index: 2, kind: input, shape index: {}]   ;;  %s5136_s3 = inlined_call_operand.hbm [shape: f32[16,512], index: 3, kind: input, shape index: {}]   ;;  %s5137_s4 = inlined_call_operand.hbm [shape: f32[256,512], index: 4, kind: input, shape index: {}]   ;;  %s5138_s5 = inlined_call_operand.vmem [shape: f32[1,512], index: 5, kind: input, shape index: {}]   ;;  %s5139_s6 = inlined_call_operand.hbm [shape: f32[1,512], index: 6, kind: input, shape index: {}]   ;;  %s5140_s7 = inlined_call_operand.hbm [shape: f32[8,8,128], index: 7, kind: output, shape index: {0}]   ;;  %s5141_s8 = inlined_call_operand.hbm [shape: f32[8,8,128], index: 8, kind: output, shape index: {1}]  }
   0x1   :  { %5311 = sst [smem:[#allocation141_spill]] %s5133_s0 }
   0x2   :  { %5312 = sst [smem:[#allocation142_spill]] %s5135_s2 }
   0x3   :  { %5313 = sst [smem:[#allocation143_spill]] %s5136_s3 }
   0x4   :  { %5314 = sst [smem:[#allocation144_spill]] %s5137_s4 }
   0x5   :  { %5315 = sst [smem:[#allocation145_spill]] %s5139_s6 }
   0x6   :  { %5316 = sst [smem:[#allocation146_spill]] %s5140_s7 }
   0x7   :  { %5317 = sst [smem:[#allocation147_spill]] %s5141_s8 }
   0x8   :  { %14 = vsyncpa [#allocation7], 0 }
   0x9   :  { %16 = vsyncpa [#allocation7 + $0x1], 0 }
   0xa   :  { %17 = vsyncpa [#allocation10], 0 }
   0xb   :  { %19 = vsyncpa [#allocation10 + $0x1], 0 }
   0xc   :  { %20 = vsyncpa [#allocation13], 0 }
   0xd   :  { %21 = vsyncpa [#allocation16], 0 }
   0xe   :  { %22 = vsyncpa [#allocation8], 0 }
   0xf   :  { %24 = vsyncpa [#allocation8 + $0x1], 0 }
  0x10   :  { %25 = vsyncpa [#allocation19], 0 }
  0x11   :  { %27 = vsyncpa [#allocation19 + $0x1], 0  ;;  %s3476_s27 = smov 0   ;;  %s3478_s28 = smov 0  }
  0x12   :  { %s3480_s29 = smov 0   ;;  %s3482_s30 = smov 0  }
  0x13   :  { %s3484_s9 = smov 0   ;;  %s3486_s10 = smov 0  }
  0x14   :  { %s3488_s11 = smov 0   ;;  %s3490_s12 = smov 0  }
  0x15   :  { %s3492_s13 = smov 0  }
  0x16 LB: > { %5318 = sst [smem:[#allocation27_spill]] %s3386_s27  ;;  %s3522_s14 = sadd.s32 4294967295, %s3418_s13   ;;  %s3418_s13 = sphi %s3492_s13, %s33_s13   ;;  %s3414_s12 = sphi %s3490_s12, %s5706_s12   ;;  %s3410_s11 = sphi %s3488_s11, %s5705_s11   ;;  %s3406_s10 = sphi %s3486_s10, %s5704_s10   ;;  %s3402_s9 = sphi %s3484_s9, %s5711_s9   ;;  %s3398_s30 = sphi %s3482_s30, %s5710_s30   ;;  %s3394_s29 = sphi %s3480_s29, %s5709_s29   ;;  %s3390_s28 = sphi %s3478_s28, %s5708_s28   ;;  %s3386_s27 = sphi %s3476_s27, %s5707_s27  }
  0x17   : > { %5319 = sst [smem:[#allocation28_spill]] %s3406_s10  ;;  %p97_p0 = scmp.ne.s32.totalorder %s3390_s28, %s3386_s27 }
  0x18   : > { %5320 = sst [smem:[#allocation29_spill]] %s3414_s12  ;;  %p5145_p1 = scmp.eq.s32.totalorder %s3522_s14, 0 }
  0x19   : > { %p228_p2 = scmp.eq.s32.totalorder %s3522_s14, 1  ;;  %p2588_p3 = scmp.ge.s32.totalorder %s3418_s13, 1 }
  0x1a   : > { %p271_p4 = scmp.lt.s32.totalorder %s3418_s13, 3  ;;  %p3535_p5 = por %p97_p0, %p5145_p1 }
  0x1b   : > { %s5323_s2 = sld [smem:[#allocation142_spill]]  ;;  %s3420_s20 = smov [#allocation11]  }
  0x1c   : > { %p3539_p6 = pnand %p2588_p3, %p271_p4  ;;  %s284_s21 = sshll.u32 %s3420_s20, 4  ;;  %s285_s21 = int_to_ptr.vmem [resolvable:$true] %s284_s21 }
  0x1d   : > { %s5325_s3 = sld [smem:[#allocation143_spill]]  ;;  %s3421_s26 = smov 512  }
  0x1e   : > { %p2708_p7 = pneg %p3539_p6  ;;  %s3422_s17 = smov 32  }
  0x1f   : > { %s5326_s4 = sld [smem:[#allocation144_spill]]  ;;  %s3423_s8 = smov [#allocation12]  }
  0x20   : > { %p3550_p8 = pnand %p2708_p7, %p5145_p1  ;;  %s298_s7 = sshll.u32 %s3423_s8, 4  ;;  %s299_s7 = int_to_ptr.vmem [resolvable:$true] %s298_s7 }
  0x21   : > { %s282_s19 = sshll.u32 %s5323_s2, 4  ;;  %s3424_s23 = smov [#allocation14]   ;;  %s283_s19 = int_to_ptr.hbm [resolvable:$true] %s282_s19 }
  0x22   : > { %2711 = dma.hbm_to_vmem [thread:$0]  (!%p3550_p8), %s283_s19, 1024, %s285_s21, [#allocation10], %s3421_s26, %s3421_s26, %s3422_s17  }
  0x23   : > { %s296_s25 = sshll.u32 %s5325_s3, 4  ;;  %s312_s19 = sshll.u32 %s3424_s23, 4  ;;  %s297_s25 = int_to_ptr.hbm [resolvable:$true] %s296_s25  ;;  %s313_s19 = int_to_ptr.vmem [resolvable:$true] %s312_s19 }
  0x24   : > { %2714 = dma.hbm_to_vmem [thread:$0]  (!%p3550_p8), %s297_s25, 1024, %s299_s7, [#allocation13], %s3421_s26, %s3421_s26, %s3422_s17  }
  0x25   : > { %s310_s2 = sshll.u32 %s5326_s4, 4  ;;  %s5327_s6 = sld [smem:[#allocation145_spill]]  ;;  %s311_s2 = int_to_ptr.hbm [resolvable:$true] %s310_s2 }
  0x26   : > { %2717 = dma.hbm_to_vmem [thread:$0]  (!%p3550_p8), %s311_s2, 16384, %s313_s19, [#allocation13], %s3421_s26, %s3421_s26, %s3422_s17  }
  0x27   : > { %s3425_s8 = smov [#allocation15]   ;;  %s2587_s7 = sadd.s32 4294967294, %s3418_s13  }
  0x28   : > { %s330_s20 = sshll.u32 %s3425_s8, 4  ;;  %s42_s25 = sadd.s32 1, %s3414_s12  ;;  %s331_s20 = int_to_ptr.vmem [resolvable:$true] %s330_s20 }
  0x29   : > { %s54_s23 = sadd.s32 1, %s3406_s10  ;;  %p43_p10 = scmp.ge.s32.totalorder %s42_s25, 2 }
  0x2a   : > { %p61_p11 = scmp.ne.s32.totalorder %s3406_s10, %s3402_s9  ;;  %p5144_p12 = scmp.eq.s32.totalorder %s3418_s13, 0 }
  0x2b   : > { %s328_s18 = sshll.u32 %s5327_s6, 4  ;;  %p67_p13 = scmp.ne.s32.totalorder %s3402_s9, %s3398_s30  ;;  %s329_s18 = int_to_ptr.hbm [resolvable:$true] %s328_s18 }
  0x2c   : > { %2720 = dma.hbm_to_vmem [thread:$0]  (!%p3550_p8), %s329_s18, 64, %s331_s20, [#allocation16]  }
  0x2d   : > { %s5713_s25 = smov (%p43_p10, %s42_s25), 0  ;;  %p3584_p3 = por %p5144_p12, %p61_p11 }
  0x2e   : > { %5328 = sst [smem:[#allocation30_spill]] %s5713_s25  ;;  %p3590_p4 = por %p5145_p1, %p67_p13 }
  0x2f   : > { %s49_s26 = ssub.s32 %s3414_s12, %s5713_s25  ;;  %p3598_p7 = por %p228_p2, %p61_p11 }
  0x30   : > { %p52_p8 = scmp.eq.s32.totalorder %s49_s26, 0  ;;  %p234_p10 = scmp.eq.s32.totalorder %s2587_s7, 1 }
  0x31   : > { %p2739_p9 = scmp.lt.s32.totalorder %s3418_s13, 2  ;;  %s341_s19 = sand.u32 1, %s3406_s10  }
  0x32   : > { %s3605_s21 = scalar_select %p52_p8, %s3406_s10, %s54_s23  }
  0x33   : > { %p3607_p12 = por %p234_p10, %p67_p13  ;;  %p3614_p1 = por %p234_p10, %p97_p0 }
  0x34   : > { %5332 = sst [smem:[#allocation31_spill]] %s3605_s21  ;;  %s2594_s8 = sshll.u32 %s341_s19, 5 }
  0x35   : > { %s5334_s18 = scalar_select %p3614_p1, 1, 0 }
  0x36   : > { %s2680_s20 = sshll.u32 %s3414_s12, 5  ;;  %s5336_s0 = sld [smem:[#allocation141_spill]] }
  0x37   : > { %5335 = sst [smem:[#allocation32_spill]] %s5334_s18  ;;  %s345_s3 = scalar_lea.vmem [#allocation6], %s2594_s8 }
  0x38   : > { %s354_s4 = sshll.u32 %s345_s3, 4  ;;  %p2722_p0 = pnand %p2739_p9, %p3584_p3  ;;  %s355_s4 = int_to_ptr.vmem [resolvable:$true] %s354_s4 }
  0x39   : > { %s342_s21 = scalar_lea.sflag [#allocation7], %s341_s19  ;;  %s3426_s10 = smov 128  }
  0x3a   : > { %s3427_s18 = smov 8   ;;  %s77_s26 = ssub.s32 1, %s3414_s12 }
  0x3b   : > { %s78_s7 = ssub.s32 1, %s5713_s25  ;;  %p91_p11 = scmp.ne.s32.totalorder %s3394_s29, %s3390_s28 }
  0x3c   : > { %s351_s23 = scalar_lea.hbm %s5336_s0, %s2680_s20  ;;  %s84_s20 = sadd.s32 1, %s3394_s29 }
  0x3d   : > { %s352_s6 = sshll.u32 %s351_s23, 4  ;;  %s79_s8 = ssub.s32 %s77_s26, %s78_s7  ;;  %s353_s6 = int_to_ptr.hbm [resolvable:$true] %s352_s6 }
  0x3e   : > { %2724 = dma.hbm_to_vmem [thread:$0]  (!%p2722_p0), %s353_s6, 512, %s355_s4, %s342_s21, %s3426_s10, %s3426_s10, %s3427_s18  }
  0x3f   : > { %p82_p13 = scmp.eq.s32.totalorder %s79_s8, 0  ;;  %p3633_p8 = por %p228_p2, %p91_p11 }
  0x40   : > { %s364_s2 = sand.u32 1, %s3418_s13   ;;  %p5338_p3 = scmp.eq.s32.totalorder %s3418_s13, 0 }
  0x41   : > { %s3639_s23 = scalar_select %p82_p13, %s3394_s29, %s84_s20  }
  0x42   : > { %p93_p10 = por %p91_p11, %p5338_p3  ;;  %s366_s19 = sand.u32 1, %s3394_s29  }
  0x43   : > { %s2597_s0 = sshll.u32 %s366_s19, 5  ;;  %s2681_s4 = sshll.u32 %s77_s26, 5 }
  0x44   : > { %s375_s7 = scalar_lea.hbm %s5134_s1, %s2681_s4  ;;  %s368_s12 = scalar_lea.vmem [#allocation9], %s2597_s0 }
  0x45   : > { %s376_s25 = sshll.u32 %s375_s7, 4  ;;  %s378_s8 = sshll.u32 %s368_s12, 4  ;;  %s377_s25 = int_to_ptr.hbm [resolvable:$true] %s376_s25  ;;  %s379_s8 = int_to_ptr.vmem [resolvable:$true] %s378_s8 }
  0x46   : > { %p2725_p2 = pnand %p2739_p9, %p93_p10  ;;  %s365_s27 = scalar_lea.sflag [#allocation10], %s364_s2 }
  0x47   : > { %390 = sbr.rel (%p3539_p6) target bundleno = 958 (0x3be), region = 48 }
  0x48   : > { %2727 = dma.hbm_to_vmem [thread:$0]  (!%p2725_p2), %s377_s25, 512, %s379_s8, %s365_s27, %s3426_s10, %s3426_s10, %s3427_s18  }
  0x4c   : > { %s3652_s20 = sand.u32 1, %s3402_s9  }
  0x4d   : > { %s2601_s26 = sshll.u32 %s3652_s20, 5  ;;  %s393_s19 = scalar_lea.sflag [#allocation7], %s3652_s20 }
  0x4e   : > { %s3656_s4 = scalar_lea.vmem [#allocation6], %s2601_s26 }
  0x4f   : > { %3357 = dma.done.wait (%p3590_p4), %s393_s19, 512  }
  0x50   : > { %3359 = vsyncadd (%p3590_p4), %s393_s19, 4294966784  ;;  %s402_s0 = sand.u32 1, %s3522_s14   ;;  %s404_s27 = sand.u32 1, %s3390_s28  }
  0x51   : > { %s2602_s10 = sshll.u32 %s404_s27, 5  ;;  %s403_s12 = scalar_lea.sflag [#allocation10], %s402_s0 }
  0x52   : > { %s3666_s16 = scalar_lea.vmem [#allocation9], %s2602_s10 }
  0x53   : > { %3361 = dma.done.wait (%p3535_p5), %s403_s12, 512  }
  0x54   : > { %3363 = vsyncadd (%p3535_p5), %s403_s12, 4294966784  ;;  %p5339_p6 = scmp.eq.s32.totalorder %s3522_s14, 0 }
  0x56   : > { %3365 = dma.done.wait (%p5339_p6), [#allocation10], 1024   ;;  %p5340_p9 = pmov %p5339_p6 }
  0x57   : > { %p5341_p4 = pmov %p5339_p6 }
  0x58   : > { %3367 = vsyncadd (%p5340_p9), [#allocation10], 4294966272 }
  0x59   : > { %3369 = dma.done.wait (%p5341_p4), [#allocation13], 17408   ;;  %p5342_p0 = pmov %p5341_p4 }
  0x5b   : > { %3371 = vsyncadd (%p5342_p0), [#allocation13], 4294949888  ;;  %p5343_p11 = pmov %p5342_p0 }
  0x5c   : > { %p5344_p13 = pmov %p5342_p0 }
  0x5d   : > { %3373 = dma.done.wait (%p5343_p11), [#allocation16], 64  }
  0x5e   : > { %3375 = vsyncadd (%p5344_p13), [#allocation16], 4294967232  ;;  %s3684_s15 = scalar_lea.vmem [#allocation17], %s2601_s26  ;;  %s3686_s25 = scalar_lea.vmem [#allocation18], %s2602_s10 }
  0x5f   : > { %p2609_p5 = scmp.ne.s32.totalorder %s3410_s11, 0 }
  0x61   : > { %479 = sbr.rel (%p2609_p5) target bundleno = 107 (0x6b), region = 76 }
  0x66   : > { %v3428_v0 = vmov 0.0  }
  0x67   : > { %480 = vst [vmem:[#allocation4] sm:$0xff] %v3428_v0 }
  0x68   : > { %481 = vst [vmem:[#allocation4 + $0x8] sm:$0xff] %v3428_v0 }
  0x69   : > { %482 = vst [vmem:[#allocation5 + $0x8] sm:$0xff] %v3428_v0 }
  0x6a   : > { %483 = vst [vmem:[#allocation5] sm:$0xff] %v3428_v0 }
  0x6b PF: > { %v490_v1 = vld [vmem:[#allocation11 + $0x20] sm:$0xff]  ;;  %v491_v2 = vld [vmem:[#allocation11 + $0x28] sm:$0xff]  ;;  %v492_v3 = vld [vmem:[#allocation11 + $0x30] sm:$0xff]  ;;  %vm510_vm0 = vcmask 130048   ;;  %s2682_s18 = sshll.u32 %s3410_s11, 5  ;;  %s5697_s21 = sld [smem:[#allocation146_spill]] }
  0x6c   : > { %537 = vmatpush.msra.mxu0 %v490_v1  ;;  %566 = vmatpush.msra.mxu1 %v491_v2  ;;  %v493_v4 = vld [vmem:[#allocation11 + $0x38] sm:$0xff]  ;;  %v486_v5 = vld [vmem:[#allocation11] sm:$0xff]  ;;  %v487_v6 = vld [vmem:[#allocation11 + $0x8] sm:$0xff]  ;;  %s2381_s8 = sshll.u32 %s3684_s15, 4  ;;  %s2393_s19 = ssub.s32 1, %s3410_s11  ;;  %s5050_s8 = int_to_ptr.vmem [resolvable:$true] %s2381_s8 }
  0x6d   : > { %595 = vmatpush.msra.mxu2 %v492_v3  ;;  %624 = vmatpush.msra.mxu3 %v493_v4  ;;  %v488_v7 = vld [vmem:[#allocation11 + $0x10] sm:$0xff]  ;;  %v489_v8 = vld [vmem:[#allocation11 + $0x18] sm:$0xff]  ;;  %v502_v9 = vld [vmem:[%s3656_s4] sm:$0xff]  ;;  %s2363_s0 = scalar_lea.sflag [#allocation8], %s3652_s20 }
  0x6e   : > { %538 = vmatpush.msra.mxu0 %v486_v5  ;;  %567 = vmatpush.msra.mxu1 %v487_v6  ;;  %v500_v10 = vld [vmem:[#allocation12 + $0x30] sm:$0xff]  ;;  %v501_v11 = vld [vmem:[#allocation12 + $0x38] sm:$0xff]  ;;  %v498_v12 = vld [vmem:[#allocation12 + $0x20] sm:$0xff] }
  0x6f   : > { %596 = vmatpush.msra.mxu2 %v488_v7  ;;  %625 = vmatpush.msra.mxu3 %v489_v8  ;;  %v499_v13 = vld [vmem:[#allocation12 + $0x28] sm:$0xff]  ;;  %v496_v14 = vld [vmem:[#allocation12 + $0x10] sm:$0xff]  ;;  %v497_v15 = vld [vmem:[#allocation12 + $0x18] sm:$0xff] }
  0x70   : > { %2610 = vmatmul.msk.f32.vlgmr.msra.gmra.mxu0 %vm510_vm0, %v502_v9  ;;  %2614 = vmatmul.msk.f32.vlgmr.msra.gmra.mxu1 %vm510_vm0, %v502_v9  ;;  %v494_v16 = vld [vmem:[#allocation12] sm:$0xff]  ;;  %v495_v17 = vld [vmem:[#allocation12 + $0x8] sm:$0xff]  ;;  %v504_v35 = vld [vmem:[%s3656_s4 + $0x10] sm:$0xff] }
  0x71   : > { %2618 = vmatmul.msk.f32.vlgmr.msra.gmra.mxu2 %vm510_vm0, %v502_v9  ;;  %2622 = vmatmul.msk.f32.vlgmr.msra.gmra.mxu3 %vm510_vm0, %v502_v9  ;;  %v3694_v18 = vld [vmem:[#allocation14 + $0x1e0] sm:$0xff]  ;;  %v3698_v20 = vld [vmem:[#allocation14 + $0x1e8] sm:$0xff]  ;;  %v505_v48 = vld [vmem:[%s3656_s4 + $0x18] sm:$0xff]  ;;  %s2380_s7 = scalar_lea.hbm %s5697_s21, %s2682_s18  ;;  %s3284_s14 = scalar_lea.hbm %s5697_s21, 64 }
  0x72   : > { %748 = vmatpush.msrb.mxu2 %v500_v10  ;;  %777 = vmatpush.msrb.mxu3 %v501_v11  ;;  %v3696_v19 = vld [vmem:[#allocation14 + $0x3e0] sm:$0xff]  ;;  %v3700_v21 = vld [vmem:[#allocation14 + $0x3e8] sm:$0xff]  ;;  %s2383_s26 = sshll.u32 %s2380_s7, 4  ;;  %s5052_s26 = int_to_ptr.hbm [resolvable:$true] %s2383_s26 }
  0x73   : > { %690 = vmatpush.msrb.mxu0 %v498_v12  ;;  %719 = vmatpush.msrb.mxu1 %v499_v13  ;;  %v503_v22 = vld [vmem:[%s3656_s4 + $0x8] sm:$0xff]  ;;  %v3707_v23 = vld [vmem:[#allocation14 + $0x1c0] sm:$0xff]  ;;  %s5054_s4 = sshll.u32 %s2393_s19, 5  ;;  %s3278_s11 = sshra.s32 %s5052_s26, 4  ;;  %s3279_s11 = int_to_ptr.hbm [resolvable:$true] %s3278_s11 }
  0x74   : > { %749 = vmatpush.msrb.mxu2 %v496_v14  ;;  %778 = vmatpush.msrb.mxu3 %v497_v15  ;;  %v3709_v24 = vld [vmem:[#allocation14 + $0x3c0] sm:$0xff]  ;;  %v3713_v25 = vld [vmem:[#allocation14 + $0x1c8] sm:$0xff]  ;;  %s3280_s10 = scalar_lea.hbm %s3279_s11, 32  ;;  %p3285_p6 = scmp.lt.s32.totalorder %s3279_s11, %s5697_s21 }
  0x75   : > { %691 = vmatpush.msrb.mxu0 %v494_v16  ;;  %720 = vmatpush.msrb.mxu1 %v495_v17  ;;  %v3715_v26 = vld [vmem:[#allocation14 + $0x3c8] sm:$0xff]  ;;  %v3719_v27 = vld [vmem:[#allocation14 + $0x1a0] sm:$0xff]  ;;  %p3281_p3 = scmp.ne.s32.totalorder %s3279_s11, %s3280_s10  ;;  %p3286_p9 = scmp.lt.s32.totalorder %s3284_s14, %s3280_s10 }
  0x76   : > { %1051 = vmatpush.msra.mxu2 %v3698_v20  ;;  %1074 = vmatpush.msra.mxu3 %v3700_v21  ;;  %v3721_v28 = vld [vmem:[#allocation14 + $0x3a0] sm:$0xff]  ;;  %v3725_v29 = vld [vmem:[#allocation14 + $0x1a8] sm:$0xff] }
  0x77   : > { %1005 = vmatpush.msra.mxu0 %v3694_v18  ;;  %1028 = vmatpush.msra.mxu1 %v3696_v19  ;;  %v3727_v30 = vld [vmem:[#allocation14 + $0x3a8] sm:$0xff]  ;;  %v3731_v31 = vld [vmem:[#allocation14 + $0x180] sm:$0xff]  ;;  %p3282_p10 = pnand %p3281_p3, %p3598_p7  ;;  %p3287_p4 = por %p3286_p9, %p3285_p6 }
  0x78   : > { %2611 = vmatmul.msk.f32.gmra.mxu0 %vm510_vm0, %v503_v22  ;;  %2615 = vmatmul.msk.f32.gmra.mxu1 %vm510_vm0, %v503_v22  ;;  %v3733_v32 = vld [vmem:[#allocation14 + $0x380] sm:$0xff]  ;;  %v3737_v33 = vld [vmem:[#allocation14 + $0x188] sm:$0xff] }
  0x79   : > { %2619 = vmatmul.msk.f32.gmra.mxu2 %vm510_vm0, %v503_v22  ;;  %2623 = vmatmul.msk.f32.gmra.mxu3 %vm510_vm0, %v503_v22  ;;  %v3739_v34 = vld [vmem:[#allocation14 + $0x388] sm:$0xff]  ;;  %v3748_v36 = vld [vmem:[#allocation14 + $0x160] sm:$0xff]  ;;  %p3283_p2 = pneg %p3282_p10 }
  0x7a   : > { %1006 = vmatpush.msra.mxu0 %v3707_v23  ;;  %1029 = vmatpush.msra.mxu1 %v3709_v24  ;;  %v3750_v37 = vld [vmem:[#allocation14 + $0x360] sm:$0xff]  ;;  %v3754_v38 = vld [vmem:[#allocation14 + $0x168] sm:$0xff] }
  0x7b   : > { %1052 = vmatpush.msra.mxu2 %v3713_v25  ;;  %1075 = vmatpush.msra.mxu3 %v3715_v26  ;;  %v3756_v39 = vld [vmem:[#allocation14 + $0x368] sm:$0xff]  ;;  %v3760_v40 = vld [vmem:[#allocation14 + $0x140] sm:$0xff]  ;;  %p3288_p0 = pnand %p3287_p4, %p3283_p2 }
  0x7c   : > { %1007 = vmatpush.msra.mxu0 %v3719_v27  ;;  %1030 = vmatpush.msra.mxu1 %v3721_v28  ;;  %v3762_v41 = vld [vmem:[#allocation14 + $0x340] sm:$0xff]  ;;  %v3766_v42 = vld [vmem:[#allocation14 + $0x148] sm:$0xff] }
  0x7d   : > { %1053 = vmatpush.msra.mxu2 %v3725_v29  ;;  %1076 = vmatpush.msra.mxu3 %v3727_v30  ;;  %v3768_v43 = vld [vmem:[#allocation14 + $0x348] sm:$0xff]  ;;  %v3772_v44 = vld [vmem:[#allocation14 + $0x120] sm:$0xff] }
  0x7e   : > { %1008 = vmatpush.msra.mxu0 %v3731_v31  ;;  %1031 = vmatpush.msra.mxu1 %v3733_v32  ;;  %v3774_v45 = vld [vmem:[#allocation14 + $0x320] sm:$0xff]  ;;  %v3778_v46 = vld [vmem:[#allocation14 + $0x128] sm:$0xff] }
  0x7f   : > { %1054 = vmatpush.msra.mxu2 %v3737_v33  ;;  %1077 = vmatpush.msra.mxu3 %v3739_v34  ;;  %v3780_v47 = vld [vmem:[#allocation14 + $0x328] sm:$0xff]  ;;  %v3789_v49 = vld [vmem:[#allocation14 + $0x100] sm:$0xff] }
  0x80   : > { %2612 = vmatmul.msk.f32.gmra.mxu0 %vm510_vm0, %v504_v35  ;;  %2616 = vmatmul.msk.f32.gmra.mxu1 %vm510_vm0, %v504_v35  ;;  %v3791_v50 = vld [vmem:[#allocation14 + $0x300] sm:$0xff]  ;;  %v3795_v51 = vld [vmem:[#allocation14 + $0x108] sm:$0xff] }
  0x81   : > { %2620 = vmatmul.msk.f32.gmra.mxu2 %vm510_vm0, %v504_v35  ;;  %2624 = vmatmul.msk.f32.gmra.mxu3 %vm510_vm0, %v504_v35  ;;  %v3797_v52 = vld [vmem:[#allocation14 + $0x308] sm:$0xff]  ;;  %v3801_v53 = vld [vmem:[#allocation14 + $0xe0] sm:$0xff] }
  0x82   : > { %1009 = vmatpush.msra.mxu0 %v3748_v36  ;;  %1032 = vmatpush.msra.mxu1 %v3750_v37  ;;  %v3803_v54 = vld [vmem:[#allocation14 + $0x2e0] sm:$0xff]  ;;  %v3807_v55 = vld [vmem:[#allocation14 + $0xe8] sm:$0xff] }
  0x83   : > { %1055 = vmatpush.msra.mxu2 %v3754_v38  ;;  %1078 = vmatpush.msra.mxu3 %v3756_v39  ;;  %v3809_v56 = vld [vmem:[#allocation14 + $0x2e8] sm:$0xff]  ;;  %v3813_v57 = vld [vmem:[#allocation14 + $0xc0] sm:$0xff] }
  0x84   : > { %1010 = vmatpush.msra.mxu0 %v3760_v40  ;;  %1033 = vmatpush.msra.mxu1 %v3762_v41  ;;  %v3815_v58 = vld [vmem:[#allocation14 + $0x2c0] sm:$0xff]  ;;  %v3819_v59 = vld [vmem:[#allocation14 + $0xc8] sm:$0xff] }
  0x85   : > { %1056 = vmatpush.msra.mxu2 %v3766_v42  ;;  %1079 = vmatpush.msra.mxu3 %v3768_v43  ;;  %v3821_v60 = vld [vmem:[#allocation14 + $0x2c8] sm:$0xff]  ;;  %v506_v61 = vld [vmem:[%s3666_s16] sm:$0xff] }
  0x86   : > { %1011 = vmatpush.msra.mxu0 %v3772_v44  ;;  %1034 = vmatpush.msra.mxu1 %v3774_v45  ;;  %v3830_v62 = vld [vmem:[#allocation14 + $0xa0] sm:$0xff]  ;;  %v3836_v0 = vld [vmem:[#allocation14 + $0xa8] sm:$0xff] }
  0x87   : > { %1057 = vmatpush.msra.mxu2 %v3778_v46  ;;  %1080 = vmatpush.msra.mxu3 %v3780_v47  ;;  %v3832_v63 = vld [vmem:[#allocation14 + $0x2a0] sm:$0xff]  ;;  %v3838_v1 = vld [vmem:[#allocation14 + $0x2a8] sm:$0xff] }
  0x88   : > { %2613 = vmatmul.msk.f32.gmra.mxu0 %vm510_vm0, %v505_v48  ;;  %2617 = vmatmul.msk.f32.gmra.mxu1 %vm510_vm0, %v505_v48  ;;  %v3842_v2 = vld [vmem:[#allocation14 + $0x80] sm:$0xff]  ;;  %v3848_v4 = vld [vmem:[#allocation14 + $0x88] sm:$0xff] }
  0x89   : > { %2621 = vmatmul.msk.f32.gmra.mxu2 %vm510_vm0, %v505_v48  ;;  %2625 = vmatmul.msk.f32.gmra.mxu3 %vm510_vm0, %v505_v48  ;;  %v3844_v3 = vld [vmem:[#allocation14 + $0x280] sm:$0xff]  ;;  %v3850_v5 = vld [vmem:[#allocation14 + $0x288] sm:$0xff] }
  0x8a   : > { %1012 = vmatpush.msra.mxu0 %v3789_v49  ;;  %1035 = vmatpush.msra.mxu1 %v3791_v50  ;;  %v3854_v6 = vld [vmem:[#allocation14 + $0x60] sm:$0xff]  ;;  %v3860_v8 = vld [vmem:[#allocation14 + $0x68] sm:$0xff] }
  0x8b   : > { %1058 = vmatpush.msra.mxu2 %v3795_v51  ;;  %1081 = vmatpush.msra.mxu3 %v3797_v52  ;;  %v3856_v7 = vld [vmem:[#allocation14 + $0x260] sm:$0xff]  ;;  %5346 = vst [vmem:[#allocation34_spill] sm:$0xff] %v3860_v8  ;;  %v3862_v9 = vld [vmem:[#allocation14 + $0x268] sm:$0xff] }
  0x8c   : > { %1013 = vmatpush.msra.mxu0 %v3801_v53  ;;  %1036 = vmatpush.msra.mxu1 %v3803_v54  ;;  %5345 = vst [vmem:[#allocation33_spill] sm:$0xff] %v3856_v7  ;;  %v507_v10 = vld [vmem:[%s3666_s16 + $0x8] sm:$0xff]  ;;  %v3871_v11 = vld [vmem:[#allocation14 + $0x40] sm:$0xff] }
  0x8d   : > { %1059 = vmatpush.msra.mxu2 %v3807_v55  ;;  %1082 = vmatpush.msra.mxu3 %v3809_v56  ;;  %5347 = vst [vmem:[#allocation35_spill] sm:$0xff] %v3862_v9  ;;  %v3873_v12 = vld [vmem:[#allocation14 + $0x240] sm:$0xff]  ;;  %v3877_v13 = vld [vmem:[#allocation14 + $0x48] sm:$0xff] }
  0x8e   : > { %1014 = vmatpush.msra.mxu0 %v3813_v57  ;;  %1037 = vmatpush.msra.mxu1 %v3815_v58  ;;  %5348 = vst [vmem:[#allocation36_spill] sm:$0xff] %v3871_v11  ;;  %v3879_v14 = vld [vmem:[#allocation14 + $0x248] sm:$0xff]  ;;  %v3883_v15 = vld [vmem:[#allocation14 + $0x20] sm:$0xff] }
  0x8f   : > { %1060 = vmatpush.msra.mxu2 %v3819_v59  ;;  %1083 = vmatpush.msra.mxu3 %v3821_v60  ;;  %5349 = vst [vmem:[#allocation37_spill] sm:$0xff] %v3873_v12  ;;  %v3885_v16 = vld [vmem:[#allocation14 + $0x220] sm:$0xff]  ;;  %v3889_v17 = vld [vmem:[#allocation14 + $0x28] sm:$0xff] }
  0x90   : > { %2626 = vmatmul.msk.f32.vlgmr.msrb.gmra.mxu0 %vm510_vm0, %v506_v61  ;;  %2630 = vmatmul.msk.f32.vlgmr.msrb.gmra.mxu1 %vm510_vm0, %v506_v61  ;;  %5350 = vst [vmem:[#allocation38_spill] sm:$0xff] %v3877_v13  ;;  %v3891_v22 = vld [vmem:[#allocation14 + $0x228] sm:$0xff]  ;;  %v3895_v35 = vld [vmem:[#allocation14] sm:$0xff] }
  0x91   : > { %2634 = vmatmul.msk.f32.vlgmr.msrb.gmra.mxu2 %vm510_vm0, %v506_v61  ;;  %2638 = vmatmul.msk.f32.vlgmr.msrb.gmra.mxu3 %vm510_vm0, %v506_v61  ;;  %5351 = vst [vmem:[#allocation39_spill] sm:$0xff] %v3879_v14  ;;  %v3897_v48 = vld [vmem:[#allocation14 + $0x200] sm:$0xff]  ;;  %v3901_v61 = vld [vmem:[#allocation14 + $0x8] sm:$0xff] }
  0x92   : > { %1015 = vmatpush.msra.mxu0 %v3830_v62  ;;  %1038 = vmatpush.msra.mxu1 %v3832_v63  ;;  %5352 = vst [vmem:[#allocation40_spill] sm:$0xff] %v3883_v15 }
  0x93   : > { %1061 = vmatpush.msra.mxu2 %v3836_v0  ;;  %1084 = vmatpush.msra.mxu3 %v3838_v1  ;;  %5353 = vst [vmem:[#allocation41_spill] sm:$0xff] %v3885_v16 }
  0x94   : > { %1016 = vmatpush.msra.mxu0 %v3842_v2  ;;  %1039 = vmatpush.msra.mxu1 %v3844_v3  ;;  %5354 = vst [vmem:[#allocation42_spill] sm:$0xff] %v3889_v17 }
  0x95   : > { %1062 = vmatpush.msra.mxu2 %v3848_v4  ;;  %1085 = vmatpush.msra.mxu3 %v3850_v5  ;;  %5355 = vst [vmem:[#allocation43_spill] sm:$0xff] %v3891_v22 }
  0x96   : > { %1017 = vmatpush.msra.mxu0 %v3854_v6  ;;  %1040 = vmatpush.msra.mxu1 %v3856_v7  ;;  %5356 = vst [vmem:[#allocation44_spill] sm:$0xff] %v3895_v35  ;;  %v4105_v7 = vld [vmem:[#allocation14 + $0x38] sm:$0xff] }
  0x97   : > { %1063 = vmatpush.msra.mxu2 %v3860_v8  ;;  %1086 = vmatpush.msra.mxu3 %v3862_v9  ;;  %5357 = vst [vmem:[#allocation45_spill] sm:$0xff] %v3897_v48  ;;  %v4050_v9 = vld [vmem:[#allocation4 + $0x8] sm:$0xff]  ;;  %v4066_v8 = vld [vmem:[#allocation14 + $0x98] sm:$0xff] }
  0x98   : > { %2627 = vmatmul.msk.f32.gmra.mxu0 %vm510_vm0, %v507_v10  ;;  %2631 = vmatmul.msk.f32.gmra.mxu1 %vm510_vm0, %v507_v10  ;;  %5358 = vst [vmem:[#allocation46_spill] sm:$0xff] %v3901_v61 }
  0x99   : > { %2635 = vmatmul.msk.f32.gmra.mxu2 %vm510_vm0, %v507_v10  ;;  %2639 = vmatmul.msk.f32.gmra.mxu3 %vm510_vm0, %v507_v10  ;;  %v3903_v10 = vld [vmem:[#allocation14 + $0x208] sm:$0xff]  ;;  %5406 = vst [vmem:[#allocation94_spill] sm:$0xff] %v4066_v8 }
  0x9a   : > { %1018 = vmatpush.msra.mxu0 %v3871_v11  ;;  %1041 = vmatpush.msra.mxu1 %v3873_v12  ;;  %5359 = vst [vmem:[#allocation47_spill] sm:$0xff] %v3903_v10  ;;  %v508_v12 = vld [vmem:[%s3666_s16 + $0x10] sm:$0xff]  ;;  %v4009_v11 = vld [vmem:[#allocation14 + $0x118] sm:$0xff] }
  0x9b   : > { %1064 = vmatpush.msra.mxu2 %v3877_v13  ;;  %1087 = vmatpush.msra.mxu3 %v3879_v14  ;;  %v3936_v14 = vld [vmem:[#allocation14 + $0x1b0] sm:$0xff]  ;;  %v3954_v13 = vld [vmem:[#allocation14 + $0x198] sm:$0xff]  ;;  %5390 = vst [vmem:[#allocation78_spill] sm:$0xff] %v4009_v11 }
  0x9c   : > { %1019 = vmatpush.msra.mxu0 %v3883_v15  ;;  %1042 = vmatpush.msra.mxu1 %v3885_v16  ;;  %v3912_v15 = vld [vmem:[#allocation14 + $0x1f0] sm:$0xff]  ;;  %5368 = vst [vmem:[#allocation56_spill] sm:$0xff] %v3936_v14 }
  0x9d   : > { %1065 = vmatpush.msra.mxu2 %v3889_v17  ;;  %1088 = vmatpush.msra.mxu3 %v3891_v22  ;;  %5360 = vst [vmem:[#allocation48_spill] sm:$0xff] %v3912_v15  ;;  %v3914_v16 = vld [vmem:[#allocation14 + $0x3f0] sm:$0xff]  ;;  %v3918_v17 = vld [vmem:[#allocation14 + $0x1f8] sm:$0xff] }
  0x9e   : > { %1020 = vmatpush.msra.mxu0 %v3895_v35  ;;  %1043 = vmatpush.msra.mxu1 %v3897_v48  ;;  %5361 = vst [vmem:[#allocation49_spill] sm:$0xff] %v3914_v16  ;;  %v3920_v22 = vld [vmem:[#allocation14 + $0x3f8] sm:$0xff]  ;;  %v3924_v48 = vld [vmem:[#allocation14 + $0x1d0] sm:$0xff] }
  0x9f   : > { %1066 = vmatpush.msra.mxu2 %v3901_v61  ;;  %1089 = vmatpush.msra.mxu3 %v3903_v10  ;;  %5362 = vst [vmem:[#allocation50_spill] sm:$0xff] %v3918_v17  ;;  %v3926_v61 = vld [vmem:[#allocation14 + $0x3d0] sm:$0xff]  ;;  %v3930_v10 = vld [vmem:[#allocation14 + $0x1d8] sm:$0xff] }
  0xa0   : > { %2628 = vmatmul.msk.f32.gmra.mxu0 %vm510_vm0, %v508_v12  ;;  %2632 = vmatmul.msk.f32.gmra.mxu1 %vm510_vm0, %v508_v12  ;;  %5363 = vst [vmem:[#allocation51_spill] sm:$0xff] %v3920_v22  ;;  %v3932_v35 = vld [vmem:[#allocation14 + $0x3d8] sm:$0xff] }
  0xa1   : > { %2636 = vmatmul.msk.f32.gmra.mxu2 %vm510_vm0, %v508_v12  ;;  %2640 = vmatmul.msk.f32.gmra.mxu3 %vm510_vm0, %v508_v12  ;;  %5364 = vst [vmem:[#allocation52_spill] sm:$0xff] %v3924_v48  ;;  %v3938_v12 = vld [vmem:[#allocation14 + $0x3b0] sm:$0xff] }
  0xa2   : > { %5365 = vst [vmem:[#allocation53_spill] sm:$0xff] %v3926_v61  ;;  %1097 = vmatpush.msrb.mxu0 %v3912_v15  ;;  %1120 = vmatpush.msrb.mxu1 %v3914_v16  ;;  %v3942_v15 = vld [vmem:[#allocation14 + $0x1b8] sm:$0xff] }
  0xa3   : > { %5366 = vst [vmem:[#allocation54_spill] sm:$0xff] %v3930_v10  ;;  %1143 = vmatpush.msrb.mxu2 %v3918_v17  ;;  %1166 = vmatpush.msrb.mxu3 %v3920_v22  ;;  %v3944_v16 = vld [vmem:[#allocation14 + $0x3b8] sm:$0xff]  ;;  %v3948_v17 = vld [vmem:[#allocation14 + $0x190] sm:$0xff] }
  0xa4   : > { %5367 = vst [vmem:[#allocation55_spill] sm:$0xff] %v3932_v35  ;;  %1098 = vmatpush.msrb.mxu0 %v3924_v48  ;;  %1121 = vmatpush.msrb.mxu1 %v3926_v61  ;;  %v3950_v22 = vld [vmem:[#allocation14 + $0x390] sm:$0xff]  ;;  %v3956_v48 = vld [vmem:[#allocation14 + $0x398] sm:$0xff] }
  0xa5   : > { %5369 = vst [vmem:[#allocation57_spill] sm:$0xff] %v3938_v12  ;;  %1144 = vmatpush.msrb.mxu2 %v3930_v10  ;;  %1167 = vmatpush.msrb.mxu3 %v3932_v35  ;;  %v509_v61 = vld [vmem:[%s3666_s16 + $0x18] sm:$0xff]  ;;  %v3989_v35 = vld [vmem:[#allocation14 + $0x130] sm:$0xff] }
  0xa6   : > { %5370 = vst [vmem:[#allocation58_spill] sm:$0xff] %v3942_v15  ;;  %1099 = vmatpush.msrb.mxu0 %v3936_v14  ;;  %1122 = vmatpush.msrb.mxu1 %v3938_v12  ;;  %v3965_v14 = vld [vmem:[#allocation14 + $0x170] sm:$0xff] }
  0xa7   : > { %5371 = vst [vmem:[#allocation59_spill] sm:$0xff] %v3944_v16  ;;  %1145 = vmatpush.msrb.mxu2 %v3942_v15  ;;  %1168 = vmatpush.msrb.mxu3 %v3944_v16  ;;  %v3967_v12 = vld [vmem:[#allocation14 + $0x370] sm:$0xff]  ;;  %v3971_v15 = vld [vmem:[#allocation14 + $0x178] sm:$0xff] }
  0xa8   : > { %5372 = vst [vmem:[#allocation60_spill] sm:$0xff] %v3948_v17  ;;  %1100 = vmatpush.msrb.mxu0 %v3948_v17  ;;  %1123 = vmatpush.msrb.mxu1 %v3950_v22  ;;  %v3973_v16 = vld [vmem:[#allocation14 + $0x378] sm:$0xff]  ;;  %v3991_v10 = vld [vmem:[#allocation14 + $0x330] sm:$0xff] }
  0xa9   : > { %5373 = vst [vmem:[#allocation61_spill] sm:$0xff] %v3950_v22  ;;  %1146 = vmatpush.msrb.mxu2 %v3954_v13  ;;  %1169 = vmatpush.msrb.mxu3 %v3956_v48  ;;  %v3977_v22 = vld [vmem:[#allocation14 + $0x150] sm:$0xff]  ;;  %v3985_v17 = vld [vmem:[#allocation14 + $0x358] sm:$0xff] }
  0xaa   : > { %5374 = vst [vmem:[#allocation62_spill] sm:$0xff] %v3954_v13  ;;  %2629 = vmatmul.msk.f32.gmra.mxu0 %vm510_vm0, %v509_v61  ;;  %2633 = vmatmul.msk.f32.gmra.mxu1 %vm510_vm0, %v509_v61  ;;  %v3979_v13 = vld [vmem:[#allocation14 + $0x350] sm:$0xff] }
  0xab   : > { %5375 = vst [vmem:[#allocation63_spill] sm:$0xff] %v3956_v48  ;;  %2637 = vmatmul.msk.f32.gmra.mxu2 %vm510_vm0, %v509_v61  ;;  %2641 = vmatmul.msk.f32.gmra.mxu3 %vm510_vm0, %v509_v61  ;;  %v3983_v48 = vld [vmem:[#allocation14 + $0x158] sm:$0xff]  ;;  %v3993_v61 = vld [vmem:[#allocation4] sm:$0xff] }
  0xac   : > { %5376 = vst [vmem:[#allocation64_spill] sm:$0xff] %v3965_v14  ;;  %1101 = vmatpush.msrb.mxu0 %v3965_v14  ;;  %1124 = vmatpush.msrb.mxu1 %v3967_v12  ;;  %v3997_v14 = vld [vmem:[#allocation14 + $0x138] sm:$0xff] }
  0xad   : > { %5377 = vst [vmem:[#allocation65_spill] sm:$0xff] %v3967_v12  ;;  %1147 = vmatpush.msrb.mxu2 %v3971_v15  ;;  %1170 = vmatpush.msrb.mxu3 %v3973_v16  ;;  %v3999_v12 = vld [vmem:[#allocation14 + $0x338] sm:$0xff] }
  0xae   : > { %5378 = vst [vmem:[#allocation66_spill] sm:$0xff] %v3971_v15  ;;  %1102 = vmatpush.msrb.mxu0 %v3977_v22  ;;  %1125 = vmatpush.msrb.mxu1 %v3979_v13  ;;  %v4003_v15 = vld [vmem:[#allocation14 + $0x110] sm:$0xff] }
  0xaf   : > { %5379 = vst [vmem:[#allocation67_spill] sm:$0xff] %v3973_v16  ;;  %1148 = vmatpush.msrb.mxu2 %v3983_v48  ;;  %1171 = vmatpush.msrb.mxu3 %v3985_v17  ;;  %v4005_v16 = vld [vmem:[#allocation14 + $0x310] sm:$0xff] }
  0xb0   : > { %5380 = vst [vmem:[#allocation68_spill] sm:$0xff] %v3977_v22  ;;  %1103 = vmatpush.msrb.mxu0 %v3989_v35  ;;  %1126 = vmatpush.msrb.mxu1 %v3991_v10  ;;  %v4011_v22 = vld [vmem:[#allocation14 + $0x318] sm:$0xff] }
  0xb1   : > { %5381 = vst [vmem:[#allocation69_spill] sm:$0xff] %v3979_v13  ;;  %v4014_v13 = vmul.f32 0.0, %v3993_v61  ;;  %1149 = vmatpush.msrb.mxu2 %v3997_v14  ;;  %1172 = vmatpush.msrb.mxu3 %v3999_v12 }
  0xb2   : > { %5382 = vst [vmem:[#allocation70_spill] sm:$0xff] %v3983_v48  ;;  %1104 = vmatpush.msrb.mxu0 %v4003_v15  ;;  %1127 = vmatpush.msrb.mxu1 %v4005_v16  ;;  %v4048_v48 = vld [vmem:[#allocation14 + $0x2b0] sm:$0xff] }
  0xb3   : > { %5383 = vst [vmem:[#allocation71_spill] sm:$0xff] %v3985_v17  ;;  %1150 = vmatpush.msrb.mxu2 %v4009_v11  ;;  %1173 = vmatpush.msrb.mxu3 %v4011_v22  ;;  %v4028_v17 = vld [vmem:[#allocation14 + $0xf8] sm:$0xff]  ;;  %v4036_v11 = vld [vmem:[#allocation14 + $0x2d0] sm:$0xff] }
  0xb4   : > { %5384 = vst [vmem:[#allocation72_spill] sm:$0xff] %v3989_v35  ;;  %v4024_v35 = vld [vmem:[#allocation14 + $0x2f0] sm:$0xff]  ;;  %1021 = vmatmul.f32.vlgmr.msra.gmra.mxu0 %v3993_v61  ;;  %1044 = vmatmul.f32.vlgmr.msra.gmra.mxu1 %v4014_v13 }
  0xb5   : > { %5385 = vst [vmem:[#allocation73_spill] sm:$0xff] %v3991_v10  ;;  %v4022_v10 = vld [vmem:[#allocation14 + $0xf0] sm:$0xff]  ;;  %1067 = vmatmul.f32.vlgmr.msra.gmra.mxu2 %v3993_v61  ;;  %1090 = vmatmul.f32.vlgmr.msra.gmra.mxu3 %v4014_v13 }
  0xb6   : > { %5386 = vst [vmem:[#allocation74_spill] sm:$0xff] %v3997_v14  ;;  %v4030_v14 = vld [vmem:[#allocation14 + $0x2f8] sm:$0xff]  ;;  %1105 = vmatpush.msrb.mxu0 %v4022_v10  ;;  %1128 = vmatpush.msrb.mxu1 %v4024_v35 }
  0xb7   : > { %5387 = vst [vmem:[#allocation75_spill] sm:$0xff] %v3999_v12  ;;  %1151 = vmatpush.msrb.mxu2 %v4028_v17  ;;  %1174 = vmatpush.msrb.mxu3 %v4030_v14  ;;  %v4046_v12 = vld [vmem:[#allocation14 + $0xb0] sm:$0xff] }
  0xb8   : > { %5388 = vst [vmem:[#allocation76_spill] sm:$0xff] %v4003_v15  ;;  %v4042_v15 = vld [vmem:[#allocation14 + $0x2d8] sm:$0xff]  ;;  %1129 = vmatpush.msrb.mxu1 %v4036_v11 }
  0xb9   : > { %5389 = vst [vmem:[#allocation77_spill] sm:$0xff] %v4005_v16  ;;  %v4034_v16 = vld [vmem:[#allocation14 + $0xd0] sm:$0xff]  ;;  %1175 = vmatpush.msrb.mxu3 %v4042_v15 }
  0xba   : > { %5391 = vst [vmem:[#allocation79_spill] sm:$0xff] %v4011_v22  ;;  %v4040_v22 = vld [vmem:[#allocation14 + $0xd8] sm:$0xff]  ;;  %1106 = vmatpush.msrb.mxu0 %v4034_v16  ;;  %1130 = vmatpush.msrb.mxu1 %v4048_v48 }
  0xbb   : > { %5392 = vst [vmem:[#allocation80_spill] sm:$0xff] %v4022_v10  ;;  %v4054_v10 = vld [vmem:[#allocation14 + $0xb8] sm:$0xff]  ;;  %1152 = vmatpush.msrb.mxu2 %v4040_v22 }
  0xbc   : > { %5393 = vst [vmem:[#allocation81_spill] sm:$0xff] %v4024_v35  ;;  %v4056_v35 = vld [vmem:[#allocation14 + $0x2b8] sm:$0xff]  ;;  %1107 = vmatpush.msrb.mxu0 %v4046_v12  ;;  %1047 = vmatmul.f32.gmra.mxu1 %v4050_v9 }
  0xbd   : > { %5394 = vst [vmem:[#allocation82_spill] sm:$0xff] %v4028_v17  ;;  %v4060_v17 = vld [vmem:[#allocation14 + $0x90] sm:$0xff]  ;;  %1153 = vmatpush.msrb.mxu2 %v4054_v10  ;;  %1176 = vmatpush.msrb.mxu3 %v4056_v35 }
  0xbe   : > { %5395 = vst [vmem:[#allocation83_spill] sm:$0xff] %v4030_v14  ;;  %v4062_v14 = vld [vmem:[#allocation14 + $0x290] sm:$0xff]  ;;  %1108 = vmatpush.msrb.mxu0 %v4060_v17  ;;  %1093 = vmatmul.f32.gmra.mxu3 %v4050_v9 }
  0xbf   : > { %5396 = vst [vmem:[#allocation84_spill] sm:$0xff] %v4034_v16  ;;  %v4068_v16 = vld [vmem:[#allocation14 + $0x298] sm:$0xff]  ;;  %1131 = vmatpush.msrb.mxu1 %v4062_v14  ;;  %1154 = vmatpush.msrb.mxu2 %v4066_v8 }
  0xc0   : > { %5397 = vst [vmem:[#allocation85_spill] sm:$0xff] %v4036_v11  ;;  %v1003_v11 = vmul.f32 0.0, %v4050_v9  ;;  %1177 = vmatpush.msrb.mxu3 %v4068_v16  ;;  %v4095_v8 = vld [vmem:[#allocation14 + $0x258] sm:$0xff] }
  0xc1   : > { %5398 = vst [vmem:[#allocation86_spill] sm:$0xff] %v4040_v22  ;;  %v4101_v22 = vld [vmem:[#allocation14 + $0x230] sm:$0xff] }
  0xc2   : > { %5399 = vst [vmem:[#allocation87_spill] sm:$0xff] %v4042_v15  ;;  %1024 = vmatmul.f32.gmra.mxu0 %v1003_v11  ;;  %v4082_v15 = vld [vmem:[#allocation14 + $0x78] sm:$0xff]  ;;  %1070 = vmatmul.f32.gmra.mxu2 %v1003_v11 }
  0xc3   : > { %5400 = vst [vmem:[#allocation88_spill] sm:$0xff] %v4046_v12  ;;  %v4077_v12 = vld [vmem:[#allocation14 + $0x70] sm:$0xff]  ;;  %1155 = vmatpush.msrb.mxu2 %v4082_v15 }
  0xc4   : > { %5401 = vst [vmem:[#allocation89_spill] sm:$0xff] %v4048_v48  ;;  %v4079_v48 = vld [vmem:[#allocation14 + $0x270] sm:$0xff]  ;;  %1109 = vmatpush.msrb.mxu0 %v4077_v12 }
  0xc5   : > { %5402 = vst [vmem:[#allocation90_spill] sm:$0xff] %v4054_v10  ;;  %v4084_v10 = vld [vmem:[#allocation14 + $0x278] sm:$0xff]  ;;  %1132 = vmatpush.msrb.mxu1 %v4079_v48 }
  0xc6   : > { %5403 = vst [vmem:[#allocation91_spill] sm:$0xff] %v4056_v35  ;;  %1178 = vmatpush.msrb.mxu3 %v4084_v10  ;;  %v4099_v35 = vld [vmem:[#allocation14 + $0x30] sm:$0xff] }
  0xc7   : > { %5404 = vst [vmem:[#allocation92_spill] sm:$0xff] %v4060_v17  ;;  %v4087_v17 = vld [vmem:[#allocation14 + $0x50] sm:$0xff] }
  0xc8   : > { %5405 = vst [vmem:[#allocation93_spill] sm:$0xff] %v4062_v14  ;;  %v4089_v14 = vld [vmem:[#allocation14 + $0x250] sm:$0xff]  ;;  %1110 = vmatpush.msrb.mxu0 %v4087_v17  ;;  %1179 = vmatpush.msrb.mxu3 %v4095_v8 }
  0xc9   : > { %5407 = vst [vmem:[#allocation95_spill] sm:$0xff] %v4068_v16  ;;  %v4093_v16 = vld [vmem:[#allocation14 + $0x58] sm:$0xff]  ;;  %1133 = vmatpush.msrb.mxu1 %v4089_v14 }
  0xca   : > { %5408 = vst [vmem:[#allocation96_spill] sm:$0xff] %v4077_v12  ;;  %v4107_v12 = vld [vmem:[#allocation14 + $0x238] sm:$0xff]  ;;  %1156 = vmatpush.msrb.mxu2 %v4093_v16  ;;  %1111 = vmatpush.msrb.mxu0 %v4099_v35 }
  0xcb   : > { %5409 = vst [vmem:[#allocation97_spill] sm:$0xff] %v4079_v48  ;;  %v4111_v48 = vld [vmem:[#allocation14 + $0x10] sm:$0xff]  ;;  %1134 = vmatpush.msrb.mxu1 %v4101_v22  ;;  %1180 = vmatpush.msrb.mxu3 %v4107_v12 }
  0xcc   : > { %5410 = vst [vmem:[#allocation98_spill] sm:$0xff] %v4082_v15  ;;  %v4113_v15 = vld [vmem:[#allocation14 + $0x210] sm:$0xff]  ;;  %1157 = vmatpush.msrb.mxu2 %v4105_v7  ;;  %1112 = vmatpush.msrb.mxu0 %v4111_v48 }
  0xcd   : > { %5411 = vst [vmem:[#allocation99_spill] sm:$0xff] %v4084_v10  ;;  %v4117_v10 = vld [vmem:[#allocation14 + $0x18] sm:$0xff]  ;;  %1135 = vmatpush.msrb.mxu1 %v4113_v15  ;;  %1113 = vmatmul.f32.vlgmr.msrb.gmra.mxu0 %v3993_v61 }
  0xce   : > { %5412 = vst [vmem:[#allocation100_spill] sm:$0xff] %v4087_v17  ;;  %v4119_v17 = vld [vmem:[#allocation14 + $0x218] sm:$0xff]  ;;  %1158 = vmatpush.msrb.mxu2 %v4117_v10  ;;  %1136 = vmatmul.f32.vlgmr.msrb.gmra.mxu1 %v4014_v13 }
  0xcf   : > { %1181 = vmatpush.msrb.mxu3 %v4119_v17  ;;  %1159 = vmatmul.f32.vlgmr.msrb.gmra.mxu2 %v3993_v61  ;;  %v5454_v61 = vld [vmem:[#allocation74_spill] sm:$0xff] }
  0xd0   : > { %1182 = vmatmul.f32.vlgmr.msrb.gmra.mxu3 %v4014_v13  ;;  %1348 = vmatpush.msra.mxu0 %v3694_v18  ;;  %v5413_v18 = vld [vmem:[#allocation33_spill] sm:$0xff] }
  0xd1   : > { %1371 = vmatpush.msra.mxu1 %v3696_v19  ;;  %1394 = vmatpush.msra.mxu2 %v3698_v20  ;;  %v5414_v19 = vld [vmem:[#allocation34_spill] sm:$0xff]  ;;  %v5415_v20 = vld [vmem:[#allocation35_spill] sm:$0xff]  ;;  %v5453_v13 = vld [vmem:[#allocation73_spill] sm:$0xff] }
  0xd2   : > { %1417 = vmatpush.msra.mxu3 %v3700_v21  ;;  %1349 = vmatpush.msra.mxu0 %v3707_v23  ;;  %v5416_v21 = vld [vmem:[#allocation36_spill] sm:$0xff]  ;;  %v5417_v23 = vld [vmem:[#allocation37_spill] sm:$0xff] }
  0xd3   : > { %1372 = vmatpush.msra.mxu1 %v3709_v24  ;;  %1395 = vmatpush.msra.mxu2 %v3713_v25  ;;  %v5418_v24 = vld [vmem:[#allocation38_spill] sm:$0xff]  ;;  %v5419_v25 = vld [vmem:[#allocation39_spill] sm:$0xff] }
  0xd4   : > { %1418 = vmatpush.msra.mxu3 %v3715_v26  ;;  %1350 = vmatpush.msra.mxu0 %v3719_v27  ;;  %v5420_v26 = vld [vmem:[#allocation40_spill] sm:$0xff]  ;;  %v5421_v27 = vld [vmem:[#allocation41_spill] sm:$0xff] }
  0xd5   : > { %1373 = vmatpush.msra.mxu1 %v3721_v28  ;;  %1396 = vmatpush.msra.mxu2 %v3725_v29  ;;  %v5422_v28 = vld [vmem:[#allocation42_spill] sm:$0xff]  ;;  %v5423_v29 = vld [vmem:[#allocation43_spill] sm:$0xff] }
  0xd6   : > { %1419 = vmatpush.msra.mxu3 %v3727_v30  ;;  %1116 = vmatmul.f32.gmra.mxu0 %v1003_v11  ;;  %v5424_v30 = vld [vmem:[#allocation44_spill] sm:$0xff] }
  0xd7   : > { %1139 = vmatmul.f32.gmra.mxu1 %v4050_v9  ;;  %1162 = vmatmul.f32.gmra.mxu2 %v1003_v11  ;;  %v5452_v11 = vld [vmem:[#allocation72_spill] sm:$0xff] }
  0xd8   : > { %1185 = vmatmul.f32.gmra.mxu3 %v4050_v9  ;;  %1351 = vmatpush.msra.mxu0 %v3731_v31  ;;  %v5425_v31 = vld [vmem:[#allocation45_spill] sm:$0xff]  ;;  %v5451_v9 = vld [vmem:[#allocation71_spill] sm:$0xff] }
  0xd9   : > { %1374 = vmatpush.msra.mxu1 %v3733_v32  ;;  %1397 = vmatpush.msra.mxu2 %v3737_v33  ;;  %v5426_v32 = vld [vmem:[#allocation46_spill] sm:$0xff]  ;;  %v5427_v33 = vld [vmem:[#allocation47_spill] sm:$0xff] }
  0xda   : > { %1420 = vmatpush.msra.mxu3 %v3739_v34  ;;  %1352 = vmatpush.msra.mxu0 %v3748_v36  ;;  %v5428_v34 = vld [vmem:[#allocation48_spill] sm:$0xff]  ;;  %v5429_v36 = vld [vmem:[#allocation49_spill] sm:$0xff] }
  0xdb   : > { %1375 = vmatpush.msra.mxu1 %v3750_v37  ;;  %1398 = vmatpush.msra.mxu2 %v3754_v38 }
  0xdc   : > { %1421 = vmatpush.msra.mxu3 %v3756_v39  ;;  %1353 = vmatpush.msra.mxu0 %v3760_v40  ;;  %v5430_v39 = vld [vmem:[#allocation50_spill] sm:$0xff]  ;;  %v5431_v40 = vld [vmem:[#allocation51_spill] sm:$0xff] }
  0xdd   : > { %1376 = vmatpush.msra.mxu1 %v3762_v41  ;;  %1399 = vmatpush.msra.mxu2 %v3766_v42  ;;  %v5432_v41 = vld [vmem:[#allocation52_spill] sm:$0xff]  ;;  %v5433_v42 = vld [vmem:[#allocation53_spill] sm:$0xff] }
  0xde   : > { %1422 = vmatpush.msra.mxu3 %v3768_v43  ;;  %1354 = vmatpush.msra.mxu0 %v3772_v44  ;;  %v5434_v43 = vld [vmem:[#allocation54_spill] sm:$0xff]  ;;  %v5435_v44 = vld [vmem:[#allocation55_spill] sm:$0xff] }
  0xdf   : > { %1377 = vmatpush.msra.mxu1 %v3774_v45  ;;  %1400 = vmatpush.msra.mxu2 %v3778_v46  ;;  %v5436_v45 = vld [vmem:[#allocation56_spill] sm:$0xff]  ;;  %v5437_v46 = vld [vmem:[#allocation57_spill] sm:$0xff] }
  0xe0   : > { %1423 = vmatpush.msra.mxu3 %v3780_v47  ;;  %1355 = vmatpush.msra.mxu0 %v3789_v49  ;;  %v5438_v47 = vld [vmem:[#allocation58_spill] sm:$0xff]  ;;  %v5439_v49 = vld [vmem:[#allocation59_spill] sm:$0xff] }
  0xe1   : > { %1378 = vmatpush.msra.mxu1 %v3791_v50  ;;  %1401 = vmatpush.msra.mxu2 %v3795_v51  ;;  %v5440_v50 = vld [vmem:[#allocation60_spill] sm:$0xff]  ;;  %v5441_v51 = vld [vmem:[#allocation61_spill] sm:$0xff] }
  0xe2   : > { %1424 = vmatpush.msra.mxu3 %v3797_v52  ;;  %1356 = vmatpush.msra.mxu0 %v3801_v53  ;;  %v484_v52 = vld [vmem:[%s5138_s5] sm:$0xf]  ;;  %v5442_v53 = vld [vmem:[#allocation62_spill] sm:$0xff] }
  0xe3   : > { %1379 = vmatpush.msra.mxu1 %v3803_v54  ;;  %1402 = vmatpush.msra.mxu2 %v3807_v55  ;;  %v5443_v54 = vld [vmem:[#allocation63_spill] sm:$0xff]  ;;  %v4220_v55 = vperm.slane %v484_v52, 0 }
  0xe4   : > { %1425 = vmatpush.msra.mxu3 %v3809_v56  ;;  %1357 = vmatpush.msra.mxu0 %v3813_v57  ;;  %v4222_v56 = vperm.slane %v484_v52, 1 }
  0xe5   : > { %1380 = vmatpush.msra.mxu1 %v3815_v58  ;;  %1403 = vmatpush.msra.mxu2 %v3819_v59  ;;  %v5444_v59 = vld [vmem:[#allocation64_spill] sm:$0xff] }
  0xe6   : > { %1426 = vmatpush.msra.mxu3 %v3821_v60  ;;  %1358 = vmatpush.msra.mxu0 %v3830_v62  ;;  %v5445_v60 = vld [vmem:[#allocation65_spill] sm:$0xff] }
  0xe7   : > { %1381 = vmatpush.msra.mxu1 %v3832_v63  ;;  %1404 = vmatpush.msra.mxu2 %v3836_v0  ;;  %v5446_v0 = vld [vmem:[#allocation66_spill] sm:$0xff] }
  0xe8   : > { %1427 = vmatpush.msra.mxu3 %v3838_v1  ;;  %1359 = vmatpush.msra.mxu0 %v3842_v2  ;;  %v5447_v1 = vld [vmem:[#allocation67_spill] sm:$0xff] }
  0xe9   : > { %1382 = vmatpush.msra.mxu1 %v3844_v3  ;;  %1405 = vmatpush.msra.mxu2 %v3848_v4  ;;  %v5448_v4 = vld [vmem:[#allocation68_spill] sm:$0xff] }
  0xea   : > { %1428 = vmatpush.msra.mxu3 %v3850_v5  ;;  %1360 = vmatpush.msra.mxu0 %v3854_v6  ;;  %v5449_v5 = vld [vmem:[#allocation69_spill] sm:$0xff]  ;;  %v5450_v6 = vld [vmem:[#allocation70_spill] sm:$0xff] }
  0xeb   : > { %1383 = vmatpush.msra.mxu1 %v5413_v18  ;;  %1406 = vmatpush.msra.mxu2 %v5414_v19  ;;  %v5455_v18 = vld [vmem:[#allocation75_spill] sm:$0xff]  ;;  %v5456_v19 = vld [vmem:[#allocation76_spill] sm:$0xff] }
  0xec   : > { %1429 = vmatpush.msra.mxu3 %v5415_v20  ;;  %1361 = vmatpush.msra.mxu0 %v5416_v21  ;;  %v5457_v20 = vld [vmem:[#allocation77_spill] sm:$0xff]  ;;  %v4248_v21 = vperm.slane %v484_v52, 2 }
  0xed   : > { %1384 = vmatpush.msra.mxu1 %v5417_v23  ;;  %1407 = vmatpush.msra.mxu2 %v5418_v24  ;;  %v4199_v37 = vpop.f32.mrf.mxu0  ;;  %v4201_v38 = vpop.f32.mrf.mxu1  ;;  %v4250_v23 = vperm.slane %v484_v52, 3  ;;  %v5458_v24 = vld [vmem:[#allocation78_spill] sm:$0xff] }
  0xee   : > { %1430 = vmatpush.msra.mxu3 %v5419_v25  ;;  %1362 = vmatpush.msra.mxu0 %v5420_v26  ;;  %v5459_v25 = vld [vmem:[#allocation79_spill] sm:$0xff]  ;;  %v5476_v52 = vld [vmem:[#allocation94_spill] sm:$0xff] }
  0xef   : > { %1385 = vmatpush.msra.mxu1 %v5421_v27  ;;  %1408 = vmatpush.msra.mxu2 %v5422_v28  ;;  %v5460_v28 = vld [vmem:[#allocation80_spill] sm:$0xff] }
  0xf0   : > { %1431 = vmatpush.msra.mxu3 %v5423_v29  ;;  %1363 = vmatpush.msra.mxu0 %v5424_v30  ;;  %v5461_v29 = vld [vmem:[#allocation81_spill] sm:$0xff] }
  0xf1   : > { %1386 = vmatpush.msra.mxu1 %v5425_v31  ;;  %1409 = vmatpush.msra.mxu2 %v5426_v32 }
  0xf2   : > { %1432 = vmatpush.msra.mxu3 %v5427_v33  ;;  %1440 = vmatpush.msrb.mxu0 %v5428_v34  ;;  %v5462_v34 = vld [vmem:[#allocation82_spill] sm:$0xff] }
  0xf3   : > { %1463 = vmatpush.msrb.mxu1 %v5429_v36  ;;  %1486 = vmatpush.msrb.mxu2 %v5430_v39  ;;  %v5463_v36 = vld [vmem:[#allocation83_spill] sm:$0xff] }
  0xf4   : > { %1509 = vmatpush.msrb.mxu3 %v5431_v40  ;;  %1441 = vmatpush.msrb.mxu0 %v5432_v41  ;;  %v4224_v57 = vpop.f32.mrf.mxu2  ;;  %v4226_v58 = vpop.f32.mrf.mxu3  ;;  %v5466_v41 = vld [vmem:[#allocation84_spill] sm:$0xff] }
  0xf5   : > { %1464 = vmatpush.msrb.mxu1 %v5433_v42  ;;  %1487 = vmatpush.msrb.mxu2 %v5434_v43  ;;  %v543_v62 = vpop.f32.mrf.mxu0  ;;  %v572_v63 = vpop.f32.mrf.mxu1  ;;  %v5467_v42 = vld [vmem:[#allocation85_spill] sm:$0xff]  ;;  %v5468_v43 = vld [vmem:[#allocation86_spill] sm:$0xff] }
  0xf6   : > { %1510 = vmatpush.msrb.mxu3 %v5435_v44  ;;  %1442 = vmatpush.msrb.mxu0 %v5436_v45  ;;  %v4233_v2 = vadd.f32 %v4220_v55, %v543_v62  ;;  %v4236_v3 = vadd.f32 %v4222_v56, %v572_v63  ;;  %v5469_v44 = vld [vmem:[#allocation87_spill] sm:$0xff]  ;;  %v5470_v45 = vld [vmem:[#allocation88_spill] sm:$0xff]  ;;  %v5479_v62 = vld [vmem:[#allocation97_spill] sm:$0xff] }
  0xf7   : > { %1465 = vmatpush.msrb.mxu1 %v5437_v46  ;;  %1488 = vmatpush.msrb.mxu2 %v5438_v47  ;;  %v5471_v46 = vld [vmem:[#allocation89_spill] sm:$0xff]  ;;  %v5472_v47 = vld [vmem:[#allocation90_spill] sm:$0xff] }
  0xf8   : > { %1511 = vmatpush.msrb.mxu3 %v5439_v49  ;;  %1443 = vmatpush.msrb.mxu0 %v5440_v50  ;;  %v5473_v49 = vld [vmem:[#allocation91_spill] sm:$0xff]  ;;  %v5474_v50 = vld [vmem:[#allocation92_spill] sm:$0xff] }
  0xf9   : > { %1466 = vmatpush.msrb.mxu1 %v5441_v51  ;;  %1489 = vmatpush.msrb.mxu2 %v5442_v53  ;;  %v5475_v51 = vld [vmem:[#allocation93_spill] sm:$0xff]  ;;  %v5477_v53 = vld [vmem:[#allocation95_spill] sm:$0xff] }
  0xfa   : > { %1512 = vmatpush.msrb.mxu3 %v5443_v54  ;;  %1444 = vmatpush.msrb.mxu0 %v5444_v59 }
  0xfb   : > { %1467 = vmatpush.msrb.mxu1 %v5445_v60  ;;  %1490 = vmatpush.msrb.mxu2 %v5446_v0  ;;  %v5478_v60 = vld [vmem:[#allocation96_spill] sm:$0xff] }
  0xfc   : > { %1513 = vmatpush.msrb.mxu3 %v5447_v1  ;;  %1445 = vmatpush.msrb.mxu0 %v5448_v4  ;;  %v601_v26 = vpop.f32.mrf.mxu2  ;;  %v630_v27 = vpop.f32.mrf.mxu3 }
  0xfd   : > { %1468 = vmatpush.msrb.mxu1 %v5449_v5  ;;  %1491 = vmatpush.msrb.mxu2 %v5450_v6  ;;  %v4257_v30 = vadd.f32 %v4248_v21, %v601_v26  ;;  %v4260_v31 = vadd.f32 %v4250_v23, %v630_v27  ;;  %v546_v32 = vpop.f32.mrf.mxu0  ;;  %v575_v33 = vpop.f32.mrf.mxu1  ;;  %v5482_v5 = vld [vmem:[#allocation98_spill] sm:$0xff]  ;;  %v5483_v6 = vld [vmem:[#allocation99_spill] sm:$0xff] }
  0xfe   : > { %1514 = vmatpush.msrb.mxu3 %v5451_v9  ;;  %1446 = vmatpush.msrb.mxu0 %v5452_v11  ;;  %v4265_v39 = vadd.f32 %v4220_v55, %v546_v32  ;;  %v4268_v40 = vadd.f32 %v4222_v56, %v575_v33 }
  0xff   : > { %1469 = vmatpush.msrb.mxu1 %v5453_v13  ;;  %1492 = vmatpush.msrb.mxu2 %v5454_v61  ;;  %v5486_v13 = vld [vmem:[#allocation100_spill] sm:$0xff] }
 0x100   : > { %1515 = vmatpush.msrb.mxu3 %v5455_v18  ;;  %1447 = vmatpush.msrb.mxu0 %v5456_v19  ;;  %5464 = vst [vmem:[#allocation33_spill] sm:$0xff] %v4265_v39  ;;  %v485_v61 = vld [vmem:[#allocation15] sm:$0xf] }
 0x101   : > { %1470 = vmatpush.msrb.mxu1 %v5457_v20  ;;  %1493 = vmatpush.msrb.mxu2 %v5458_v24  ;;  %5465 = vst [vmem:[#allocation34_spill] sm:$0xff] %v4268_v40  ;;  %v793_v18 = vperm.slane %v485_v61, 0  ;;  %v4306_v19 = vperm.slane %v485_v61, 1  ;;  %v4585_v40 = vld [vmem:[#allocation14 + $0x40] sm:$0xff] }
 0x102   : > { %1516 = vmatpush.msrb.mxu3 %v5459_v25  ;;  %1448 = vmatpush.msrb.mxu0 %v5460_v28  ;;  %5513 = vst [vmem:[#allocation65_spill] sm:$0xff] %v4585_v40  ;;  %v4588_v39 = vld [vmem:[#allocation14 + $0x240] sm:$0xff] }
 0x103   : > { %1471 = vmatpush.msrb.mxu1 %v5461_v29  ;;  %1494 = vmatpush.msrb.mxu2 %v5462_v34  ;;  %5514 = vst [vmem:[#allocation66_spill] sm:$0xff] %v4588_v39 }
 0x104   : > { %1517 = vmatpush.msrb.mxu3 %v5463_v36  ;;  %1449 = vmatpush.msrb.mxu0 %v5466_v41  ;;  %v604_v54 = vpop.f32.mrf.mxu2  ;;  %v633_v59 = vpop.f32.mrf.mxu3 }
 0x105   : > { %1472 = vmatpush.msrb.mxu1 %v5467_v42  ;;  %1495 = vmatpush.msrb.mxu2 %v5468_v43  ;;  %v4285_v63 = vadd.f32 %v4248_v21, %v604_v54  ;;  %v4288_v0 = vadd.f32 %v4250_v23, %v633_v59  ;;  %v549_v1 = vpop.f32.mrf.mxu0  ;;  %v578_v4 = vpop.f32.mrf.mxu1 }
 0x106   : > { %1518 = vmatpush.msrb.mxu3 %v5469_v44  ;;  %1450 = vmatpush.msrb.mxu0 %v5470_v45  ;;  %v4293_v9 = vadd.f32 %v4220_v55, %v549_v1  ;;  %v4296_v11 = vadd.f32 %v4222_v56, %v578_v4 }
 0x107   : > { %1473 = vmatpush.msrb.mxu1 %v5471_v46  ;;  %1496 = vmatpush.msrb.mxu2 %v5472_v47  ;;  %5480 = vst [vmem:[#allocation35_spill] sm:$0xff] %v4285_v63  ;;  %v4576_v63 = vld [vmem:[#allocation14 + $0x260] sm:$0xff] }
 0x108   : > { %1519 = vmatpush.msrb.mxu3 %v5473_v49  ;;  %1451 = vmatpush.msrb.mxu0 %v5474_v50  ;;  %5481 = vst [vmem:[#allocation36_spill] sm:$0xff] %v4288_v0  ;;  %v4573_v0 = vld [vmem:[#allocation14 + $0x60] sm:$0xff] }
 0x109   : > { %1474 = vmatpush.msrb.mxu1 %v5475_v51  ;;  %1497 = vmatpush.msrb.mxu2 %v5476_v52  ;;  %5484 = vst [vmem:[#allocation37_spill] sm:$0xff] %v4293_v9  ;;  %v4558_v9 = vld [vmem:[#allocation14 + $0x2a8] sm:$0xff] }
 0x10a   : > { %1520 = vmatpush.msrb.mxu3 %v5477_v53  ;;  %1452 = vmatpush.msrb.mxu0 %v5478_v60  ;;  %5485 = vst [vmem:[#allocation38_spill] sm:$0xff] %v4296_v11  ;;  %v648_v60 = vadd.f32 %v4220_v55, %v4199_v37  ;;  %v4555_v11 = vld [vmem:[#allocation14 + $0xa8] sm:$0xff] }
 0x10b   : > { %1475 = vmatpush.msrb.mxu1 %v5479_v62  ;;  %1498 = vmatpush.msrb.mxu2 %v5482_v5  ;;  %5503 = vst [vmem:[#allocation55_spill] sm:$0xff] %v4555_v11 }
 0x10c   : > { %1521 = vmatpush.msrb.mxu3 %v5483_v6  ;;  %1453 = vmatpush.msrb.mxu0 %v5486_v13  ;;  %v649_v13 = vadd.f32 %v4222_v56, %v4201_v38  ;;  %5504 = vst [vmem:[#allocation56_spill] sm:$0xff] %v4558_v9 }
 0x10d   : > { %1476 = vmatpush.msrb.mxu1 %v4089_v14  ;;  %1499 = vmatpush.msrb.mxu2 %v4093_v16  ;;  %v636_v14 = vpop.f32.mrf.mxu3  ;;  %5509 = vst [vmem:[#allocation61_spill] sm:$0xff] %v4573_v0 }
 0x10e   : > { %1522 = vmatpush.msrb.mxu3 %v4095_v8  ;;  %1454 = vmatpush.msrb.mxu0 %v4099_v35  ;;  %v607_v8 = vpop.f32.mrf.mxu2  ;;  %v722_v35 = vpop.f32.mrf.mxu1  ;;  %5510 = vst [vmem:[#allocation62_spill] sm:$0xff] %v4576_v63 }
 0x10f   : > { %1477 = vmatpush.msrb.mxu1 %v4101_v22  ;;  %1500 = vmatpush.msrb.mxu2 %v4105_v7  ;;  %v4313_v16 = vadd.f32 %v4248_v21, %v607_v8  ;;  %v4316_v7 = vadd.f32 %v4250_v23, %v636_v14  ;;  %v693_v22 = vpop.f32.mrf.mxu0 }
 0x110   : > { %1523 = vmatpush.msrb.mxu3 %v4107_v12  ;;  %1455 = vmatpush.msrb.mxu0 %v4111_v48  ;;  %v4318_v12 = vadd.f32 %v793_v18, %v693_v22  ;;  %v4321_v48 = vadd.f32 %v4306_v19, %v722_v35 }
 0x111   : > { %1478 = vmatpush.msrb.mxu1 %v4113_v15  ;;  %1501 = vmatpush.msrb.mxu2 %v4117_v10  ;;  %5487 = vst [vmem:[#allocation39_spill] sm:$0xff] %v4313_v16  ;;  %v4323_v15 = vperm.slane %v485_v61, 2  ;;  %v4325_v10 = vperm.slane %v485_v61, 3  ;;  %v4542_v16 = vld [vmem:[#allocation14 + $0x2c8] sm:$0xff] }
 0x112   : > { %1524 = vmatpush.msrb.mxu3 %v4119_v17  ;;  %5488 = vst [vmem:[#allocation40_spill] sm:$0xff] %v4316_v7  ;;  %v4539_v7 = vld [vmem:[#allocation14 + $0xc8] sm:$0xff] }
 0x113   : > { %5489 = vst [vmem:[#allocation41_spill] sm:$0xff] %v4318_v12  ;;  %v4552_v12 = vld [vmem:[#allocation14 + $0x2a0] sm:$0xff] }
 0x114   : > { %5490 = vst [vmem:[#allocation42_spill] sm:$0xff] %v4321_v48  ;;  %v4549_v48 = vld [vmem:[#allocation14 + $0xa0] sm:$0xff] }
 0x115   : > { %v780_v20 = vpop.f32.mrf.mxu3  ;;  %5499 = vst [vmem:[#allocation51_spill] sm:$0xff] %v4539_v7 }
 0x116   : > { %v751_v17 = vpop.f32.mrf.mxu2  ;;  %v4331_v25 = vadd.f32 %v4325_v10, %v780_v20  ;;  %v725_v27 = vpop.f32.mrf.mxu1  ;;  %5500 = vst [vmem:[#allocation52_spill] sm:$0xff] %v4542_v16 }
 0x117   : > { %v4328_v24 = vadd.f32 %v4323_v15, %v751_v17  ;;  %v696_v26 = vpop.f32.mrf.mxu0  ;;  %v4336_v29 = vadd.f32 %v4306_v19, %v725_v27  ;;  %5501 = vst [vmem:[#allocation53_spill] sm:$0xff] %v4549_v48 }
 0x118   : > { %5492 = vst [vmem:[#allocation44_spill] sm:$0xff] %v4331_v25  ;;  %v4333_v28 = vadd.f32 %v793_v18, %v696_v26  ;;  %v4533_v25 = vld [vmem:[#allocation14 + $0xc0] sm:$0xff] }
 0x119   : > { %5491 = vst [vmem:[#allocation43_spill] sm:$0xff] %v4328_v24  ;;  %v4536_v24 = vld [vmem:[#allocation14 + $0x2c0] sm:$0xff] }
 0x11a   : > { %5493 = vst [vmem:[#allocation45_spill] sm:$0xff] %v4333_v28  ;;  %v4582_v28 = vld [vmem:[#allocation14 + $0x268] sm:$0xff] }
 0x11b   : > { %5494 = vst [vmem:[#allocation46_spill] sm:$0xff] %v4336_v29  ;;  %v4579_v29 = vld [vmem:[#allocation14 + $0x68] sm:$0xff] }
 0x11c   : > { %5497 = vst [vmem:[#allocation49_spill] sm:$0xff] %v4533_v25 }
 0x11d   : > { %v783_v33 = vpop.f32.mrf.mxu3  ;;  %5498 = vst [vmem:[#allocation50_spill] sm:$0xff] %v4536_v24 }
 0x11e   : > { %v754_v32 = vpop.f32.mrf.mxu2  ;;  %v4342_v36 = vadd.f32 %v4325_v10, %v783_v33  ;;  %v728_v42 = vpop.f32.mrf.mxu1  ;;  %5502 = vst [vmem:[#allocation54_spill] sm:$0xff] %v4552_v12 }
 0x11f   : > { %v4339_v34 = vadd.f32 %v4323_v15, %v754_v32  ;;  %v699_v41 = vpop.f32.mrf.mxu0  ;;  %v4347_v44 = vadd.f32 %v4306_v19, %v728_v42  ;;  %5511 = vst [vmem:[#allocation63_spill] sm:$0xff] %v4579_v29 }
 0x120   : > { %5496 = vst [vmem:[#allocation48_spill] sm:$0xff] %v4342_v36  ;;  %v4344_v43 = vadd.f32 %v793_v18, %v699_v41  ;;  %v4561_v36 = vld [vmem:[#allocation14 + $0x80] sm:$0xff] }
 0x121   : > { %5495 = vst [vmem:[#allocation47_spill] sm:$0xff] %v4339_v34  ;;  %v4570_v34 = vld [vmem:[#allocation14 + $0x288] sm:$0xff] }
 0x122   : > { %5505 = vst [vmem:[#allocation57_spill] sm:$0xff] %v4561_v36 }
 0x123   : > { %5508 = vst [vmem:[#allocation60_spill] sm:$0xff] %v4570_v34 }
 0x124   : > { %5512 = vst [vmem:[#allocation64_spill] sm:$0xff] %v4582_v28 }
 0x125   : > { %v786_v46 = vpop.f32.mrf.mxu3 }
 0x126   : > { %v757_v45 = vpop.f32.mrf.mxu2  ;;  %v4353_v49 = vadd.f32 %v4325_v10, %v786_v46 }
 0x127   : > { %v4350_v47 = vadd.f32 %v4323_v15, %v757_v45  ;;  %v702_v50 = vpop.f32.mrf.mxu0  ;;  %v731_v51 = vpop.f32.mrf.mxu1 }
 0x128   : > { %v813_v35 = vadd.f32 %v793_v18, %v702_v50  ;;  %v814_v41 = vadd.f32 %v4306_v19, %v731_v51 }
 0x12e   : > { %v4355_v52 = vpop.f32.mrf.mxu2  ;;  %v4357_v53 = vpop.f32.mrf.mxu3 }
 0x131   : > { %v1022_v54 = vpop.f32.mrf.mxu0  ;;  %v1045_v59 = vpop.f32.mrf.mxu1 }
 0x132   : > { %v1046_v62 = vadd.f32 %v1045_v59, %v1022_v54  ;;  %v650_v59 = vadd.f32 %v4248_v21, %v4224_v57  ;;  %v651_v57 = vadd.f32 %v4250_v23, %v4226_v58 }
 0x134   : > { %v1189_v1 = vadd.f32 %v1046_v62, %v648_v60 }
 0x136   : > { %v2642_v4 = vmul.f32 -1.442695, %v1189_v1 }
 0x138   : > { %2828 = vpow2.f32 %v2642_v4  ;;  %v1068_v5 = vpop.f32.mrf.mxu2  ;;  %v1091_v6 = vpop.f32.mrf.mxu3 }
 0x139   : > { %v1092_v61 = vadd.f32 %v1091_v6, %v1068_v5  ;;  %v1048_v22 = vpop.f32.mrf.mxu1 }
 0x13b   : > { %v1190_v8 = vadd.f32 %v1092_v61, %v649_v13 }
 0x13d   : > { %v2644_v20 = vmul.f32 -1.442695, %v1190_v8 }
 0x13e   : > { %v2829_v26 = vpop.eup %2828 }
 0x13f   : > { %v1025_v14 = vpop.f32.mrf.mxu0  ;;  %v1203_v32 = vadd.f32 1.0, %v2829_v26  ;;  %2830 = vpow2.f32 %v2644_v20 }
 0x140   : > { %v1049_v17 = vadd.f32 %v1048_v22, %v1025_v14 }
 0x141   : > { %2832 = vrcp.f32 %v1203_v32  ;;  %v1094_v33 = vpop.f32.mrf.mxu3  ;;  %v1216_v51 = vand.u32 2147483648, %v1203_v32  ;;  %v1214_v13 = vand.u32 2147483647, %v1203_v32  ;;  %vm1210_vm2 = vweird.f32 %v1203_v32 }
 0x142   : > { %v1193_v27 = vadd.f32 %v1049_v17, %v813_v35 }
 0x143   : > { %v1217_v20 = vor.u32 1.1754944e-38, %v1216_v51  ;;  %vm1215_vm4 = vcmp.eq.f32.partialorder %v1214_v13, 8.507059e+37 }
 0x144   : > { %v2643_v37 = vmul.f32 -1.442695, %v1193_v27 }
 0x145   : > { %v1071_v55 = vpop.f32.mrf.mxu2  ;;  %v2831_v38 = vpop.eup %2830 }
 0x146   : > { %2834 = vpow2.f32 %v2643_v37  ;;  %v1095_v42 = vadd.f32 %v1094_v33, %v1071_v55  ;;  %v1241_v54 = vadd.f32 1.0, %v2831_v38 }
 0x147   : > { %v2833_v50 = vpop.eup %2832 }
 0x148   : > { %v1194_v56 = vadd.f32 %v1095_v42, %v814_v41  ;;  %v1206_v1 = vmul.f32 %v2833_v50, %v1203_v32  ;;  %2836 = vrcp.f32 %v1241_v54  ;;  %vm1211_vm1 = vweird.f32 %v2833_v50 }
 0x149   : > { %vm1212_vm3 = vmor %vm1210_vm2, %vm1211_vm1  ;;  %v1254_v58 = vand.u32 2147483648, %v1241_v54  ;;  %v1252_v32 = vand.u32 2147483647, %v1241_v54  ;;  %vm1248_vm6 = vweird.f32 %v1241_v54 }
 0x14a   : > { %v1114_v45 = vpop.f32.mrf.mxu0  ;;  %v2645_v60 = vmul.f32 -1.442695, %v1194_v56  ;;  %v1207_v19 = vsub.f32 1.0, %v1206_v1 }
 0x14b   : > { %v1137_v46 = vpop.f32.mrf.mxu1  ;;  %vm1253_vm8 = vcmp.eq.f32.partialorder %v1252_v32, 8.507059e+37 }
 0x14c   : > { %v1138_v18 = vadd.f32 %v1137_v46, %v1114_v45  ;;  %v2835_v62 = vpop.eup %2834  ;;  %2838 = vpow2.f32 %v2645_v60  ;;  %v1208_v6 = vmul.f32 %v2833_v50, %v1207_v19 }
 0x14d   : > { %v4366_v4 = vadd.f32 1.0, %v2835_v62  ;;  %v1255_v62 = vor.u32 1.1754944e-38, %v1254_v58 }
 0x14e   : > { %v1191_v5 = vadd.f32 %v1138_v18, %v650_v59  ;;  %v2837_v14 = vpop.eup %2836  ;;  %v1209_v22 = vadd.f32 %v2833_v50, %v1208_v6 }
 0x14f   : > { %2840 = vrcp.f32 %v4366_v4  ;;  %v1244_v17 = vmul.f32 %v2837_v14, %v1241_v54  ;;  %vm1249_vm5 = vweird.f32 %v2837_v14  ;;  %vm1225_vm13 = vweird.f32 %v4366_v4 }
 0x150   : > { %2842 = vtanh.f32 %v1191_v5  ;;  %v1213_v37 = vsel %vm1212_vm3, %v2833_v50, %v1209_v22  ;;  %v816_v50 = vadd.f32 %v4325_v10, %v4357_v53  ;;  %vm1250_vm7 = vmor %vm1248_vm6, %vm1249_vm5  ;;  %v1313_v5 = vld [vmem:[#allocation5 + $0x8] sm:$0xff] }
 0x151   : > { %v1245_v33 = vsub.f32 1.0, %v1244_v17  ;;  %v1218_v41 = vsel %vm1215_vm4, %v1217_v20, %v1213_v37  ;;  %v815_v17 = vadd.f32 %v4323_v15, %v4355_v52  ;;  %v1231_v15 = vand.u32 2147483648, %v4366_v4 }
 0x152   : > { %v1160_v61 = vpop.f32.mrf.mxu2  ;;  %v2839_v35 = vpop.eup %2838 }
 0x153   : > { %v1183_v8 = vpop.f32.mrf.mxu3  ;;  %v4371_v27 = vadd.f32 1.0, %v2839_v35  ;;  %v1246_v56 = vmul.f32 %v2837_v14, %v1245_v33  ;;  %v1117_v19 = vpop.f32.mrf.mxu0 }
 0x154   : > { %v1184_v21 = vadd.f32 %v1183_v8, %v1160_v61  ;;  %v1140_v51 = vpop.f32.mrf.mxu1 }
 0x155   : > { %v4373_v55 = vpop.eup %2840  ;;  %2844 = vrcp.f32 %v4371_v27  ;;  %v1247_v59 = vadd.f32 %v2837_v14, %v1246_v56  ;;  %v1141_v35 = vadd.f32 %v1140_v51, %v1117_v19  ;;  %v1269_v37 = vand.u32 2147483648, %v4371_v27 }
 0x156   : > { %v1192_v26 = vadd.f32 %v1184_v21, %v651_v57  ;;  %v2843_v38 = vpop.eup %2842  ;;  %v1221_v23 = vmul.f32 %v4373_v55, %v4366_v4  ;;  %vm1226_vm10 = vweird.f32 %v4373_v55  ;;  %vm1263_vm11 = vweird.f32 %v4371_v27 }
 0x157   : > { %v1317_v45 = vmul.f32 %v2843_v38, %v1218_v41  ;;  %v1251_v6 = vsel %vm1250_vm7, %v2837_v14, %v1247_v59  ;;  %v1195_v33 = vadd.f32 %v1141_v35, %v815_v17  ;;  %v1229_v38 = vand.u32 2147483647, %v4366_v4  ;;  %vm1227_vm14 = vmor %vm1225_vm13, %vm1226_vm10  ;;  %v1314_v59 = vld [vmem:[#allocation5] sm:$0xff] }
 0x158   : > { %v2646_v42 = vmul.f32 -1.442695, %v1192_v26  ;;  %v1222_v1 = vsub.f32 1.0, %v1221_v23  ;;  %v1256_v8 = vsel %vm1253_vm8, %v1255_v62, %v1251_v6  ;;  %v1270_v23 = vor.u32 1.1754944e-38, %v1269_v37  ;;  %v4408_v37 = vld [vmem:[#allocation14 + $0x1e0] sm:$0xff] }
 0x159   : > { %v1315_v22 = vmul.f32 %v1313_v5, %v1256_v8  ;;  %vm1230_vm0 = vcmp.eq.f32.partialorder %v1229_v38, 8.507059e+37 }
 0x15a   : > { %2846 = vpow2.f32 %v2646_v42  ;;  %v1163_v46 = vpop.f32.mrf.mxu2  ;;  %v1223_v54 = vmul.f32 %v4373_v55, %v1222_v1  ;;  %v1267_v42 = vand.u32 2147483647, %v4371_v27 }
 0x15b   : > { %v1186_v18 = vpop.f32.mrf.mxu3  ;;  %v2845_v61 = vpop.eup %2844  ;;  %v4384_v26 = vadd.f32 %v1317_v45, %v1315_v22 }
 0x15c   : > { %v1187_v60 = vadd.f32 %v1186_v18, %v1163_v46  ;;  %v1259_v21 = vmul.f32 %v2845_v61, %v4371_v27  ;;  %vm1264_vm9 = vweird.f32 %v2845_v61  ;;  %v1224_v41 = vadd.f32 %v4373_v55, %v1223_v54 }
 0x15d   : > { %vm1265_vm12 = vmor %vm1263_vm11, %vm1264_vm9  ;;  %vm1268_vm15 = vcmp.eq.f32.partialorder %v1267_v42, 8.507059e+37  ;;  %v1232_v27 = vor.u32 1.1754944e-38, %v1231_v15  ;;  %v4416_v15 = vld [vmem:[#allocation14 + $0x3e0] sm:$0xff] }
 0x15e   : > { %v1196_v13 = vadd.f32 %v1187_v60, %v816_v50  ;;  %v1260_v20 = vsub.f32 1.0, %v1259_v21  ;;  %v1228_v45 = vsel %vm1227_vm14, %v4373_v55, %v1224_v41 }
 0x15f   : > { %v1233_v62 = vsel %vm1230_vm0, %v1232_v27, %v1228_v45  ;;  %v4428_v45 = vld [vmem:[#allocation14 + $0x3c0] sm:$0xff] }
 0x160   : > { %v2847_v57 = vpop.eup %2846  ;;  %v2647_v10 = vmul.f32 -1.442695, %v1196_v13  ;;  %v1261_v14 = vmul.f32 %v2845_v61, %v1260_v20  ;;  %v4436_v27 = vld [vmem:[#allocation14 + $0x1a0] sm:$0xff] }
 0x161   : > { %v1281_v53 = vadd.f32 1.0, %v2847_v57 }
 0x162   : > { %2848 = vpow2.f32 %v2647_v10  ;;  %v1262_v52 = vadd.f32 %v2845_v61, %v1261_v14 }
 0x163   : > { %2850 = vrcp.f32 %v1281_v53  ;;  %v1294_v4 = vand.u32 2147483648, %v1281_v53  ;;  %v1292_v51 = vand.u32 2147483647, %v1281_v53  ;;  %vm1288_vm2 = vweird.f32 %v1281_v53 }
 0x164   : > { %v1266_v32 = vsel %vm1265_vm12, %v2845_v61, %v1262_v52  ;;  %2852 = vtanh.f32 %v1195_v33  ;;  %v4411_v33 = vld [vmem:[#allocation14 + $0x1e8] sm:$0xff] }
 0x165   : > { %v1271_v50 = vsel %vm1268_vm15, %v1270_v23, %v1266_v32  ;;  %v1295_v61 = vor.u32 1.1754944e-38, %v1294_v4  ;;  %vm1293_vm4 = vcmp.eq.f32.partialorder %v1292_v51, 8.507059e+37  ;;  %v4419_v52 = vld [vmem:[#allocation14 + $0x3e8] sm:$0xff]  ;;  %v4453_v4 = vld [vmem:[#allocation14 + $0x180] sm:$0xff] }
 0x166   : > { %v1316_v1 = vmul.f32 %v1314_v59, %v1271_v50  ;;  %v4425_v23 = vld [vmem:[#allocation14 + $0x1c8] sm:$0xff]  ;;  %v4442_v59 = vld [vmem:[#allocation14 + $0x3a0] sm:$0xff] }
 0x167   : > { %v4439_v50 = vld [vmem:[#allocation14 + $0x1a8] sm:$0xff]  ;;  %v4469_v51 = vld [vmem:[#allocation14 + $0x160] sm:$0xff] }
 0x168   : > { %v2849_v58 = vpop.eup %2848 }
 0x169   : > { %v2851_v56 = vpop.eup %2850  ;;  %v1282_v46 = vadd.f32 1.0, %v2849_v58  ;;  %v4422_v58 = vld [vmem:[#allocation14 + $0x1c0] sm:$0xff] }
 0x16a   : > { %v1284_v18 = vmul.f32 %v2851_v56, %v1281_v53  ;;  %v2853_v5 = vpop.eup %2852  ;;  %vm1289_vm1 = vweird.f32 %v2851_v56 }
 0x16b   : > { %2854 = vrcp.f32 %v1282_v46  ;;  %v1318_v6 = vmul.f32 %v2853_v5, %v1233_v62  ;;  %vm1290_vm3 = vmor %vm1288_vm2, %vm1289_vm1  ;;  %v1309_v17 = vand.u32 2147483648, %v1282_v46  ;;  %v1307_v53 = vand.u32 2147483647, %v1282_v46  ;;  %v4459_v5 = vld [vmem:[#allocation14 + $0x380] sm:$0xff] }
 0x16c   : > { %v1285_v60 = vsub.f32 1.0, %v1284_v18  ;;  %2856 = vtanh.f32 %v4384_v26  ;;  %vm1303_vm6 = vweird.f32 %v1282_v46 }
 0x16d   : > { %v4396_v8 = vadd.f32 %v1318_v6, %v1316_v1  ;;  %v1310_v42 = vor.u32 1.1754944e-38, %v1309_v17  ;;  %vm1308_vm8 = vcmp.eq.f32.partialorder %v1307_v53, 8.507059e+37  ;;  %v4456_v1 = vld [vmem:[#allocation14 + $0x188] sm:$0xff]  ;;  %v4472_v6 = vld [vmem:[#allocation14 + $0x360] sm:$0xff] }
 0x16e   : > { %v1286_v19 = vmul.f32 %v2851_v56, %v1285_v60  ;;  %v4445_v60 = vld [vmem:[#allocation14 + $0x3a8] sm:$0xff]  ;;  %v4509_v53 = vld [vmem:[#allocation14 + $0x100] sm:$0xff] }
 0x16f   : > { %2858 = vtanh.f32 %v4396_v8  ;;  %v4499_v17 = vld [vmem:[#allocation14 + $0x128] sm:$0xff] }
 0x170   : > { %v1287_v55 = vadd.f32 %v2851_v56, %v1286_v19  ;;  %v4462_v19 = vld [vmem:[#allocation14 + $0x388] sm:$0xff] }
 0x171   : > { %v2855_v13 = vpop.eup %2854 }
 0x172   : > { %v1291_v57 = vsel %vm1290_vm3, %v2851_v56, %v1287_v55  ;;  %v1299_v21 = vmul.f32 %v2855_v13, %v1282_v46  ;;  %v2857_v22 = vpop.eup %2856  ;;  %vm1304_vm5 = vweird.f32 %v2855_v13  ;;  %v4431_v46 = vld [vmem:[#allocation14 + $0x3c8] sm:$0xff] }
 0x173   : > { %v1296_v35 = vsel %vm1293_vm4, %v1295_v61, %v1291_v57  ;;  %vm1305_vm7 = vmor %vm1303_vm6, %vm1304_vm5  ;;  %v4475_v55 = vld [vmem:[#allocation14 + $0x168] sm:$0xff]  ;;  %v4481_v61 = vld [vmem:[#allocation14 + $0x140] sm:$0xff] }
 0x174   : > { %v4398_v10 = vmul.f32 %v2857_v22, %v1296_v35  ;;  %v1300_v54 = vsub.f32 1.0, %v1299_v21  ;;  %v4484_v57 = vld [vmem:[#allocation14 + $0x340] sm:$0xff]  ;;  %v4487_v21 = vld [vmem:[#allocation14 + $0x148] sm:$0xff] }
 0x175   : > { %v2859_v32 = vpop.eup %2858  ;;  %v4490_v22 = vld [vmem:[#allocation14 + $0x348] sm:$0xff]  ;;  %v4493_v35 = vld [vmem:[#allocation14 + $0x120] sm:$0xff] }
 0x176   : > { %1329 = vst [vmem:[%s3684_s15] sm:$0xff] %v4398_v10  ;;  %v1301_v20 = vmul.f32 %v2855_v13, %v1300_v54  ;;  %1364 = vmatmul.f32.vlgmr.msra.gmra.mxu0 %v4398_v10  ;;  %1410 = vmatmul.f32.vlgmr.msra.gmra.mxu2 %v4398_v10  ;;  %v4406_v14 = vmul.f32 0.0, %v4398_v10  ;;  %v4496_v54 = vld [vmem:[#allocation14 + $0x320] sm:$0xff] }
 0x177   : > { %1692 = vmatpush.msra.mxu0 %v4408_v37  ;;  %1738 = vmatpush.msra.mxu2 %v4411_v33 }
 0x178   : > { %v1302_v41 = vadd.f32 %v2855_v13, %v1301_v20  ;;  %1387 = vmatmul.f32.vlgmr.msra.gmra.mxu1 %v4406_v14  ;;  %1433 = vmatmul.f32.vlgmr.msra.gmra.mxu3 %v4406_v14  ;;  %v4502_v20 = vld [vmem:[#allocation14 + $0x328] sm:$0xff] }
 0x179   : > { %1715 = vmatpush.msra.mxu1 %v4416_v15  ;;  %1761 = vmatpush.msra.mxu3 %v4419_v52 }
 0x17a   : > { %v1306_v38 = vsel %vm1305_vm7, %v2855_v13, %v1302_v41  ;;  %1693 = vmatpush.msra.mxu0 %v4422_v58  ;;  %1739 = vmatpush.msra.mxu2 %v4425_v23  ;;  %v4478_v13 = vld [vmem:[#allocation14 + $0x368] sm:$0xff]  ;;  %v4512_v41 = vld [vmem:[#allocation14 + $0x300] sm:$0xff] }
 0x17b   : > { %v1311_v56 = vsel %vm1308_vm8, %v1310_v42, %v1306_v38  ;;  %1716 = vmatpush.msra.mxu1 %v4428_v45  ;;  %1762 = vmatpush.msra.mxu3 %v4431_v46  ;;  %v4515_v42 = vld [vmem:[#allocation14 + $0x108] sm:$0xff] }
 0x17c   : > { %v4434_v18 = vmul.f32 %v2859_v32, %v1311_v56  ;;  %1694 = vmatpush.msra.mxu0 %v4436_v27  ;;  %1740 = vmatpush.msra.mxu2 %v4439_v50  ;;  %v4518_v38 = vld [vmem:[#allocation14 + $0x308] sm:$0xff]  ;;  %v4521_v32 = vld [vmem:[#allocation14 + $0xe0] sm:$0xff] }
 0x17d   : > { %1717 = vmatpush.msra.mxu1 %v4442_v59  ;;  %1763 = vmatpush.msra.mxu3 %v4445_v60  ;;  %v4530_v56 = vld [vmem:[#allocation14 + $0x2e8] sm:$0xff] }
 0x17e   : > { %2648 = vst [vmem:[%s3686_s25 + $0x18] sm:$0xff] %v4434_v18  ;;  %v4451_v62 = vmul.f32 0.0, %v4434_v18  ;;  %1695 = vmatpush.msra.mxu0 %v4453_v4  ;;  %1741 = vmatpush.msra.mxu2 %v4456_v1 }
 0x17f   : > { %1718 = vmatpush.msra.mxu1 %v4459_v5  ;;  %1764 = vmatpush.msra.mxu3 %v4462_v19 }
 0x180   : > { %1367 = vmatmul.f32.gmra.mxu0 %v4451_v62  ;;  %1390 = vmatmul.f32.gmra.mxu1 %v4434_v18 }
 0x181   : > { %1413 = vmatmul.f32.gmra.mxu2 %v4451_v62  ;;  %1436 = vmatmul.f32.gmra.mxu3 %v4434_v18 }
 0x182   : > { %1696 = vmatpush.msra.mxu0 %v4469_v51  ;;  %1719 = vmatpush.msra.mxu1 %v4472_v6 }
 0x183   : > { %1742 = vmatpush.msra.mxu2 %v4475_v55  ;;  %1765 = vmatpush.msra.mxu3 %v4478_v13 }
 0x184   : > { %1697 = vmatpush.msra.mxu0 %v4481_v61  ;;  %1720 = vmatpush.msra.mxu1 %v4484_v57 }
 0x185   : > { %1743 = vmatpush.msra.mxu2 %v4487_v21  ;;  %1766 = vmatpush.msra.mxu3 %v4490_v22 }
 0x186   : > { %1698 = vmatpush.msra.mxu0 %v4493_v35  ;;  %1721 = vmatpush.msra.mxu1 %v4496_v54 }
 0x187   : > { %1744 = vmatpush.msra.mxu2 %v4499_v17  ;;  %1767 = vmatpush.msra.mxu3 %v4502_v20 }
 0x188   : > { %1456 = vmatmul.f32.vlgmr.msrb.gmra.mxu0 %v4398_v10  ;;  %1479 = vmatmul.f32.vlgmr.msrb.gmra.mxu1 %v4406_v14 }
 0x189   : > { %1502 = vmatmul.f32.vlgmr.msrb.gmra.mxu2 %v4398_v10  ;;  %1525 = vmatmul.f32.vlgmr.msrb.gmra.mxu3 %v4406_v14  ;;  %v4524_v10 = vld [vmem:[#allocation14 + $0x2e0] sm:$0xff]  ;;  %v4527_v14 = vld [vmem:[#allocation14 + $0xe8] sm:$0xff] }
 0x18a   : > { %1699 = vmatpush.msra.mxu0 %v4509_v53  ;;  %1722 = vmatpush.msra.mxu1 %v4512_v41 }
 0x18b   : > { %1745 = vmatpush.msra.mxu2 %v4515_v42  ;;  %1768 = vmatpush.msra.mxu3 %v4518_v38 }
 0x18c   : > { %1700 = vmatpush.msra.mxu0 %v4521_v32  ;;  %1723 = vmatpush.msra.mxu1 %v4524_v10 }
 0x18d   : > { %1746 = vmatpush.msra.mxu2 %v4527_v14  ;;  %1769 = vmatpush.msra.mxu3 %v4530_v56 }
 0x18e   : > { %1701 = vmatpush.msra.mxu0 %v4533_v25  ;;  %1724 = vmatpush.msra.mxu1 %v4536_v24 }
 0x18f   : > { %1747 = vmatpush.msra.mxu2 %v4539_v7  ;;  %1770 = vmatpush.msra.mxu3 %v4542_v16 }
 0x190   : > { %1459 = vmatmul.f32.gmra.mxu0 %v4451_v62  ;;  %1482 = vmatmul.f32.gmra.mxu1 %v4434_v18 }
 0x191   : > { %1505 = vmatmul.f32.gmra.mxu2 %v4451_v62  ;;  %1528 = vmatmul.f32.gmra.mxu3 %v4434_v18  ;;  %v4564_v18 = vld [vmem:[#allocation14 + $0x280] sm:$0xff]  ;;  %v4567_v62 = vld [vmem:[#allocation14 + $0x88] sm:$0xff] }
 0x192   : > { %1702 = vmatpush.msra.mxu0 %v4549_v48  ;;  %1725 = vmatpush.msra.mxu1 %v4552_v12  ;;  %5506 = vst [vmem:[#allocation58_spill] sm:$0xff] %v4564_v18 }
 0x193   : > { %1748 = vmatpush.msra.mxu2 %v4555_v11  ;;  %1771 = vmatpush.msra.mxu3 %v4558_v9  ;;  %5507 = vst [vmem:[#allocation59_spill] sm:$0xff] %v4567_v62 }
 0x194   : > { %1703 = vmatpush.msra.mxu0 %v4561_v36  ;;  %1726 = vmatpush.msra.mxu1 %v4564_v18 }
 0x195   : > { %1749 = vmatpush.msra.mxu2 %v4567_v62  ;;  %1772 = vmatpush.msra.mxu3 %v4570_v34 }
 0x196   : > { %1704 = vmatpush.msra.mxu0 %v4573_v0  ;;  %1727 = vmatpush.msra.mxu1 %v4576_v63  ;;  %v4591_v0 = vld [vmem:[#allocation14 + $0x48] sm:$0xff] }
 0x197   : > { %1750 = vmatpush.msra.mxu2 %v4579_v29  ;;  %1773 = vmatpush.msra.mxu3 %v4582_v28  ;;  %5515 = vst [vmem:[#allocation67_spill] sm:$0xff] %v4591_v0  ;;  %v4594_v63 = vld [vmem:[#allocation14 + $0x248] sm:$0xff]  ;;  %v4597_v29 = vld [vmem:[#allocation14 + $0x20] sm:$0xff] }
 0x198   : > { %1705 = vmatpush.msra.mxu0 %v4585_v40  ;;  %1728 = vmatpush.msra.mxu1 %v4588_v39  ;;  %5516 = vst [vmem:[#allocation68_spill] sm:$0xff] %v4594_v63  ;;  %v4600_v28 = vld [vmem:[#allocation14 + $0x220] sm:$0xff]  ;;  %v4603_v40 = vld [vmem:[#allocation14 + $0x28] sm:$0xff] }
 0x199   : > { %1751 = vmatpush.msra.mxu2 %v4591_v0  ;;  %1774 = vmatpush.msra.mxu3 %v4594_v63  ;;  %5517 = vst [vmem:[#allocation69_spill] sm:$0xff] %v4597_v29  ;;  %v4606_v39 = vld [vmem:[#allocation14 + $0x228] sm:$0xff]  ;;  %v4609_v0 = vld [vmem:[#allocation14] sm:$0xff] }
 0x19a   : > { %1706 = vmatpush.msra.mxu0 %v4597_v29  ;;  %5518 = vst [vmem:[#allocation70_spill] sm:$0xff] %v4600_v28  ;;  %1729 = vmatpush.msra.mxu1 %v4600_v28  ;;  %v4612_v63 = vld [vmem:[#allocation14 + $0x200] sm:$0xff]  ;;  %v4615_v29 = vld [vmem:[#allocation14 + $0x8] sm:$0xff] }
 0x19b   : > { %5519 = vst [vmem:[#allocation71_spill] sm:$0xff] %v4603_v40  ;;  %1752 = vmatpush.msra.mxu2 %v4603_v40  ;;  %1775 = vmatpush.msra.mxu3 %v4606_v39  ;;  %v4618_v28 = vld [vmem:[#allocation14 + $0x208] sm:$0xff]  ;;  %v4621_v40 = vld [vmem:[#allocation14 + $0x1f0] sm:$0xff] }
 0x19c   : > { %5520 = vst [vmem:[#allocation72_spill] sm:$0xff] %v4606_v39  ;;  %1707 = vmatpush.msra.mxu0 %v4609_v0  ;;  %1730 = vmatpush.msra.mxu1 %v4612_v63  ;;  %v4624_v39 = vld [vmem:[#allocation14 + $0x3f0] sm:$0xff] }
 0x19d   : > { %5521 = vst [vmem:[#allocation73_spill] sm:$0xff] %v4609_v0  ;;  %1753 = vmatpush.msra.mxu2 %v4615_v29  ;;  %1776 = vmatpush.msra.mxu3 %v4618_v28  ;;  %v4627_v0 = vld [vmem:[#allocation14 + $0x1f8] sm:$0xff] }
 0x19e   : > { %5522 = vst [vmem:[#allocation74_spill] sm:$0xff] %v4612_v63  ;;  %1784 = vmatpush.msrb.mxu0 %v4621_v40  ;;  %1807 = vmatpush.msrb.mxu1 %v4624_v39  ;;  %v4630_v63 = vld [vmem:[#allocation14 + $0x3f8] sm:$0xff] }
 0x19f   : > { %5523 = vst [vmem:[#allocation75_spill] sm:$0xff] %v4615_v29  ;;  %1830 = vmatpush.msrb.mxu2 %v4627_v0  ;;  %1853 = vmatpush.msrb.mxu3 %v4630_v63  ;;  %v4633_v29 = vld [vmem:[#allocation14 + $0x1d0] sm:$0xff] }
 0x1a0   : > { %5524 = vst [vmem:[#allocation76_spill] sm:$0xff] %v4618_v28  ;;  %1785 = vmatpush.msrb.mxu0 %v4633_v29  ;;  %v4636_v28 = vld [vmem:[#allocation14 + $0x3d0] sm:$0xff] }
 0x1a1   : > { %5525 = vst [vmem:[#allocation77_spill] sm:$0xff] %v4621_v40  ;;  %1808 = vmatpush.msrb.mxu1 %v4636_v28  ;;  %v4639_v40 = vld [vmem:[#allocation14 + $0x1d8] sm:$0xff] }
 0x1a2   : > { %5526 = vst [vmem:[#allocation78_spill] sm:$0xff] %v4624_v39  ;;  %1831 = vmatpush.msrb.mxu2 %v4639_v40  ;;  %v4642_v39 = vld [vmem:[#allocation14 + $0x3d8] sm:$0xff] }
 0x1a3   : > { %5527 = vst [vmem:[#allocation79_spill] sm:$0xff] %v4627_v0  ;;  %1854 = vmatpush.msrb.mxu3 %v4642_v39  ;;  %v4645_v0 = vld [vmem:[#allocation14 + $0x1b0] sm:$0xff] }
 0x1a4   : > { %5528 = vst [vmem:[#allocation80_spill] sm:$0xff] %v4630_v63  ;;  %1786 = vmatpush.msrb.mxu0 %v4645_v0  ;;  %v4648_v63 = vld [vmem:[#allocation14 + $0x3b0] sm:$0xff] }
 0x1a5   : > { %5529 = vst [vmem:[#allocation81_spill] sm:$0xff] %v4633_v29  ;;  %1809 = vmatpush.msrb.mxu1 %v4648_v63  ;;  %v4651_v29 = vld [vmem:[#allocation14 + $0x1b8] sm:$0xff] }
 0x1a6   : > { %5530 = vst [vmem:[#allocation82_spill] sm:$0xff] %v4636_v28  ;;  %1832 = vmatpush.msrb.mxu2 %v4651_v29  ;;  %v4654_v28 = vld [vmem:[#allocation14 + $0x3b8] sm:$0xff] }
 0x1a7   : > { %5531 = vst [vmem:[#allocation83_spill] sm:$0xff] %v4639_v40  ;;  %1855 = vmatpush.msrb.mxu3 %v4654_v28  ;;  %v4657_v40 = vld [vmem:[#allocation14 + $0x190] sm:$0xff] }
 0x1a8   : > { %5532 = vst [vmem:[#allocation84_spill] sm:$0xff] %v4642_v39  ;;  %1787 = vmatpush.msrb.mxu0 %v4657_v40  ;;  %v4660_v39 = vld [vmem:[#allocation14 + $0x390] sm:$0xff] }
 0x1a9   : > { %5533 = vst [vmem:[#allocation85_spill] sm:$0xff] %v4645_v0  ;;  %1810 = vmatpush.msrb.mxu1 %v4660_v39  ;;  %v4663_v0 = vld [vmem:[#allocation14 + $0x198] sm:$0xff] }
 0x1aa   : > { %5534 = vst [vmem:[#allocation86_spill] sm:$0xff] %v4648_v63  ;;  %1833 = vmatpush.msrb.mxu2 %v4663_v0  ;;  %v4666_v63 = vld [vmem:[#allocation14 + $0x398] sm:$0xff] }
 0x1ab   : > { %5535 = vst [vmem:[#allocation87_spill] sm:$0xff] %v4651_v29  ;;  %1856 = vmatpush.msrb.mxu3 %v4666_v63  ;;  %v4669_v29 = vld [vmem:[#allocation14 + $0x170] sm:$0xff] }
 0x1ac   : > { %5536 = vst [vmem:[#allocation88_spill] sm:$0xff] %v4654_v28  ;;  %1788 = vmatpush.msrb.mxu0 %v4669_v29  ;;  %v4672_v28 = vld [vmem:[#allocation14 + $0x370] sm:$0xff] }
 0x1ad   : > { %5537 = vst [vmem:[#allocation89_spill] sm:$0xff] %v4657_v40  ;;  %1811 = vmatpush.msrb.mxu1 %v4672_v28  ;;  %v4675_v40 = vld [vmem:[#allocation14 + $0x178] sm:$0xff] }
 0x1ae   : > { %5538 = vst [vmem:[#allocation90_spill] sm:$0xff] %v4660_v39  ;;  %1834 = vmatpush.msrb.mxu2 %v4675_v40  ;;  %v4678_v39 = vld [vmem:[#allocation14 + $0x378] sm:$0xff] }
 0x1af   : > { %5539 = vst [vmem:[#allocation91_spill] sm:$0xff] %v4663_v0  ;;  %1857 = vmatpush.msrb.mxu3 %v4678_v39  ;;  %v4681_v0 = vld [vmem:[#allocation14 + $0x150] sm:$0xff] }
 0x1b0   : > { %5540 = vst [vmem:[#allocation92_spill] sm:$0xff] %v4666_v63  ;;  %1789 = vmatpush.msrb.mxu0 %v4681_v0  ;;  %v4684_v63 = vld [vmem:[#allocation14 + $0x350] sm:$0xff] }
 0x1b1   : > { %5541 = vst [vmem:[#allocation93_spill] sm:$0xff] %v4669_v29  ;;  %1812 = vmatpush.msrb.mxu1 %v4684_v63  ;;  %v4687_v29 = vld [vmem:[#allocation14 + $0x158] sm:$0xff] }
 0x1b2   : > { %5542 = vst [vmem:[#allocation94_spill] sm:$0xff] %v4672_v28  ;;  %1835 = vmatpush.msrb.mxu2 %v4687_v29  ;;  %v4690_v28 = vld [vmem:[#allocation14 + $0x358] sm:$0xff] }
 0x1b3   : > { %5543 = vst [vmem:[#allocation95_spill] sm:$0xff] %v4675_v40  ;;  %1858 = vmatpush.msrb.mxu3 %v4690_v28  ;;  %v4693_v40 = vld [vmem:[#allocation14 + $0x130] sm:$0xff] }
 0x1b4   : > { %5544 = vst [vmem:[#allocation96_spill] sm:$0xff] %v4678_v39  ;;  %1790 = vmatpush.msrb.mxu0 %v4693_v40  ;;  %v4696_v39 = vld [vmem:[#allocation14 + $0x330] sm:$0xff] }
 0x1b5   : > { %5545 = vst [vmem:[#allocation97_spill] sm:$0xff] %v4681_v0  ;;  %1813 = vmatpush.msrb.mxu1 %v4696_v39  ;;  %v4699_v0 = vld [vmem:[#allocation14 + $0x138] sm:$0xff] }
 0x1b6   : > { %5546 = vst [vmem:[#allocation98_spill] sm:$0xff] %v4684_v63  ;;  %1836 = vmatpush.msrb.mxu2 %v4699_v0  ;;  %v4702_v63 = vld [vmem:[#allocation14 + $0x338] sm:$0xff] }
 0x1b7   : > { %5547 = vst [vmem:[#allocation99_spill] sm:$0xff] %v4687_v29  ;;  %1859 = vmatpush.msrb.mxu3 %v4702_v63  ;;  %v4705_v29 = vld [vmem:[#allocation14 + $0x110] sm:$0xff] }
 0x1b8   : > { %5548 = vst [vmem:[#allocation100_spill] sm:$0xff] %v4690_v28  ;;  %1791 = vmatpush.msrb.mxu0 %v4705_v29  ;;  %v4708_v28 = vld [vmem:[#allocation14 + $0x310] sm:$0xff] }
 0x1b9   : > { %5549 = vst [vmem:[#allocation101_spill] sm:$0xff] %v4693_v40  ;;  %1814 = vmatpush.msrb.mxu1 %v4708_v28  ;;  %v4711_v40 = vld [vmem:[#allocation14 + $0x118] sm:$0xff] }
 0x1ba   : > { %5550 = vst [vmem:[#allocation102_spill] sm:$0xff] %v4696_v39  ;;  %1837 = vmatpush.msrb.mxu2 %v4711_v40  ;;  %v4714_v39 = vld [vmem:[#allocation14 + $0x318] sm:$0xff] }
 0x1bb   : > { %5551 = vst [vmem:[#allocation103_spill] sm:$0xff] %v4699_v0  ;;  %1860 = vmatpush.msrb.mxu3 %v4714_v39  ;;  %v4717_v0 = vld [vmem:[#allocation14 + $0xf0] sm:$0xff] }
 0x1bc   : > { %5552 = vst [vmem:[#allocation104_spill] sm:$0xff] %v4702_v63  ;;  %1792 = vmatpush.msrb.mxu0 %v4717_v0  ;;  %v4720_v63 = vld [vmem:[#allocation14 + $0x2f0] sm:$0xff] }
 0x1bd   : > { %5553 = vst [vmem:[#allocation105_spill] sm:$0xff] %v4705_v29  ;;  %1815 = vmatpush.msrb.mxu1 %v4720_v63  ;;  %v4723_v29 = vld [vmem:[#allocation14 + $0xf8] sm:$0xff] }
 0x1be   : > { %5554 = vst [vmem:[#allocation106_spill] sm:$0xff] %v4708_v28  ;;  %1838 = vmatpush.msrb.mxu2 %v4723_v29  ;;  %v4726_v28 = vld [vmem:[#allocation14 + $0x2f8] sm:$0xff] }
 0x1bf   : > { %5555 = vst [vmem:[#allocation107_spill] sm:$0xff] %v4711_v40  ;;  %1861 = vmatpush.msrb.mxu3 %v4726_v28  ;;  %v4729_v40 = vld [vmem:[#allocation14 + $0xd0] sm:$0xff] }
 0x1c0   : > { %5556 = vst [vmem:[#allocation108_spill] sm:$0xff] %v4714_v39  ;;  %1793 = vmatpush.msrb.mxu0 %v4729_v40  ;;  %v4732_v39 = vld [vmem:[#allocation14 + $0x2d0] sm:$0xff] }
 0x1c1   : > { %5557 = vst [vmem:[#allocation109_spill] sm:$0xff] %v4717_v0  ;;  %1816 = vmatpush.msrb.mxu1 %v4732_v39  ;;  %v4735_v0 = vld [vmem:[#allocation14 + $0xd8] sm:$0xff] }
 0x1c2   : > { %5558 = vst [vmem:[#allocation110_spill] sm:$0xff] %v4720_v63  ;;  %1839 = vmatpush.msrb.mxu2 %v4735_v0  ;;  %v4738_v63 = vld [vmem:[#allocation14 + $0x2d8] sm:$0xff] }
 0x1c3   : > { %5559 = vst [vmem:[#allocation111_spill] sm:$0xff] %v4723_v29  ;;  %1862 = vmatpush.msrb.mxu3 %v4738_v63  ;;  %v4741_v29 = vld [vmem:[#allocation14 + $0xb0] sm:$0xff] }
 0x1c4   : > { %5560 = vst [vmem:[#allocation112_spill] sm:$0xff] %v4726_v28  ;;  %1794 = vmatpush.msrb.mxu0 %v4741_v29  ;;  %v4744_v28 = vld [vmem:[#allocation14 + $0x2b0] sm:$0xff] }
 0x1c5   : > { %5561 = vst [vmem:[#allocation113_spill] sm:$0xff] %v4729_v40  ;;  %1817 = vmatpush.msrb.mxu1 %v4744_v28  ;;  %v4747_v40 = vld [vmem:[#allocation14 + $0xb8] sm:$0xff] }
 0x1c6   : > { %5562 = vst [vmem:[#allocation114_spill] sm:$0xff] %v4732_v39  ;;  %1840 = vmatpush.msrb.mxu2 %v4747_v40  ;;  %v4750_v39 = vld [vmem:[#allocation14 + $0x2b8] sm:$0xff] }
 0x1c7   : > { %5563 = vst [vmem:[#allocation115_spill] sm:$0xff] %v4735_v0  ;;  %1863 = vmatpush.msrb.mxu3 %v4750_v39  ;;  %v4753_v0 = vld [vmem:[#allocation14 + $0x90] sm:$0xff] }
 0x1c8   : > { %5564 = vst [vmem:[#allocation116_spill] sm:$0xff] %v4738_v63  ;;  %1795 = vmatpush.msrb.mxu0 %v4753_v0  ;;  %v4756_v63 = vld [vmem:[#allocation14 + $0x290] sm:$0xff] }
 0x1c9   : > { %5565 = vst [vmem:[#allocation117_spill] sm:$0xff] %v4741_v29  ;;  %1818 = vmatpush.msrb.mxu1 %v4756_v63  ;;  %v4759_v29 = vld [vmem:[#allocation14 + $0x98] sm:$0xff] }
 0x1ca   : > { %5566 = vst [vmem:[#allocation118_spill] sm:$0xff] %v4744_v28  ;;  %1841 = vmatpush.msrb.mxu2 %v4759_v29  ;;  %v4762_v28 = vld [vmem:[#allocation14 + $0x298] sm:$0xff] }
 0x1cb   : > { %5567 = vst [vmem:[#allocation119_spill] sm:$0xff] %v4747_v40  ;;  %1864 = vmatpush.msrb.mxu3 %v4762_v28  ;;  %v4765_v40 = vld [vmem:[#allocation14 + $0x70] sm:$0xff] }
 0x1cc   : > { %5568 = vst [vmem:[#allocation120_spill] sm:$0xff] %v4750_v39  ;;  %1796 = vmatpush.msrb.mxu0 %v4765_v40  ;;  %v4768_v39 = vld [vmem:[#allocation14 + $0x270] sm:$0xff] }
 0x1cd   : > { %5569 = vst [vmem:[#allocation121_spill] sm:$0xff] %v4753_v0  ;;  %1819 = vmatpush.msrb.mxu1 %v4768_v39  ;;  %v4771_v0 = vld [vmem:[#allocation14 + $0x78] sm:$0xff] }
 0x1ce   : > { %5570 = vst [vmem:[#allocation122_spill] sm:$0xff] %v4756_v63  ;;  %1842 = vmatpush.msrb.mxu2 %v4771_v0  ;;  %v4774_v63 = vld [vmem:[#allocation14 + $0x278] sm:$0xff] }
 0x1cf   : > { %5571 = vst [vmem:[#allocation123_spill] sm:$0xff] %v4759_v29  ;;  %1865 = vmatpush.msrb.mxu3 %v4774_v63  ;;  %v4777_v29 = vld [vmem:[#allocation14 + $0x50] sm:$0xff] }
 0x1d0   : > { %5572 = vst [vmem:[#allocation124_spill] sm:$0xff] %v4762_v28  ;;  %1797 = vmatpush.msrb.mxu0 %v4777_v29  ;;  %v4780_v28 = vld [vmem:[#allocation14 + $0x250] sm:$0xff] }
 0x1d1   : > { %5573 = vst [vmem:[#allocation125_spill] sm:$0xff] %v4765_v40  ;;  %1820 = vmatpush.msrb.mxu1 %v4780_v28  ;;  %v4783_v40 = vld [vmem:[#allocation14 + $0x58] sm:$0xff] }
 0x1d2   : > { %5574 = vst [vmem:[#allocation126_spill] sm:$0xff] %v4768_v39  ;;  %1843 = vmatpush.msrb.mxu2 %v4783_v40  ;;  %v4786_v39 = vld [vmem:[#allocation14 + $0x258] sm:$0xff] }
 0x1d3   : > { %5575 = vst [vmem:[#allocation127_spill] sm:$0xff] %v4771_v0  ;;  %1866 = vmatpush.msrb.mxu3 %v4786_v39  ;;  %v4789_v0 = vld [vmem:[#allocation14 + $0x30] sm:$0xff] }
 0x1d4   : > { %5576 = vst [vmem:[#allocation128_spill] sm:$0xff] %v4774_v63  ;;  %1798 = vmatpush.msrb.mxu0 %v4789_v0  ;;  %v4792_v63 = vld [vmem:[#allocation14 + $0x230] sm:$0xff] }
 0x1d5   : > { %5577 = vst [vmem:[#allocation129_spill] sm:$0xff] %v4777_v29  ;;  %1821 = vmatpush.msrb.mxu1 %v4792_v63  ;;  %v4795_v29 = vld [vmem:[#allocation14 + $0x38] sm:$0xff] }
 0x1d6   : > { %5578 = vst [vmem:[#allocation130_spill] sm:$0xff] %v4780_v28  ;;  %1844 = vmatpush.msrb.mxu2 %v4795_v29  ;;  %v4798_v28 = vld [vmem:[#allocation14 + $0x238] sm:$0xff] }
 0x1d7   : > { %5579 = vst [vmem:[#allocation131_spill] sm:$0xff] %v4783_v40  ;;  %1867 = vmatpush.msrb.mxu3 %v4798_v28  ;;  %v4801_v40 = vld [vmem:[#allocation14 + $0x10] sm:$0xff] }
 0x1d8   : > { %5580 = vst [vmem:[#allocation132_spill] sm:$0xff] %v4786_v39  ;;  %1799 = vmatpush.msrb.mxu0 %v4801_v40  ;;  %v4804_v39 = vld [vmem:[#allocation14 + $0x210] sm:$0xff] }
 0x1d9   : > { %5581 = vst [vmem:[#allocation133_spill] sm:$0xff] %v4789_v0  ;;  %1822 = vmatpush.msrb.mxu1 %v4804_v39  ;;  %v4807_v0 = vld [vmem:[#allocation14 + $0x18] sm:$0xff] }
 0x1da   : > { %5582 = vst [vmem:[#allocation134_spill] sm:$0xff] %v4792_v63  ;;  %1845 = vmatpush.msrb.mxu2 %v4807_v0  ;;  %v4810_v63 = vld [vmem:[#allocation14 + $0x218] sm:$0xff] }
 0x1db   : > { %5583 = vst [vmem:[#allocation135_spill] sm:$0xff] %v4795_v29  ;;  %1868 = vmatpush.msrb.mxu3 %v4810_v63 }
 0x1dc   : > { %5584 = vst [vmem:[#allocation136_spill] sm:$0xff] %v4798_v28 }
 0x1dd   : > { %5585 = vst [vmem:[#allocation137_spill] sm:$0xff] %v4801_v40 }
 0x1de   : > { %5586 = vst [vmem:[#allocation138_spill] sm:$0xff] %v4804_v39 }
 0x1df   : > { %5587 = vst [vmem:[#allocation139_spill] sm:$0xff] %v4807_v0 }
 0x1e0   : > { %5588 = vst [vmem:[#allocation140_spill] sm:$0xff] %v4810_v63 }
 0x1f3   : > { %v1365_v29 = vpop.f32.mrf.mxu0 }
 0x1f5   : > { %v1388_v34 = vpop.f32.mrf.mxu1 }
 0x1f6   : > { %v1389_v62 = vadd.f32 %v1388_v34, %v1365_v29 }
 0x1f8   : > { %v1532_v28 = vadd.f32 %v1389_v62, %v4233_v2 }
 0x1f9   : > { %v1411_v36 = vpop.f32.mrf.mxu2 }
 0x1fa   : > { %v2649_v18 = vmul.f32 -1.442695, %v1532_v28 }
 0x1fb   : > { %v1434_v40 = vpop.f32.mrf.mxu3 }
 0x1fc   : > { %2860 = vpow2.f32 %v2649_v18  ;;  %v1435_v9 = vadd.f32 %v1434_v40, %v1411_v36 }
 0x1fd   : > { %v1368_v11 = vpop.f32.mrf.mxu0  ;;  %v1391_v39 = vpop.f32.mrf.mxu1 }
 0x1fe   : > { %v1533_v12 = vadd.f32 %v1435_v9, %v4236_v3  ;;  %v1392_v48 = vadd.f32 %v1391_v39, %v1368_v11 }
 0x200   : > { %v2651_v0 = vmul.f32 -1.442695, %v1533_v12  ;;  %v1536_v16 = vadd.f32 %v1392_v48, %v4344_v43 }
 0x202   : > { %v2861_v7 = vpop.eup %2860  ;;  %2862 = vpow2.f32 %v2651_v0  ;;  %v2650_v63 = vmul.f32 -1.442695, %v1536_v16 }
 0x203   : > { %v1546_v24 = vadd.f32 1.0, %v2861_v7 }
 0x204   : > { %2864 = vpow2.f32 %v2650_v63  ;;  %v1414_v29 = vpop.f32.mrf.mxu2  ;;  %v1437_v2 = vpop.f32.mrf.mxu3 }
 0x205   : > { %2866 = vrcp.f32 %v1546_v24  ;;  %v1438_v28 = vadd.f32 %v1437_v2, %v1414_v29  ;;  %v1457_v34 = vpop.f32.mrf.mxu0  ;;  %v1480_v18 = vpop.f32.mrf.mxu1  ;;  %v1557_v2 = vand.u32 2147483647, %v1546_v24  ;;  %vm1553_vm10 = vweird.f32 %v1546_v24 }
 0x206   : > { %v1481_v36 = vadd.f32 %v1480_v18, %v1457_v34 }
 0x207   : > { %v1537_v40 = vadd.f32 %v1438_v28, %v4347_v44  ;;  %v1559_v28 = vand.u32 2147483648, %v1546_v24  ;;  %vm1558_vm12 = vcmp.eq.f32.partialorder %v1557_v2, 8.507059e+37 }
 0x208   : > { %v2863_v62 = vpop.eup %2862  ;;  %v1534_v63 = vadd.f32 %v1481_v36, %v4257_v30 }
 0x209   : > { %v4817_v3 = vadd.f32 1.0, %v2863_v62  ;;  %v2652_v39 = vmul.f32 -1.442695, %v1537_v40 }
 0x20a   : > { %v2865_v9 = vpop.eup %2864 }
 0x20b   : > { %v2867_v11 = vpop.eup %2866  ;;  %2868 = vrcp.f32 %v4817_v3  ;;  %v4820_v0 = vadd.f32 1.0, %v2865_v9  ;;  %vm1591_vm14 = vweird.f32 %v4817_v3 }
 0x20c   : > { %v1549_v16 = vmul.f32 %v2867_v11, %v1546_v24  ;;  %2870 = vpow2.f32 %v2652_v39  ;;  %v1503_v7 = vpop.f32.mrf.mxu2  ;;  %v1526_v12 = vpop.f32.mrf.mxu3  ;;  %vm1554_vm9 = vweird.f32 %v2867_v11 }
 0x20d   : > { %2872 = vrcp.f32 %v4820_v0  ;;  %v1527_v48 = vadd.f32 %v1526_v12, %v1503_v7  ;;  %v1460_v43 = vpop.f32.mrf.mxu0  ;;  %v1483_v44 = vpop.f32.mrf.mxu1  ;;  %vm1555_vm11 = vmor %vm1553_vm10, %vm1554_vm9  ;;  %vm1568_vm2 = vweird.f32 %v4820_v0 }
 0x20e   : > { %v1550_v29 = vsub.f32 1.0, %v1549_v16  ;;  %2874 = vtanh.f32 %v1534_v63  ;;  %v1484_v40 = vadd.f32 %v1483_v44, %v1460_v43  ;;  %v1560_v16 = vor.u32 1.1754944e-38, %v1559_v28 }
 0x20f   : > { %v1535_v34 = vadd.f32 %v1527_v48, %v4260_v31 }
 0x210   : > { %v1551_v18 = vmul.f32 %v2867_v11, %v1550_v29  ;;  %v1538_v48 = vadd.f32 %v1484_v40, %v4350_v47  ;;  %v1574_v47 = vand.u32 2147483648, %v4820_v0 }
 0x211   : > { %v2869_v62 = vpop.eup %2868  ;;  %v2653_v30 = vmul.f32 -1.442695, %v1535_v34  ;;  %v1597_v34 = vand.u32 2147483648, %v4817_v3 }
 0x212   : > { %v2871_v36 = vpop.eup %2870  ;;  %v1587_v39 = vmul.f32 %v2869_v62, %v4817_v3  ;;  %v1552_v9 = vadd.f32 %v2867_v11, %v1551_v18  ;;  %v1595_v18 = vand.u32 2147483647, %v4817_v3  ;;  %vm1592_vm13 = vweird.f32 %v2869_v62 }
 0x213   : > { %v2873_v25 = vpop.eup %2872  ;;  %v4826_v7 = vadd.f32 1.0, %v2871_v36  ;;  %2876 = vpow2.f32 %v2653_v30  ;;  %vm1593_vm15 = vmor %vm1591_vm14, %vm1592_vm13 }
 0x214   : > { %v1588_v63 = vsub.f32 1.0, %v1587_v39  ;;  %v1564_v31 = vmul.f32 %v2873_v25, %v4820_v0  ;;  %v1556_v12 = vsel %vm1555_vm11, %v2867_v11, %v1552_v9  ;;  %v1506_v43 = vpop.f32.mrf.mxu2  ;;  %v1529_v44 = vpop.f32.mrf.mxu3  ;;  %v1598_v9 = vor.u32 1.1754944e-38, %v1597_v34 }
 0x215   : > { %v2875_v29 = vpop.eup %2874  ;;  %2878 = vrcp.f32 %v4826_v7  ;;  %v1561_v24 = vsel %vm1558_vm12, %v1560_v16, %v1556_v12  ;;  %v1530_v30 = vadd.f32 %v1529_v44, %v1506_v43  ;;  %vm1569_vm0 = vweird.f32 %v2873_v25 }
 0x216   : > { %v1589_v36 = vmul.f32 %v2869_v62, %v1588_v63  ;;  %v1565_v2 = vsub.f32 1.0, %v1564_v31  ;;  %v1660_v28 = vmul.f32 %v2875_v29, %v1561_v24  ;;  %2880 = vtanh.f32 %v1538_v48  ;;  %vm1570_vm3 = vmor %vm1568_vm2, %vm1569_vm0 }
 0x217   : > { %v1572_v16 = vand.u32 2147483647, %v4820_v0  ;;  %v1539_v12 = vadd.f32 %v1530_v30, %v4353_v49  ;;  %vm1596_vm1 = vcmp.eq.f32.partialorder %v1595_v18, 8.507059e+37  ;;  %v1575_v34 = vor.u32 1.1754944e-38, %v1574_v47 }
 0x218   : > { %v1590_v11 = vadd.f32 %v2869_v62, %v1589_v36  ;;  %v1566_v39 = vmul.f32 %v2873_v25, %v1565_v2  ;;  %v1612_v30 = vand.u32 2147483648, %v4826_v7  ;;  %vm1606_vm6 = vweird.f32 %v4826_v7 }
 0x219   : > { %v2877_v40 = vpop.eup %2876  ;;  %v2654_v43 = vmul.f32 -1.442695, %v1539_v12  ;;  %vm1573_vm4 = vcmp.eq.f32.partialorder %v1572_v16, 8.507059e+37 }
 0x21a   : > { %v1594_v63 = vsel %vm1593_vm15, %v2869_v62, %v1590_v11  ;;  %v1624_v31 = vadd.f32 1.0, %v2877_v40  ;;  %v1567_v29 = vadd.f32 %v2873_v25, %v1566_v39  ;;  %v1610_v39 = vand.u32 2147483647, %v4826_v7 }
 0x21b   : > { %v2879_v24 = vpop.eup %2878  ;;  %v1599_v3 = vsel %vm1596_vm1, %v1598_v9, %v1594_v63 }
 0x21c   : > { %v1602_v44 = vmul.f32 %v2879_v24, %v4826_v7  ;;  %v1658_v48 = vmul.f32 %v1599_v3, %v4384_v26  ;;  %2882 = vrcp.f32 %v1624_v31  ;;  %v1571_v36 = vsel %vm1570_vm3, %v2873_v25, %v1567_v29  ;;  %v2881_v2 = vpop.eup %2880 }
 0x21d   : > { %v1576_v18 = vsel %vm1573_vm4, %v1575_v34, %v1571_v36  ;;  %2884 = vpow2.f32 %v2654_v43  ;;  %vm1607_vm5 = vweird.f32 %v2879_v24  ;;  %v1613_v25 = vor.u32 1.1754944e-38, %v1612_v30 }
 0x21e   : > { %v1603_v49 = vsub.f32 1.0, %v1602_v44  ;;  %v4840_v62 = vadd.f32 %v1660_v28, %v1658_v48  ;;  %v1661_v11 = vmul.f32 %v2881_v2, %v1576_v18  ;;  %vm1608_vm7 = vmor %vm1606_vm6, %vm1607_vm5  ;;  %vm1611_vm8 = vcmp.eq.f32.partialorder %v1610_v39, 8.507059e+37 }
 0x21f   : > { %v1637_v29 = vand.u32 2147483648, %v1624_v31  ;;  %v1635_v44 = vand.u32 2147483647, %v1624_v31  ;;  %vm1631_vm10 = vweird.f32 %v1624_v31 }
 0x220   : > { %v1604_v0 = vmul.f32 %v2879_v24, %v1603_v49  ;;  %2886 = vtanh.f32 %v4840_v62 }
 0x221   : > { %vm1636_vm12 = vcmp.eq.f32.partialorder %v1635_v44, 8.507059e+37  ;;  %v5630_v44 = vld [vmem:[#allocation90_spill] sm:$0xff] }
 0x222   : > { %v2883_v40 = vpop.eup %2882  ;;  %v1605_v26 = vadd.f32 %v2879_v24, %v1604_v0 }
 0x223   : > { %v1627_v47 = vmul.f32 %v2883_v40, %v1624_v31  ;;  %v2885_v9 = vpop.eup %2884  ;;  %vm1632_vm9 = vweird.f32 %v2883_v40 }
 0x224   : > { %v1609_v16 = vsel %vm1608_vm7, %v2879_v24, %v1605_v26  ;;  %v1625_v63 = vadd.f32 1.0, %v2885_v9  ;;  %vm1633_vm11 = vmor %vm1631_vm10, %vm1632_vm9  ;;  %v1638_v24 = vor.u32 1.1754944e-38, %v1637_v29  ;;  %v5619_v26 = vld [vmem:[#allocation79_spill] sm:$0xff]  ;;  %v5622_v9 = vld [vmem:[#allocation82_spill] sm:$0xff] }
 0x225   : > { %v1628_v28 = vsub.f32 1.0, %v1627_v47  ;;  %v1614_v12 = vsel %vm1611_vm8, %v1613_v25, %v1609_v16  ;;  %v5620_v25 = vld [vmem:[#allocation80_spill] sm:$0xff]  ;;  %v5621_v47 = vld [vmem:[#allocation81_spill] sm:$0xff]  ;;  %v5623_v16 = vld [vmem:[#allocation83_spill] sm:$0xff] }
 0x226   : > { %v1659_v3 = vmul.f32 %v1614_v12, %v4396_v8  ;;  %2888 = vrcp.f32 %v1625_v63  ;;  %v2887_v36 = vpop.eup %2886  ;;  %v1652_v31 = vand.u32 2147483648, %v1625_v63  ;;  %v1650_v39 = vand.u32 2147483647, %v1625_v63  ;;  %v5625_v12 = vld [vmem:[#allocation85_spill] sm:$0xff]  ;;  %v5627_v29 = vld [vmem:[#allocation87_spill] sm:$0xff] }
 0x227   : > { %v1629_v43 = vmul.f32 %v2883_v40, %v1628_v28  ;;  %vm1646_vm14 = vweird.f32 %v1625_v63  ;;  %v5624_v28 = vld [vmem:[#allocation84_spill] sm:$0xff] }
 0x228   : > { %v4847_v7 = vadd.f32 %v1661_v11, %v1659_v3  ;;  %vm1651_vm0 = vcmp.eq.f32.partialorder %v1650_v39, 8.507059e+37  ;;  %v5628_v3 = vld [vmem:[#allocation88_spill] sm:$0xff]  ;;  %v5643_v39 = vld [vmem:[#allocation103_spill] sm:$0xff] }
 0x229   : > { %v1630_v48 = vadd.f32 %v2883_v40, %v1629_v43  ;;  %v5629_v43 = vld [vmem:[#allocation89_spill] sm:$0xff] }
 0x22a   : > { %2890 = vtanh.f32 %v4847_v7 }
 0x22b   : > { %v1634_v34 = vsel %vm1633_vm11, %v2883_v40, %v1630_v48  ;;  %v5631_v48 = vld [vmem:[#allocation91_spill] sm:$0xff] }
 0x22c   : > { %v1639_v2 = vsel %vm1636_vm12, %v1638_v24, %v1634_v34  ;;  %v2889_v49 = vpop.eup %2888  ;;  %v5632_v24 = vld [vmem:[#allocation92_spill] sm:$0xff]  ;;  %v5633_v34 = vld [vmem:[#allocation93_spill] sm:$0xff] }
 0x22d   : > { %v4849_v18 = vmul.f32 %v2887_v36, %v1639_v2  ;;  %v1642_v30 = vmul.f32 %v2889_v49, %v1625_v63  ;;  %vm1647_vm13 = vweird.f32 %v2889_v49  ;;  %v5626_v63 = vld [vmem:[#allocation86_spill] sm:$0xff]  ;;  %v5635_v2 = vld [vmem:[#allocation95_spill] sm:$0xff] }
 0x22e   : > { %vm1648_vm15 = vmor %vm1646_vm14, %vm1647_vm13  ;;  %v5634_v36 = vld [vmem:[#allocation94_spill] sm:$0xff] }
 0x22f   : > { %2655 = vst [vmem:[%s3684_s15 + $0x8] sm:$0xff] %v4849_v18  ;;  %1708 = vmatmul.f32.vlgmr.msra.gmra.mxu0 %v4849_v18  ;;  %1754 = vmatmul.f32.vlgmr.msra.gmra.mxu2 %v4849_v18  ;;  %v1689_v8 = vmul.f32 0.0, %v4849_v18  ;;  %v1643_v11 = vsub.f32 1.0, %v1642_v30  ;;  %v5638_v30 = vld [vmem:[#allocation98_spill] sm:$0xff] }
 0x230   : > { %2035 = vmatpush.msra.mxu0 %v4408_v37  ;;  %2081 = vmatpush.msra.mxu2 %v4411_v33  ;;  %v1653_v37 = vor.u32 1.1754944e-38, %v1652_v31  ;;  %v5641_v31 = vld [vmem:[#allocation101_spill] sm:$0xff] }
 0x231   : > { %1731 = vmatmul.f32.vlgmr.msra.gmra.mxu1 %v1689_v8  ;;  %1777 = vmatmul.f32.vlgmr.msra.gmra.mxu3 %v1689_v8  ;;  %v1644_v0 = vmul.f32 %v2889_v49, %v1643_v11  ;;  %v5640_v11 = vld [vmem:[#allocation100_spill] sm:$0xff] }
 0x232   : > { %2058 = vmatpush.msra.mxu1 %v4416_v15  ;;  %2104 = vmatpush.msra.mxu3 %v4419_v52  ;;  %v2891_v15 = vpop.eup %2890 }
 0x233   : > { %2036 = vmatpush.msra.mxu0 %v4422_v58  ;;  %2082 = vmatpush.msra.mxu2 %v4425_v23  ;;  %v1645_v40 = vadd.f32 %v2889_v49, %v1644_v0  ;;  %v5642_v0 = vld [vmem:[#allocation102_spill] sm:$0xff] }
 0x234   : > { %2059 = vmatpush.msra.mxu1 %v4428_v45  ;;  %2105 = vmatpush.msra.mxu3 %v4431_v46  ;;  %v5589_v45 = vld [vmem:[#allocation49_spill] sm:$0xff]  ;;  %v5590_v46 = vld [vmem:[#allocation50_spill] sm:$0xff] }
 0x235   : > { %2037 = vmatpush.msra.mxu0 %v4436_v27  ;;  %2083 = vmatpush.msra.mxu2 %v4439_v50  ;;  %v1649_v33 = vsel %vm1648_vm15, %v2889_v49, %v1645_v40  ;;  %v5591_v27 = vld [vmem:[#allocation51_spill] sm:$0xff]  ;;  %v5592_v50 = vld [vmem:[#allocation52_spill] sm:$0xff] }
 0x236   : > { %2060 = vmatpush.msra.mxu1 %v4442_v59  ;;  %2106 = vmatpush.msra.mxu3 %v4445_v60  ;;  %v1654_v52 = vsel %vm1651_vm0, %v1653_v37, %v1649_v33  ;;  %v5593_v59 = vld [vmem:[#allocation53_spill] sm:$0xff]  ;;  %v5594_v60 = vld [vmem:[#allocation54_spill] sm:$0xff]  ;;  %v5636_v49 = vld [vmem:[#allocation96_spill] sm:$0xff] }
 0x237   : > { %2038 = vmatpush.msra.mxu0 %v4453_v4  ;;  %2084 = vmatpush.msra.mxu2 %v4456_v1  ;;  %v1667_v58 = vmul.f32 %v2891_v15, %v1654_v52  ;;  %v5595_v4 = vld [vmem:[#allocation55_spill] sm:$0xff]  ;;  %v5596_v1 = vld [vmem:[#allocation56_spill] sm:$0xff]  ;;  %v5645_v37 = vld [vmem:[#allocation105_spill] sm:$0xff] }
 0x238   : > { %2061 = vmatpush.msra.mxu1 %v4459_v5  ;;  %2107 = vmatpush.msra.mxu3 %v4462_v19  ;;  %v5597_v5 = vld [vmem:[#allocation57_spill] sm:$0xff]  ;;  %v5598_v19 = vld [vmem:[#allocation58_spill] sm:$0xff]  ;;  %v5644_v40 = vld [vmem:[#allocation104_spill] sm:$0xff] }
 0x239   : > { %2039 = vmatpush.msra.mxu0 %v4469_v51  ;;  %2085 = vmatpush.msra.mxu2 %v4475_v55  ;;  %2656 = vst [vmem:[%s3686_s25 + $0x10] sm:$0xff] %v1667_v58  ;;  %v1690_v23 = vmul.f32 0.0, %v1667_v58  ;;  %v5599_v51 = vld [vmem:[#allocation59_spill] sm:$0xff]  ;;  %v5601_v55 = vld [vmem:[#allocation61_spill] sm:$0xff]  ;;  %v5646_v33 = vld [vmem:[#allocation106_spill] sm:$0xff] }
 0x23a   : > { %1734 = vmatmul.f32.gmra.mxu1 %v1667_v58  ;;  %1780 = vmatmul.f32.gmra.mxu3 %v1667_v58  ;;  %v5647_v15 = vld [vmem:[#allocation107_spill] sm:$0xff]  ;;  %v5648_v52 = vld [vmem:[#allocation108_spill] sm:$0xff] }
 0x23b   : > { %2062 = vmatpush.msra.mxu1 %v4472_v6  ;;  %2108 = vmatpush.msra.mxu3 %v4478_v13  ;;  %v5600_v6 = vld [vmem:[#allocation60_spill] sm:$0xff]  ;;  %v5602_v13 = vld [vmem:[#allocation62_spill] sm:$0xff] }
 0x23c   : > { %1711 = vmatmul.f32.gmra.mxu0 %v1690_v23  ;;  %1757 = vmatmul.f32.gmra.mxu2 %v1690_v23 }
 0x23d   : > { %2040 = vmatpush.msra.mxu0 %v4481_v61  ;;  %2063 = vmatpush.msra.mxu1 %v4484_v57  ;;  %v5603_v61 = vld [vmem:[#allocation63_spill] sm:$0xff]  ;;  %v5604_v57 = vld [vmem:[#allocation64_spill] sm:$0xff] }
 0x23e   : > { %2086 = vmatpush.msra.mxu2 %v4487_v21  ;;  %2109 = vmatpush.msra.mxu3 %v4490_v22  ;;  %v5605_v21 = vld [vmem:[#allocation65_spill] sm:$0xff]  ;;  %v5606_v22 = vld [vmem:[#allocation66_spill] sm:$0xff] }
 0x23f   : > { %2041 = vmatpush.msra.mxu0 %v4493_v35  ;;  %2064 = vmatpush.msra.mxu1 %v4496_v54  ;;  %v5607_v35 = vld [vmem:[#allocation67_spill] sm:$0xff]  ;;  %v5608_v54 = vld [vmem:[#allocation68_spill] sm:$0xff] }
 0x240   : > { %2087 = vmatpush.msra.mxu2 %v4499_v17  ;;  %2110 = vmatpush.msra.mxu3 %v4502_v20  ;;  %v5609_v17 = vld [vmem:[#allocation69_spill] sm:$0xff]  ;;  %v5610_v20 = vld [vmem:[#allocation70_spill] sm:$0xff] }
 0x241   : > { %2042 = vmatpush.msra.mxu0 %v4509_v53  ;;  %2065 = vmatpush.msra.mxu1 %v4512_v41  ;;  %v5611_v53 = vld [vmem:[#allocation71_spill] sm:$0xff]  ;;  %v5612_v41 = vld [vmem:[#allocation72_spill] sm:$0xff] }
 0x242   : > { %1823 = vmatmul.f32.vlgmr.msrb.gmra.mxu1 %v1689_v8  ;;  %1869 = vmatmul.f32.vlgmr.msrb.gmra.mxu3 %v1689_v8  ;;  %v5639_v8 = vld [vmem:[#allocation99_spill] sm:$0xff] }
 0x243   : > { %2088 = vmatpush.msra.mxu2 %v4515_v42  ;;  %2111 = vmatpush.msra.mxu3 %v4518_v38  ;;  %v5613_v42 = vld [vmem:[#allocation73_spill] sm:$0xff]  ;;  %v5614_v38 = vld [vmem:[#allocation74_spill] sm:$0xff] }
 0x244   : > { %1800 = vmatmul.f32.vlgmr.msrb.gmra.mxu0 %v4849_v18  ;;  %1846 = vmatmul.f32.vlgmr.msrb.gmra.mxu2 %v4849_v18  ;;  %v5637_v18 = vld [vmem:[#allocation97_spill] sm:$0xff] }
 0x245   : > { %2043 = vmatpush.msra.mxu0 %v4521_v32  ;;  %2066 = vmatpush.msra.mxu1 %v4524_v10  ;;  %v5615_v32 = vld [vmem:[#allocation75_spill] sm:$0xff]  ;;  %v5616_v10 = vld [vmem:[#allocation76_spill] sm:$0xff] }
 0x246   : > { %2089 = vmatpush.msra.mxu2 %v4527_v14  ;;  %2112 = vmatpush.msra.mxu3 %v4530_v56  ;;  %v5617_v14 = vld [vmem:[#allocation77_spill] sm:$0xff]  ;;  %v5618_v56 = vld [vmem:[#allocation78_spill] sm:$0xff] }
 0x247   : > { %2044 = vmatpush.msra.mxu0 %v5589_v45  ;;  %2067 = vmatpush.msra.mxu1 %v5590_v46  ;;  %v5651_v45 = vld [vmem:[#allocation111_spill] sm:$0xff]  ;;  %v5652_v46 = vld [vmem:[#allocation112_spill] sm:$0xff] }
 0x248   : > { %2090 = vmatpush.msra.mxu2 %v5591_v27  ;;  %2113 = vmatpush.msra.mxu3 %v5592_v50  ;;  %v5653_v27 = vld [vmem:[#allocation113_spill] sm:$0xff]  ;;  %v5654_v50 = vld [vmem:[#allocation114_spill] sm:$0xff] }
 0x249   : > { %2045 = vmatpush.msra.mxu0 %v5593_v59  ;;  %2068 = vmatpush.msra.mxu1 %v5594_v60  ;;  %v5655_v59 = vld [vmem:[#allocation115_spill] sm:$0xff]  ;;  %v5656_v60 = vld [vmem:[#allocation116_spill] sm:$0xff] }
 0x24a   : > { %1826 = vmatmul.f32.gmra.mxu1 %v1667_v58  ;;  %1872 = vmatmul.f32.gmra.mxu3 %v1667_v58  ;;  %v5649_v58 = vld [vmem:[#allocation109_spill] sm:$0xff] }
 0x24b   : > { %2091 = vmatpush.msra.mxu2 %v5595_v4  ;;  %2114 = vmatpush.msra.mxu3 %v5596_v1  ;;  %v5657_v4 = vld [vmem:[#allocation117_spill] sm:$0xff]  ;;  %v5658_v1 = vld [vmem:[#allocation118_spill] sm:$0xff] }
 0x24c   : > { %1803 = vmatmul.f32.gmra.mxu0 %v1690_v23  ;;  %1849 = vmatmul.f32.gmra.mxu2 %v1690_v23  ;;  %v5650_v23 = vld [vmem:[#allocation110_spill] sm:$0xff] }
 0x24d   : > { %2046 = vmatpush.msra.mxu0 %v5597_v5  ;;  %2069 = vmatpush.msra.mxu1 %v5598_v19  ;;  %v5659_v5 = vld [vmem:[#allocation119_spill] sm:$0xff]  ;;  %v5660_v19 = vld [vmem:[#allocation120_spill] sm:$0xff] }
 0x24e   : > { %2092 = vmatpush.msra.mxu2 %v5599_v51  ;;  %2115 = vmatpush.msra.mxu3 %v5600_v6  ;;  %v5661_v51 = vld [vmem:[#allocation121_spill] sm:$0xff]  ;;  %v5662_v6 = vld [vmem:[#allocation122_spill] sm:$0xff] }
 0x24f   : > { %2047 = vmatpush.msra.mxu0 %v5601_v55  ;;  %2070 = vmatpush.msra.mxu1 %v5602_v13  ;;  %v5663_v55 = vld [vmem:[#allocation123_spill] sm:$0xff]  ;;  %v5664_v13 = vld [vmem:[#allocation124_spill] sm:$0xff] }
 0x250   : > { %2093 = vmatpush.msra.mxu2 %v5603_v61  ;;  %2116 = vmatpush.msra.mxu3 %v5604_v57  ;;  %v5665_v61 = vld [vmem:[#allocation125_spill] sm:$0xff]  ;;  %v5666_v57 = vld [vmem:[#allocation126_spill] sm:$0xff] }
 0x251   : > { %2048 = vmatpush.msra.mxu0 %v5605_v21  ;;  %2071 = vmatpush.msra.mxu1 %v5606_v22  ;;  %v5667_v21 = vld [vmem:[#allocation127_spill] sm:$0xff]  ;;  %v5668_v22 = vld [vmem:[#allocation128_spill] sm:$0xff] }
 0x252   : > { %2094 = vmatpush.msra.mxu2 %v5607_v35  ;;  %2117 = vmatpush.msra.mxu3 %v5608_v54  ;;  %v5669_v35 = vld [vmem:[#allocation129_spill] sm:$0xff]  ;;  %v5670_v54 = vld [vmem:[#allocation130_spill] sm:$0xff] }
 0x253   : > { %2049 = vmatpush.msra.mxu0 %v5609_v17  ;;  %2072 = vmatpush.msra.mxu1 %v5610_v20  ;;  %v5671_v17 = vld [vmem:[#allocation131_spill] sm:$0xff]  ;;  %v5672_v20 = vld [vmem:[#allocation132_spill] sm:$0xff] }
 0x254   : > { %2095 = vmatpush.msra.mxu2 %v5611_v53  ;;  %2118 = vmatpush.msra.mxu3 %v5612_v41  ;;  %v5673_v53 = vld [vmem:[#allocation133_spill] sm:$0xff]  ;;  %v5674_v41 = vld [vmem:[#allocation134_spill] sm:$0xff] }
 0x255   : > { %2050 = vmatpush.msra.mxu0 %v5613_v42  ;;  %2073 = vmatpush.msra.mxu1 %v5614_v38  ;;  %v5675_v42 = vld [vmem:[#allocation135_spill] sm:$0xff]  ;;  %v5676_v38 = vld [vmem:[#allocation136_spill] sm:$0xff] }
 0x256   : > { %2096 = vmatpush.msra.mxu2 %v5615_v32  ;;  %2119 = vmatpush.msra.mxu3 %v5616_v10  ;;  %v5677_v32 = vld [vmem:[#allocation137_spill] sm:$0xff]  ;;  %v5678_v10 = vld [vmem:[#allocation138_spill] sm:$0xff] }
 0x257   : > { %2127 = vmatpush.msrb.mxu0 %v5617_v14  ;;  %2150 = vmatpush.msrb.mxu1 %v5618_v56  ;;  %v5679_v14 = vld [vmem:[#allocation139_spill] sm:$0xff]  ;;  %v5680_v56 = vld [vmem:[#allocation140_spill] sm:$0xff] }
 0x258   : > { %2173 = vmatpush.msrb.mxu2 %v5619_v26  ;;  %2196 = vmatpush.msrb.mxu3 %v5620_v25 }
 0x259   : > { %2128 = vmatpush.msrb.mxu0 %v5621_v47  ;;  %2151 = vmatpush.msrb.mxu1 %v5622_v9  ;;  %v5681_v9 = vld [vmem:[#allocation33_spill] sm:$0xff] }
 0x25a   : > { %2174 = vmatpush.msrb.mxu2 %v5623_v16  ;;  %2197 = vmatpush.msrb.mxu3 %v5624_v28 }
 0x25b   : > { %2129 = vmatpush.msrb.mxu0 %v5625_v12  ;;  %2152 = vmatpush.msrb.mxu1 %v5626_v63 }
 0x25c   : > { %2175 = vmatpush.msrb.mxu2 %v5627_v29  ;;  %2198 = vmatpush.msrb.mxu3 %v5628_v3  ;;  %v5682_v3 = vld [vmem:[#allocation34_spill] sm:$0xff] }
 0x25d   : > { %2130 = vmatpush.msrb.mxu0 %v5629_v43  ;;  %2153 = vmatpush.msrb.mxu1 %v5630_v44 }
 0x25e   : > { %2176 = vmatpush.msrb.mxu2 %v5631_v48  ;;  %2199 = vmatpush.msrb.mxu3 %v5632_v24 }
 0x25f   : > { %2131 = vmatpush.msrb.mxu0 %v5633_v34  ;;  %2154 = vmatpush.msrb.mxu1 %v5634_v36 }
 0x260   : > { %2177 = vmatpush.msrb.mxu2 %v5635_v2  ;;  %2200 = vmatpush.msrb.mxu3 %v5636_v49  ;;  %v5683_v49 = vld [vmem:[#allocation45_spill] sm:$0xff] }
 0x261   : > { %2132 = vmatpush.msrb.mxu0 %v5637_v18  ;;  %2155 = vmatpush.msrb.mxu1 %v5638_v30 }
 0x262   : > { %2178 = vmatpush.msrb.mxu2 %v5639_v8  ;;  %2201 = vmatpush.msrb.mxu3 %v5640_v11 }
 0x263   : > { %2133 = vmatpush.msrb.mxu0 %v5641_v31  ;;  %2156 = vmatpush.msrb.mxu1 %v5642_v0 }
 0x264   : > { %2179 = vmatpush.msrb.mxu2 %v5643_v39  ;;  %2202 = vmatpush.msrb.mxu3 %v5644_v40 }
 0x265   : > { %2134 = vmatpush.msrb.mxu0 %v5645_v37  ;;  %2157 = vmatpush.msrb.mxu1 %v5646_v33  ;;  %v5684_v33 = vld [vmem:[#allocation46_spill] sm:$0xff] }
 0x266   : > { %2180 = vmatpush.msrb.mxu2 %v5647_v15  ;;  %2203 = vmatpush.msrb.mxu3 %v5648_v52 }
 0x267   : > { %2135 = vmatpush.msrb.mxu0 %v5649_v58  ;;  %2158 = vmatpush.msrb.mxu1 %v5650_v23 }
 0x268   : > { %2181 = vmatpush.msrb.mxu2 %v5651_v45  ;;  %2204 = vmatpush.msrb.mxu3 %v5652_v46  ;;  %v5685_v46 = vld [vmem:[#allocation35_spill] sm:$0xff] }
 0x269   : > { %2136 = vmatpush.msrb.mxu0 %v5653_v27  ;;  %2159 = vmatpush.msrb.mxu1 %v5654_v50 }
 0x26a   : > { %2182 = vmatpush.msrb.mxu2 %v5655_v59  ;;  %2205 = vmatpush.msrb.mxu3 %v5656_v60 }
 0x26b   : > { %2137 = vmatpush.msrb.mxu0 %v5657_v4  ;;  %2160 = vmatpush.msrb.mxu1 %v5658_v1 }
 0x26c   : > { %2183 = vmatpush.msrb.mxu2 %v5659_v5  ;;  %2206 = vmatpush.msrb.mxu3 %v5660_v19 }
 0x26d   : > { %2138 = vmatpush.msrb.mxu0 %v5661_v51  ;;  %2161 = vmatpush.msrb.mxu1 %v5662_v6 }
 0x26e   : > { %2184 = vmatpush.msrb.mxu2 %v5663_v55  ;;  %2207 = vmatpush.msrb.mxu3 %v5664_v13 }
 0x26f   : > { %2139 = vmatpush.msrb.mxu0 %v5665_v61  ;;  %2162 = vmatpush.msrb.mxu1 %v5666_v57  ;;  %v5686_v57 = vld [vmem:[#allocation36_spill] sm:$0xff] }
 0x270   : > { %2185 = vmatpush.msrb.mxu2 %v5667_v21  ;;  %2208 = vmatpush.msrb.mxu3 %v5668_v22 }
 0x271   : > { %2140 = vmatpush.msrb.mxu0 %v5669_v35  ;;  %2163 = vmatpush.msrb.mxu1 %v5670_v54 }
 0x272   : > { %2186 = vmatpush.msrb.mxu2 %v5671_v17  ;;  %2209 = vmatpush.msrb.mxu3 %v5672_v20 }
 0x273   : > { %2141 = vmatpush.msrb.mxu0 %v5673_v53  ;;  %2164 = vmatpush.msrb.mxu1 %v5674_v41 }
 0x274   : > { %2187 = vmatpush.msrb.mxu2 %v5675_v42  ;;  %2210 = vmatpush.msrb.mxu3 %v5676_v38 }
 0x275   : > { %2142 = vmatpush.msrb.mxu0 %v5677_v32  ;;  %2165 = vmatpush.msrb.mxu1 %v5678_v10 }
 0x276   : > { %2188 = vmatpush.msrb.mxu2 %v5679_v14  ;;  %2211 = vmatpush.msrb.mxu3 %v5680_v56 }
 0x2ac   : > { %v1709_v26 = vpop.f32.mrf.mxu0 }
 0x2ae   : > { %v1732_v25 = vpop.f32.mrf.mxu1 }
 0x2af   : > { %v1733_v47 = vadd.f32 %v1732_v25, %v1709_v26 }
 0x2b1   : > { %v1876_v16 = vadd.f32 %v1733_v47, %v5681_v9  ;;  %v5687_v9 = vld [vmem:[#allocation47_spill] sm:$0xff] }
 0x2b2   : > { %v1755_v12 = vpop.f32.mrf.mxu2 }
 0x2b3   : > { %v2657_v28 = vmul.f32 -1.442695, %v1876_v16 }
 0x2b4   : > { %v1778_v63 = vpop.f32.mrf.mxu3 }
 0x2b5   : > { %2892 = vpow2.f32 %v2657_v28  ;;  %v1779_v29 = vadd.f32 %v1778_v63, %v1755_v12 }
 0x2b7   : > { %v1877_v43 = vadd.f32 %v1779_v29, %v5682_v3  ;;  %v1735_v44 = vpop.f32.mrf.mxu1 }
 0x2b9   : > { %v2659_v48 = vmul.f32 -1.442695, %v1877_v43  ;;  %v1712_v24 = vpop.f32.mrf.mxu0 }
 0x2ba   : > { %v1736_v34 = vadd.f32 %v1735_v44, %v1712_v24 }
 0x2bb   : > { %v2893_v36 = vpop.eup %2892  ;;  %2894 = vpow2.f32 %v2659_v48 }
 0x2bc   : > { %v1890_v2 = vadd.f32 1.0, %v2893_v36  ;;  %v1880_v18 = vadd.f32 %v1736_v34, %v5683_v49  ;;  %v5688_v34 = vld [vmem:[#allocation48_spill] sm:$0xff] }
 0x2bd   : > { %v1781_v30 = vpop.f32.mrf.mxu3 }
 0x2be   : > { %2896 = vrcp.f32 %v1890_v2  ;;  %v2658_v8 = vmul.f32 -1.442695, %v1880_v18  ;;  %v1903_v5 = vand.u32 2147483648, %v1890_v2  ;;  %v1901_v55 = vand.u32 2147483647, %v1890_v2 }
 0x2bf   : > { %v1758_v11 = vpop.f32.mrf.mxu2  ;;  %v1824_v31 = vpop.f32.mrf.mxu1  ;;  %vm1897_vm2 = vweird.f32 %v1890_v2 }
 0x2c0   : > { %2898 = vpow2.f32 %v2658_v8  ;;  %v1782_v0 = vadd.f32 %v1781_v30, %v1758_v11  ;;  %v1904_v20 = vor.u32 1.1754944e-38, %v1903_v5  ;;  %vm1902_vm4 = vcmp.eq.f32.partialorder %v1901_v55, 8.507059e+37 }
 0x2c1   : > { %v2895_v39 = vpop.eup %2894  ;;  %v1801_v40 = vpop.f32.mrf.mxu0 }
 0x2c2   : > { %v1928_v37 = vadd.f32 1.0, %v2895_v39  ;;  %v1881_v15 = vadd.f32 %v1782_v0, %v5684_v33  ;;  %v1825_v52 = vadd.f32 %v1824_v31, %v1801_v40 }
 0x2c4   : > { %v2897_v58 = vpop.eup %2896  ;;  %2900 = vrcp.f32 %v1928_v37  ;;  %v2660_v23 = vmul.f32 -1.442695, %v1881_v15  ;;  %v1878_v27 = vadd.f32 %v1825_v52, %v5685_v46  ;;  %v1941_v10 = vand.u32 2147483648, %v1928_v37 }
 0x2c5   : > { %v1893_v45 = vmul.f32 %v2897_v58, %v1890_v2  ;;  %v1870_v50 = vpop.f32.mrf.mxu3  ;;  %vm1898_vm1 = vweird.f32 %v2897_v58  ;;  %v1939_v56 = vand.u32 2147483647, %v1928_v37  ;;  %vm1935_vm6 = vweird.f32 %v1928_v37 }
 0x2c6   : > { %v2899_v59 = vpop.eup %2898  ;;  %2902 = vpow2.f32 %v2660_v23  ;;  %vm1899_vm3 = vmor %vm1897_vm2, %vm1898_vm1  ;;  %v1942_v43 = vor.u32 1.1754944e-38, %v1941_v10 }
 0x2c7   : > { %v1894_v60 = vsub.f32 1.0, %v1893_v45  ;;  %v4993_v4 = vadd.f32 1.0, %v2899_v59  ;;  %v1847_v1 = vpop.f32.mrf.mxu2  ;;  %2904 = vtanh.f32 %v1878_v27  ;;  %v1827_v51 = vpop.f32.mrf.mxu1  ;;  %vm1940_vm8 = vcmp.eq.f32.partialorder %v1939_v56, 8.507059e+37 }
 0x2c8   : > { %v1871_v19 = vadd.f32 %v1870_v50, %v1847_v1 }
 0x2c9   : > { %2906 = vrcp.f32 %v4993_v4  ;;  %v1895_v6 = vmul.f32 %v2897_v58, %v1894_v60  ;;  %v1804_v13 = vpop.f32.mrf.mxu0  ;;  %v1918_v24 = vand.u32 2147483648, %v4993_v4  ;;  %v1916_v30 = vand.u32 2147483647, %v4993_v4 }
 0x2ca   : > { %v2901_v61 = vpop.eup %2900  ;;  %v1879_v21 = vadd.f32 %v1871_v19, %v5686_v57  ;;  %v1828_v54 = vadd.f32 %v1827_v51, %v1804_v13  ;;  %vm1912_vm10 = vweird.f32 %v4993_v4 }
 0x2cb   : > { %v1931_v22 = vmul.f32 %v2901_v61, %v1928_v37  ;;  %v1896_v35 = vadd.f32 %v2897_v58, %v1895_v6  ;;  %vm1936_vm5 = vweird.f32 %v2901_v61  ;;  %v1919_v33 = vor.u32 1.1754944e-38, %v1918_v24 }
 0x2cc   : > { %v2903_v17 = vpop.eup %2902  ;;  %v2661_v53 = vmul.f32 -1.442695, %v1879_v21  ;;  %v1882_v16 = vadd.f32 %v1828_v54, %v5687_v9  ;;  %vm1937_vm7 = vmor %vm1935_vm6, %vm1936_vm5  ;;  %vm1917_vm12 = vcmp.eq.f32.partialorder %v1916_v30, 8.507059e+37 }
 0x2cd   : > { %v1932_v41 = vsub.f32 1.0, %v1931_v22  ;;  %v4997_v42 = vadd.f32 1.0, %v2903_v17  ;;  %v1900_v38 = vsel %vm1899_vm3, %v2897_v58, %v1896_v35  ;;  %v2905_v32 = vpop.eup %2904  ;;  %v1873_v26 = vpop.f32.mrf.mxu3 }
 0x2ce   : > { %v1905_v14 = vsel %vm1902_vm4, %v1904_v20, %v1900_v38  ;;  %2908 = vpow2.f32 %v2661_v53 }
 0x2cf   : > { %v2907_v25 = vpop.eup %2906  ;;  %v1933_v47 = vmul.f32 %v2901_v61, %v1932_v41  ;;  %2910 = vrcp.f32 %v4997_v42  ;;  %v1850_v28 = vpop.f32.mrf.mxu2  ;;  %v2004_v63 = vmul.f32 %v2905_v32, %v1905_v14  ;;  %v1956_v23 = vand.u32 2147483648, %v4997_v42 }
 0x2d0   : > { %v1908_v12 = vmul.f32 %v2907_v25, %v4993_v4  ;;  %v1874_v3 = vadd.f32 %v1873_v26, %v1850_v28  ;;  %2912 = vtanh.f32 %v1882_v16  ;;  %vm1913_vm9 = vweird.f32 %v2907_v25 }
 0x2d1   : > { %v1934_v29 = vadd.f32 %v2901_v61, %v1933_v47  ;;  %vm1914_vm11 = vmor %vm1912_vm10, %vm1913_vm9  ;;  %v1954_v46 = vand.u32 2147483647, %v4997_v42  ;;  %vm1950_vm14 = vweird.f32 %v4997_v42  ;;  %v1957_v60 = vor.u32 1.1754944e-38, %v1956_v23 }
 0x2d2   : > { %v1909_v44 = vsub.f32 1.0, %v1908_v12  ;;  %v1883_v36 = vadd.f32 %v1874_v3, %v5688_v34  ;;  %v5689_v3 = vld [vmem:[#allocation37_spill] sm:$0xff] }
 0x2d3   : > { %v1938_v48 = vsel %vm1937_vm7, %v2901_v61, %v1934_v29  ;;  %vm1955_vm0 = vcmp.eq.f32.partialorder %v1954_v46, 8.507059e+37 }
 0x2d4   : > { %v2909_v2 = vpop.eup %2908  ;;  %v1943_v49 = vsel %vm1940_vm8, %v1942_v43, %v1938_v48  ;;  %v1910_v18 = vmul.f32 %v2907_v25, %v1909_v44  ;;  %v2662_v0 = vmul.f32 -1.442695, %v1883_v36 }
 0x2d5   : > { %v2911_v8 = vpop.eup %2910  ;;  %v2002_v11 = vmul.f32 %v1943_v49, %v4840_v62  ;;  %v1968_v31 = vadd.f32 1.0, %v2909_v2  ;;  %v5690_v2 = vld [vmem:[#allocation38_spill] sm:$0xff] }
 0x2d6   : > { %v1946_v39 = vmul.f32 %v2911_v8, %v4997_v42  ;;  %v1911_v40 = vadd.f32 %v2907_v25, %v1910_v18  ;;  %v2913_v58 = vpop.eup %2912  ;;  %vm1951_vm13 = vweird.f32 %v2911_v8 }
 0x2d7   : > { %v5008_v37 = vadd.f32 %v2004_v63, %v2002_v11  ;;  %2914 = vrcp.f32 %v1968_v31  ;;  %vm1952_vm15 = vmor %vm1950_vm14, %vm1951_vm13  ;;  %v1981_v13 = vand.u32 2147483648, %v1968_v31  ;;  %v1979_v57 = vand.u32 2147483647, %v1968_v31 }
 0x2d8   : > { %v1947_v15 = vsub.f32 1.0, %v1946_v39  ;;  %v1915_v52 = vsel %vm1914_vm11, %v2907_v25, %v1911_v40  ;;  %2916 = vpow2.f32 %v2662_v0  ;;  %vm1975_vm2 = vweird.f32 %v1968_v31 }
 0x2d9   : > { %v1920_v62 = vsel %vm1917_vm12, %v1919_v33, %v1915_v52  ;;  %2918 = vtanh.f32 %v5008_v37  ;;  %v1982_v35 = vor.u32 1.1754944e-38, %v1981_v13  ;;  %vm1980_vm4 = vcmp.eq.f32.partialorder %v1979_v57, 8.507059e+37 }
 0x2da   : > { %v1948_v45 = vmul.f32 %v2911_v8, %v1947_v15  ;;  %v2005_v27 = vmul.f32 %v2913_v58, %v1920_v62 }
 0x2dc   : > { %v1949_v50 = vadd.f32 %v2911_v8, %v1948_v45  ;;  %v5692_v45 = vld [vmem:[#allocation42_spill] sm:$0xff] }
 0x2dd   : > { %v2915_v59 = vpop.eup %2914 }
 0x2de   : > { %v2917_v4 = vpop.eup %2916  ;;  %v1971_v1 = vmul.f32 %v2915_v59, %v1968_v31  ;;  %v1953_v5 = vsel %vm1952_vm15, %v2911_v8, %v1949_v50  ;;  %vm1976_vm1 = vweird.f32 %v2915_v59  ;;  %v5691_v31 = vld [vmem:[#allocation41_spill] sm:$0xff] }
 0x2df   : > { %v1958_v19 = vsel %vm1955_vm0, %v1957_v60, %v1953_v5  ;;  %v1969_v51 = vadd.f32 1.0, %v2917_v4  ;;  %vm1977_vm3 = vmor %vm1975_vm2, %vm1976_vm1  ;;  %v2919_v54 = vpop.eup %2918  ;;  %v5693_v60 = vld [vmem:[#allocation39_spill] sm:$0xff] }
 0x2e0   : > { %v1972_v6 = vsub.f32 1.0, %v1971_v1  ;;  %v2003_v55 = vmul.f32 %v1958_v19, %v4847_v7 }
 0x2e1   : > { %2920 = vrcp.f32 %v1969_v51  ;;  %v1996_v32 = vand.u32 2147483648, %v1969_v51  ;;  %v1994_v14 = vand.u32 2147483647, %v1969_v51  ;;  %vm1990_vm6 = vweird.f32 %v1969_v51 }
 0x2e2   : > { %v1973_v61 = vmul.f32 %v2915_v59, %v1972_v6  ;;  %v5015_v21 = vadd.f32 %v2005_v27, %v2003_v55 }
 0x2e3   : > { %v1997_v26 = vor.u32 1.1754944e-38, %v1996_v32  ;;  %vm1995_vm8 = vcmp.eq.f32.partialorder %v1994_v14, 8.507059e+37 }
 0x2e4   : > { %v1974_v22 = vadd.f32 %v2915_v59, %v1973_v61  ;;  %2922 = vtanh.f32 %v5015_v21 }
 0x2e6   : > { %v1978_v17 = vsel %vm1977_vm3, %v2915_v59, %v1974_v22 }
 0x2e7   : > { %v2921_v20 = vpop.eup %2920  ;;  %v1983_v53 = vsel %vm1980_vm4, %v1982_v35, %v1978_v17 }
 0x2e8   : > { %v2010_v41 = vmul.f32 %v2919_v54, %v1983_v53  ;;  %v1986_v42 = vmul.f32 %v2921_v20, %v1969_v51  ;;  %vm1991_vm5 = vweird.f32 %v2921_v20 }
 0x2e9   : > { %vm1992_vm7 = vmor %vm1990_vm6, %vm1991_vm5 }
 0x2ea   : > { %2663 = vst [vmem:[%s3684_s15 + $0x10] sm:$0xff] %v2010_v41  ;;  %v1987_v7 = vsub.f32 1.0, %v1986_v42  ;;  %2051 = vmatmul.f32.vlgmr.msra.gmra.mxu0 %v2010_v41  ;;  %2097 = vmatmul.f32.vlgmr.msra.gmra.mxu2 %v2010_v41  ;;  %v2032_v38 = vmul.f32 0.0, %v2010_v41  ;;  %v2923_v47 = vpop.eup %2922 }
 0x2ec   : > { %v1988_v10 = vmul.f32 %v2921_v20, %v1987_v7  ;;  %2074 = vmatmul.f32.vlgmr.msra.gmra.mxu1 %v2032_v38  ;;  %2120 = vmatmul.f32.vlgmr.msra.gmra.mxu3 %v2032_v38 }
 0x2ee   : > { %v1989_v56 = vadd.f32 %v2921_v20, %v1988_v10 }
 0x2f0   : > { %v1993_v25 = vsel %vm1992_vm7, %v2921_v20, %v1989_v56  ;;  %v5694_v20 = vld [vmem:[#allocation40_spill] sm:$0xff] }
 0x2f1   : > { %v1998_v9 = vsel %vm1995_vm8, %v1997_v26, %v1993_v25 }
 0x2f2   : > { %v2011_v16 = vmul.f32 %v2923_v47, %v1998_v9 }
 0x2f4   : > { %2664 = vst [vmem:[%s3686_s25 + $0x8] sm:$0xff] %v2011_v16  ;;  %v2033_v28 = vmul.f32 0.0, %v2011_v16  ;;  %2077 = vmatmul.f32.gmra.mxu1 %v2011_v16  ;;  %2123 = vmatmul.f32.gmra.mxu3 %v2011_v16 }
 0x2f6   : > { %2054 = vmatmul.f32.gmra.mxu0 %v2033_v28  ;;  %2100 = vmatmul.f32.gmra.mxu2 %v2033_v28 }
 0x2fc   : > { %2166 = vmatmul.f32.vlgmr.msrb.gmra.mxu1 %v2032_v38  ;;  %2212 = vmatmul.f32.vlgmr.msrb.gmra.mxu3 %v2032_v38 }
 0x2fe   : > { %2143 = vmatmul.f32.vlgmr.msrb.gmra.mxu0 %v2010_v41  ;;  %2189 = vmatmul.f32.vlgmr.msrb.gmra.mxu2 %v2010_v41 }
 0x304   : > { %2169 = vmatmul.f32.gmra.mxu1 %v2011_v16  ;;  %2215 = vmatmul.f32.gmra.mxu3 %v2011_v16 }
 0x306   : > { %2146 = vmatmul.f32.gmra.mxu0 %v2033_v28  ;;  %2192 = vmatmul.f32.gmra.mxu2 %v2033_v28 }
 0x367   : > { %v2052_v12 = vpop.f32.mrf.mxu0 }
 0x369   : > { %v2075_v63 = vpop.f32.mrf.mxu1 }
 0x36a   : > { %v2076_v29 = vadd.f32 %v2075_v63, %v2052_v12 }
 0x36c   : > { %v2219_v43 = vadd.f32 %v2076_v29, %v5689_v3  ;;  %v5695_v29 = vld [vmem:[#allocation43_spill] sm:$0xff] }
 0x36d   : > { %v2098_v48 = vpop.f32.mrf.mxu2 }
 0x36e   : > { %v2665_v44 = vmul.f32 -1.442695, %v2219_v43 }
 0x36f   : > { %v2121_v24 = vpop.f32.mrf.mxu3 }
 0x370   : > { %2924 = vpow2.f32 %v2665_v44  ;;  %v2122_v34 = vadd.f32 %v2121_v24, %v2098_v48 }
 0x371   : > { %v2078_v36 = vpop.f32.mrf.mxu1 }
 0x372   : > { %v2220_v49 = vadd.f32 %v2122_v34, %v5690_v2 }
 0x373   : > { %v2055_v18 = vpop.f32.mrf.mxu0 }
 0x374   : > { %v2667_v30 = vmul.f32 -1.442695, %v2220_v49  ;;  %v2079_v8 = vadd.f32 %v2078_v36, %v2055_v18 }
 0x376   : > { %v2925_v11 = vpop.eup %2924  ;;  %2926 = vpow2.f32 %v2667_v30  ;;  %v2223_v0 = vadd.f32 %v2079_v8, %v5691_v31  ;;  %v5696_v8 = vld [vmem:[#allocation44_spill] sm:$0xff] }
 0x377   : > { %v2233_v39 = vadd.f32 1.0, %v2925_v11  ;;  %v2124_v40 = vpop.f32.mrf.mxu3 }
 0x378   : > { %v2666_v33 = vmul.f32 -1.442695, %v2223_v0 }
 0x379   : > { %2928 = vrcp.f32 %v2233_v39  ;;  %v2101_v15 = vpop.f32.mrf.mxu2  ;;  %v2167_v52 = vpop.f32.mrf.mxu1  ;;  %v2244_v22 = vand.u32 2147483647, %v2233_v39  ;;  %v2246_v35 = vand.u32 2147483648, %v2233_v39  ;;  %vm2240_vm10 = vweird.f32 %v2233_v39 }
 0x37a   : > { %2930 = vpow2.f32 %v2666_v33  ;;  %v2125_v58 = vadd.f32 %v2124_v40, %v2101_v15 }
 0x37b   : > { %v2144_v23 = vpop.f32.mrf.mxu0  ;;  %vm2245_vm12 = vcmp.eq.f32.partialorder %v2244_v22, 8.507059e+37  ;;  %v2247_v56 = vor.u32 1.1754944e-38, %v2246_v35 }
 0x37c   : > { %v2927_v62 = vpop.eup %2926  ;;  %v2224_v46 = vadd.f32 %v2125_v58, %v5692_v45  ;;  %v2168_v27 = vadd.f32 %v2167_v52, %v2144_v23 }
 0x37d   : > { %v2271_v50 = vadd.f32 1.0, %v2927_v62 }
 0x37e   : > { %v2668_v59 = vmul.f32 -1.442695, %v2224_v46  ;;  %v2221_v4 = vadd.f32 %v2168_v27, %v5693_v60 }
 0x37f   : > { %v2929_v1 = vpop.eup %2928  ;;  %2932 = vrcp.f32 %v2271_v50  ;;  %v2213_v5 = vpop.f32.mrf.mxu3  ;;  %v2284_v47 = vand.u32 2147483648, %v2271_v50  ;;  %v2282_v63 = vand.u32 2147483647, %v2271_v50  ;;  %vm2278_vm14 = vweird.f32 %v2271_v50 }
 0x380   : > { %v2931_v19 = vpop.eup %2930  ;;  %v2236_v51 = vmul.f32 %v2929_v1, %v2233_v39  ;;  %2934 = vpow2.f32 %v2668_v59  ;;  %vm2241_vm9 = vweird.f32 %v2929_v1 }
 0x381   : > { %v5025_v6 = vadd.f32 1.0, %v2931_v19  ;;  %v2190_v55 = vpop.f32.mrf.mxu2  ;;  %2936 = vtanh.f32 %v2221_v4  ;;  %v2170_v57 = vpop.f32.mrf.mxu1  ;;  %vm2242_vm11 = vmor %vm2240_vm10, %vm2241_vm9  ;;  %v2285_v36 = vor.u32 1.1754944e-38, %v2284_v47  ;;  %vm2283_vm0 = vcmp.eq.f32.partialorder %v2282_v63, 8.507059e+37 }
 0x382   : > { %v2237_v13 = vsub.f32 1.0, %v2236_v51  ;;  %v2214_v61 = vadd.f32 %v2213_v5, %v2190_v55 }
 0x383   : > { %2938 = vrcp.f32 %v5025_v6  ;;  %v2147_v54 = vpop.f32.mrf.mxu0  ;;  %v2259_v18 = vand.u32 2147483647, %v5025_v6  ;;  %v2261_v30 = vand.u32 2147483648, %v5025_v6  ;;  %vm2255_vm2 = vweird.f32 %v5025_v6 }
 0x384   : > { %v2238_v17 = vmul.f32 %v2929_v1, %v2237_v13  ;;  %v2222_v53 = vadd.f32 %v2214_v61, %v5694_v20  ;;  %v2171_v42 = vadd.f32 %v2170_v57, %v2147_v54 }
 0x385   : > { %v2933_v41 = vpop.eup %2932  ;;  %vm2260_vm4 = vcmp.eq.f32.partialorder %v2259_v18, 8.507059e+37  ;;  %v2262_v45 = vor.u32 1.1754944e-38, %v2261_v30 }
 0x386   : > { %v2935_v7 = vpop.eup %2934  ;;  %v2274_v38 = vmul.f32 %v2933_v41, %v2271_v50  ;;  %v2239_v32 = vadd.f32 %v2929_v1, %v2238_v17  ;;  %v2669_v10 = vmul.f32 -1.442695, %v2222_v53  ;;  %v2225_v3 = vadd.f32 %v2171_v42, %v5695_v29 }
 0x387   : > { %v5029_v14 = vadd.f32 1.0, %v2935_v7  ;;  %v2937_v26 = vpop.eup %2936  ;;  %v2216_v16 = vpop.f32.mrf.mxu3  ;;  %vm2279_vm13 = vweird.f32 %v2933_v41 }
 0x388   : > { %v2275_v25 = vsub.f32 1.0, %v2274_v38  ;;  %v2243_v9 = vsel %vm2242_vm11, %v2929_v1, %v2239_v32  ;;  %2940 = vpow2.f32 %v2669_v10  ;;  %vm2280_vm15 = vmor %vm2278_vm14, %vm2279_vm13 }
 0x389   : > { %v2939_v28 = vpop.eup %2938  ;;  %2942 = vrcp.f32 %v5029_v14  ;;  %v2248_v12 = vsel %vm2245_vm12, %v2247_v56, %v2243_v9  ;;  %v2193_v43 = vpop.f32.mrf.mxu2  ;;  %v2299_v60 = vand.u32 2147483648, %v5029_v14  ;;  %vm2293_vm6 = vweird.f32 %v5029_v14 }
 0x38a   : > { %v2276_v44 = vmul.f32 %v2933_v41, %v2275_v25  ;;  %v2251_v48 = vmul.f32 %v2939_v28, %v5025_v6  ;;  %v2347_v24 = vmul.f32 %v2937_v26, %v2248_v12  ;;  %v2217_v34 = vadd.f32 %v2216_v16, %v2193_v43 }
 0x38b   : > { %2944 = vtanh.f32 %v2225_v3  ;;  %vm2256_vm1 = vweird.f32 %v2939_v28  ;;  %v2300_v6 = vor.u32 1.1754944e-38, %v2299_v60 }
 0x38c   : > { %v2252_v2 = vsub.f32 1.0, %v2251_v48  ;;  %v2277_v49 = vadd.f32 %v2933_v41, %v2276_v44  ;;  %v2226_v11 = vadd.f32 %v2217_v34, %v5696_v8  ;;  %vm2257_vm3 = vmor %vm2255_vm2, %vm2256_vm1 }
 0x38e   : > { %v2941_v31 = vpop.eup %2940  ;;  %v2281_v0 = vsel %vm2280_vm15, %v2933_v41, %v2277_v49  ;;  %v2253_v39 = vmul.f32 %v2939_v28, %v2252_v2  ;;  %v2670_v52 = vmul.f32 -1.442695, %v2226_v11 }
 0x38f   : > { %v2943_v40 = vpop.eup %2942  ;;  %v2286_v33 = vsel %vm2283_vm0, %v2285_v36, %v2281_v0  ;;  %v2311_v15 = vadd.f32 1.0, %v2941_v31 }
 0x390   : > { %v2289_v58 = vmul.f32 %v2943_v40, %v5029_v14  ;;  %v2345_v23 = vmul.f32 %v2286_v33, %v5008_v37  ;;  %v2254_v62 = vadd.f32 %v2939_v28, %v2253_v39  ;;  %vm2294_vm5 = vweird.f32 %v2943_v40 }
 0x391   : > { %2946 = vrcp.f32 %v2311_v15  ;;  %v2945_v59 = vpop.eup %2944  ;;  %v2297_v37 = vand.u32 2147483647, %v5029_v14  ;;  %vm2295_vm7 = vmor %vm2293_vm6, %vm2294_vm5  ;;  %v2324_v17 = vand.u32 2147483648, %v2311_v15  ;;  %v2322_v53 = vand.u32 2147483647, %v2311_v15 }
 0x392   : > { %v2290_v46 = vsub.f32 1.0, %v2289_v58  ;;  %v2349_v27 = vadd.f32 %v2347_v24, %v2345_v23  ;;  %v2258_v50 = vsel %vm2257_vm3, %v2939_v28, %v2254_v62  ;;  %2948 = vpow2.f32 %v2670_v52 }
 0x393   : > { %v2263_v4 = vsel %vm2260_vm4, %v2262_v45, %v2258_v50  ;;  %vm2298_vm8 = vcmp.eq.f32.partialorder %v2297_v37, 8.507059e+37  ;;  %vm2318_vm10 = vweird.f32 %v2311_v15  ;;  %v2325_v7 = vor.u32 1.1754944e-38, %v2324_v17 }
 0x394   : > { %v2291_v1 = vmul.f32 %v2943_v40, %v2290_v46  ;;  %2355 = vst [vmem:[#allocation5 + $0x8] sm:$0xff] %v2349_v27  ;;  %v2348_v5 = vmul.f32 %v2945_v59, %v2263_v4  ;;  %2950 = vtanh.f32 %v2349_v27  ;;  %vm2323_vm12 = vcmp.eq.f32.partialorder %v2322_v53, 8.507059e+37 }
 0x396   : > { %v2292_v19 = vadd.f32 %v2943_v40, %v2291_v1 }
 0x397   : > { %v2947_v51 = vpop.eup %2946 }
 0x398   : > { %v2949_v55 = vpop.eup %2948  ;;  %v2314_v13 = vmul.f32 %v2947_v51, %v2311_v15  ;;  %v2296_v61 = vsel %vm2295_vm7, %v2943_v40, %v2292_v19  ;;  %vm2319_vm9 = vweird.f32 %v2947_v51 }
 0x399   : > { %v2301_v57 = vsel %vm2298_vm8, %v2300_v6, %v2296_v61  ;;  %v2312_v22 = vadd.f32 1.0, %v2949_v55  ;;  %vm2320_vm11 = vmor %vm2318_vm10, %vm2319_vm9 }
 0x39a   : > { %v2315_v35 = vsub.f32 1.0, %v2314_v13  ;;  %v2346_v54 = vmul.f32 %v2301_v57, %v5015_v21  ;;  %v2951_v21 = vpop.eup %2950 }
 0x39b   : > { %2952 = vrcp.f32 %v2312_v22  ;;  %v2339_v25 = vand.u32 2147483648, %v2312_v22  ;;  %v2337_v9 = vand.u32 2147483647, %v2312_v22 }
 0x39c   : > { %v2316_v20 = vmul.f32 %v2947_v51, %v2315_v35  ;;  %v2350_v41 = vadd.f32 %v2348_v5, %v2346_v54 }
 0x39e   : > { %v2317_v42 = vadd.f32 %v2947_v51, %v2316_v20  ;;  %2356 = vst [vmem:[#allocation5] sm:$0xff] %v2350_v41  ;;  %2954 = vtanh.f32 %v2350_v41 }
 0x3a0   : > { %v2321_v38 = vsel %vm2320_vm11, %v2947_v51, %v2317_v42 }
 0x3a1   : > { %v2953_v32 = vpop.eup %2952  ;;  %v2326_v10 = vsel %vm2323_vm12, %v2325_v7, %v2321_v38 }
 0x3a2   : > { %v2353_v14 = vmul.f32 %v2951_v21, %v2326_v10  ;;  %v2329_v56 = vmul.f32 %v2953_v32, %v2312_v22  ;;  %vm2334_vm13 = vweird.f32 %v2953_v32 }
 0x3a4   : > { %2357 = vst [vmem:[#allocation4] sm:$0xff] %v2353_v14  ;;  %v2330_v26 = vsub.f32 1.0, %v2329_v56 }
 0x3a5   : > { %2671 = vst [vmem:[%s3684_s15 + $0x18] sm:$0xff] %v2353_v14 }
 0x3a6   : > { %v2331_v47 = vmul.f32 %v2953_v32, %v2330_v26 }
 0x3a7   : > { %3291 = shalt.err (!%p3288_p0)
}
 0x3a8   : > { %s3429_s20 = smov 128   ;;  %s3430_s15 = smov 8   ;;  %v2332_v16 = vadd.f32 %v2953_v32, %v2331_v47  ;;  %vm2333_vm14 = vweird.f32 %v2312_v22  ;;  %v2340_v28 = vor.u32 1.1754944e-38, %v2339_v25  ;;  %vm2338_vm0 = vcmp.eq.f32.partialorder %v2337_v9, 8.507059e+37  ;;  %v2955_v63 = vpop.eup %2954 }
 0x3a9   : > { %2704 = dma.vmem_to_hbm [thread:$0]  (%p3598_p7), %s5050_s8, 512, %s5052_s26, %s2363_s0, %s3429_s20, %s3429_s20, %s3430_s15   ;;  %vm2335_vm15 = vmor %vm2333_vm14, %vm2334_vm13 }
 0x3aa   : > { %s5698_s7 = sld [smem:[#allocation147_spill]]  ;;  %v2336_v12 = vsel %vm2335_vm15, %v2953_v32, %v2332_v16  ;;  %s2400_s11 = sshll.u32 %s3686_s25, 4  ;;  %s2401_s11 = int_to_ptr.vmem [resolvable:$true] %s2400_s11 }
 0x3ab   : > { %v2341_v29 = vsel %vm2338_vm0, %v2340_v28, %v2336_v12  ;;  %s2368_s8 = scalar_lea.sflag [#allocation19], %s404_s27 }
 0x3ac   : > { %v2354_v3 = vmul.f32 %v2955_v63, %v2341_v29 }
 0x3ae   : > { %2358 = vst [vmem:[#allocation4 + $0x8] sm:$0xff] %v2354_v3 }
 0x3af   : > { %2361 = vst [vmem:[%s3686_s25] sm:$0xff] %v2354_v3 }
 0x3b0   : > { %s2399_s19 = scalar_lea.hbm %s5698_s7, %s5054_s4  ;;  %s3312_s12 = scalar_lea.hbm %s5698_s7, 64 }
 0x3b1   : > { %s2402_s17 = sshll.u32 %s2399_s19, 4  ;;  %s2403_s17 = int_to_ptr.hbm [resolvable:$true] %s2402_s17 }
 0x3b2   : > { %s3306_s26 = sshra.s32 %s2403_s17, 4  ;;  %s3307_s26 = int_to_ptr.hbm [resolvable:$true] %s3306_s26 }
 0x3b3   : > { %s3308_s4 = scalar_lea.hbm %s3307_s26, 32  ;;  %p3313_p5 = scmp.lt.s32.totalorder %s3307_s26, %s5698_s7 }
 0x3b4   : > { %p3309_p7 = scmp.ne.s32.totalorder %s3307_s26, %s3308_s4  ;;  %p3314_p3 = scmp.lt.s32.totalorder %s3312_s12, %s3308_s4 }
 0x3b6   : > { %p3310_p11 = pnand %p3309_p7, %p3633_p8  ;;  %p3315_p10 = por %p3314_p3, %p3313_p5 }
 0x3b8   : > { %p3311_p13 = pneg %p3310_p11 }
 0x3ba   : > { %p3316_p2 = pnand %p3315_p10, %p3311_p13 }
 0x3bc   : > { %3319 = shalt.err (!%p3316_p2)
}
 0x3bd   : > { %2705 = dma.vmem_to_hbm [thread:$0]  (%p3633_p8), %s2401_s11, 512, %s2403_s17, %s2368_s8, %s3429_s20, %s3429_s20, %s3430_s15  }
 0x3be PF: > { %s2417_s27 = sand.u32 1, %s3398_s30   ;;  %p5699_p6 = scmp.ge.s32.totalorder %s3418_s13, 2 }
 0x3bf   : > { %s2418_s25 = scalar_lea.sflag [#allocation8], %s2417_s27 }
 0x3c0   : > { %p2729_p9 = pnand %p5699_p6, %p3607_p12 }
 0x3c2   : > { %p2730_p4 = pneg %p2729_p9 }
 0x3c4   : > { %3377 = dma.done.wait (%p2730_p4), %s2418_s25, 512  }
 0x3c5   : > { %3379 = vsyncadd (%p2730_p4), %s2418_s25, 4294966784  ;;  %s5700_s22 = sld [smem:[#allocation27_spill]]  ;;  %p5702_p0 = pmov %p5699_p6 }
 0x3c7   : > { %p2732_p7 = pnand %p5702_p0, %p3614_p1 }
 0x3c9   : > { %p2733_p8 = pneg %p2732_p7 }
 0x3cb   : > { %s2427_s3 = sand.u32 1, %s5700_s22  }
 0x3cc   : > { %s2428_s20 = scalar_lea.sflag [#allocation19], %s2427_s3 }
 0x3cd   : > { %3381 = dma.done.wait (%p2733_p8), %s2428_s20, 512  }
 0x3ce   : > { %3383 = vsyncadd (%p2733_p8), %s2428_s20, 4294966784  ;;  %s33_s13 = sadd.s32 1, %s3418_s13   ;;  %s5703_s24 = sld [smem:[#allocation28_spill]] }
 0x3cf   : > { %p30_p11 = scmp.ge.s32.totalorder %s33_s13, 4   ;;  %s5704_s10 = sld [smem:[#allocation31_spill]] }
 0x3d0   : > { %s5705_s11 = sld [smem:[#allocation29_spill]]  ;;  %s5707_s27 = smov %s3390_s28 }
 0x3d1   : > { %s5706_s12 = sld [smem:[#allocation30_spill]]  ;;  %s5708_s28 = smov %s3394_s29 }
 0x3d2   : > { %s5709_s29 = smov %s3639_s23  ;;  %s5710_s30 = smov %s3402_s9 }
 0x3d3   :  { %32 = sbr.rel (!%p30_p11) target bundleno = 22 (0x16), region = 155 }
 0x3d4   : > { %s5711_s9 = smov %s5703_s24 }
 0x3d8   :  { %2434 = vsyncpa [#allocation7], 1 }
 0x3d9   :  { %2436 = vsyncpa [#allocation7 + $0x1], 1 }
 0x3da   :  { %2437 = vsyncpa [#allocation10], 1 }
 0x3db   :  { %2439 = vsyncpa [#allocation10 + $0x1], 1 }
 0x3dc   :  { %2440 = vsyncpa [#allocation13], 1 }
 0x3dd   :  { %2441 = vsyncpa [#allocation16], 1 }
 0x3de   :  { %2442 = vsyncpa [#allocation8], 1 }
 0x3df   :  { %2444 = vsyncpa [#allocation8 + $0x1], 1 }
 0x3e0   :  { %2445 = vsyncpa [#allocation19], 1 }
 0x3e1   :  { %2447 = vsyncpa [#allocation19 + $0x1], 1 }

</bundles_post_ra>
